<compile_context>
chip_gen: v6e
topology: v6e:2x2x1
jax: 0.10.0
libtpu: 0.0.40
codegen_flags: <defaults>
</compile_context>

<pallas_src>
import jax
import jax.numpy as jnp
import numpy as np
from jax.experimental import pallas as pl
from jax.experimental.pallas import tpu as pltpu


# -------------------- fused encoder + gather + GRU + out_fc kernel -----------
def fused_kernel(ids_ref, enc_in_ref, ew1_ref, eb1_ref, ew2_ref, eb2_ref,
                 embed_hbm, wih_ref, whh_ref, bih_ref, bhh_ref,
                 wout_ref, bout_ref, logit_ref, emb_scr, gather_sem):
    # ids_ref:    (T*Bp,) int32 SMEM (scalar prefetch), time-major (row = t*Bp + b)
    # enc_in_ref: (Bp, Dp)       zero-padded encoder input (p_target ++ nq_norm ++ 0)
    # ew1_ref:    (Dp, H), eb1: (1, H), ew2: (H, H), eb2: (1, H)
    # embed_hbm:  (V, H) f32, HBM resident (memory_space=pl.ANY)
    # wih_ref:    (H, 3H)  whh_ref: (H, 3H)  (transposed PyTorch weights, gates r,z,n)
    # bih_ref:    (1, 3H)  bhh_ref: (1, 3H)
    # wout_ref:   (H, Vp)  bout_ref: (1, Vp)   (zero-padded to 128 lanes)
    # logit_ref:  (T*Bp, Vp)
    # emb_scr:    (T*Bp, H) VMEM scratch for the gathered embedding rows
    H = wih_ref.shape[0]
    Bp = enc_in_ref.shape[0]
    TBp = emb_scr.shape[0]
    T = TBp // Bp

    # ---- 1) kick off the embedding-row gather DMAs (HBM -> VMEM scratch) ----
    # All copies share one DMA semaphore; every start is matched by a wait below.
    # TODO(synk): at production T*B, chunk this gather and pipeline it against the
    # recurrence (emit_pipeline / manual double-buffer) instead of gather-all upfront.
    def row_copy(k):
        return pltpu.make_async_copy(
            embed_hbm.at[pl.ds(ids_ref[k], 1), :],
            emb_scr.at[pl.ds(k, 1), :],
            gather_sem)

    for k in range(TBp):
        row_copy(k).start()

    # ---- 2) encoder MLP -> initial hidden state (Bp, H); overlaps with DMAs ----
    eh = jnp.dot(enc_in_ref[...], ew1_ref[...],
                 preferred_element_type=jnp.float32) + eb1_ref[...]
    eh = jnp.maximum(eh, 0.0)
    h = jnp.dot(eh, ew2_ref[...], preferred_element_type=jnp.float32) + eb2_ref[...]

    # ---- 3) wait for all embedding rows ----
    for k in range(TBp):
        row_copy(k).wait()

    # ---- 4) hoisted input-side GRU matmul for ALL timesteps: (T*Bp, 3H) ----
    gx_all = jnp.dot(emb_scr[...], wih_ref[...],
                     preferred_element_type=jnp.float32) + bih_ref[...]

    whh = whh_ref[...]
    bhh = bhh_ref[...]

    # ---- 5) serial GRU recurrence; h_t stays in vregs (no scratch round trip) ----
    # Slice offsets t*Bp are static multiples of 8 -> full-tile, unmasked accesses.
    # TODO(synk): for production T, switch to lax.fori_loop(..., unroll=4-8) over
    # pl.ds tile-aligned slices with a chunked VMEM scratch to bound vreg pressure.
    hs = []
    for t in range(T):
        gx = gx_all[t * Bp:(t + 1) * Bp, :]                                # (Bp, 3H)
        gh = jnp.dot(h, whh, preferred_element_type=jnp.float32) + bhh     # (Bp, 3H)
        r = jax.nn.sigmoid(gx[:, :H] + gh[:, :H])
        z = jax.nn.sigmoid(gx[:, H:2 * H] + gh[:, H:2 * H])
        n = jnp.tanh(gx[:, 2 * H:] + r * gh[:, 2 * H:])
        h = (1.0 - z) * n + z * h
        hs.append(h)

    # ---- 6) single batched, lane-dense output projection (one matmul, one store) ----
    h_all = jnp.concatenate(hs, axis=0)                                    # (T*Bp, H)
    logit_ref[...] = (jnp.dot(h_all, wout_ref[...],
                              preferred_element_type=jnp.float32) + bout_ref[...])


def run_fused(ids_flat, enc_in, ew1, eb1, ew2, eb2, embed,
              wih, whh, bih, bhh, wout, bout):
    TBp = ids_flat.shape[0]
    H = wih.shape[0]
    Vp = wout.shape[1]

    def vmem_spec():
        # Whole-array VMEM operand: grid=(1,) => no pipelining / double-buffering.
        return pl.BlockSpec(memory_space=pltpu.MemorySpace.VMEM)

    # TODO(synk): for production shapes, add a leading batch-half grid axis marked
    # "parallel" (v7x dual TensorCore) and re-tile over T chunks with an explicit
    # vmem_limit_bytes in CompilerParams.
    return pl.pallas_call(
        fused_kernel,
        out_shape=jax.ShapeDtypeStruct((TBp, Vp), jnp.float32),
        grid_spec=pltpu.PrefetchScalarGridSpec(
            num_scalar_prefetch=1,                     # ids_flat -> SMEM
            grid=(1,),
            in_specs=[
                vmem_spec(),                           # enc_in   (Bp, Dp)
                vmem_spec(), vmem_spec(),              # enc_w1.T (Dp,H), enc_b1 (1,H)
                vmem_spec(), vmem_spec(),              # enc_w2.T (H,H),  enc_b2 (1,H)
                pl.BlockSpec(memory_space=pl.ANY),     # embedding table (V,H) in HBM
                vmem_spec(), vmem_spec(),              # gru_wih.T, gru_whh.T (H,3H)
                vmem_spec(), vmem_spec(),              # gru_bih, gru_bhh (1,3H)
                vmem_spec(), vmem_spec(),              # out_w.T (H,Vp), out_b (1,Vp)
            ],
            out_specs=pl.BlockSpec((TBp, Vp), lambda i, ids: (0, 0)),
            scratch_shapes=[
                pltpu.VMEM((TBp, H), jnp.float32),     # gathered embeddings
                pltpu.SemaphoreType.DMA(()),           # shared gather semaphore
            ],
        ),
        compiler_params=pltpu.CompilerParams(dimension_semantics=("arbitrary",)),
    )(ids_flat, enc_in, ew1, eb1, ew2, eb2, embed, wih, whh, bih, bhh, wout, bout)


# ------------------------------- parameters ----------------------------------
def init_params(key, input_dim, vocab_size, hidden_dim):
    ks = jax.random.split(key, 12)

    def uniform(k, shape, fan_in):
        bound = 1.0 / np.sqrt(fan_in)
        return jax.random.uniform(k, shape, jnp.float32, -bound, bound)

    Din = input_dim + 1
    H = hidden_dim
    params = dict(
        # encoder: Linear(Din, H) -> ReLU -> Linear(H, H)
        enc_w1=uniform(ks[0], (H, Din), Din),
        enc_b1=uniform(ks[1], (H,), Din),
        enc_w2=uniform(ks[2], (H, H), H),
        enc_b2=uniform(ks[3], (H,), H),
        # embedding
        embed=jax.random.normal(ks[4], (vocab_size, H), jnp.float32),
        # GRU (PyTorch layout: (3H, in) with gate order r, z, n)
        gru_wih=uniform(ks[5], (3 * H, H), H),
        gru_whh=uniform(ks[6], (3 * H, H), H),
        gru_bih=uniform(ks[7], (3 * H,), H),
        gru_bhh=uniform(ks[8], (3 * H,), H),
        # out_fc: Linear(H, vocab)
        out_w=uniform(ks[9], (vocab_size, H), H),
        out_b=uniform(ks[10], (vocab_size,), H),
    )
    return params


def prepare_inference_params(params):
    """One-time transpose/pad of the weights into kernel layout (kept out of the
    per-call forward so no HBM transposes / pad materialization per call).
    All weights stay f32 to keep the 1e-4 tolerance; on v5e/v6e the non-recurrent
    operands (enc_w1_t, gru_wih_t, out_w_t) may optionally be cast to bf16."""
    H, Din = params["enc_w1"].shape            # Din = input_dim + 1
    V = params["out_w"].shape[0]
    Dp = ((Din + 127) // 128) * 128            # pad encoder K-dim to full lanes
    Vp = ((V + 127) // 128) * 128              # pad vocab to full lanes

    enc_w1_t = jnp.zeros((Dp, H), jnp.float32).at[:Din, :].set(params["enc_w1"].T)
    out_w_t = jnp.zeros((H, Vp), jnp.float32).at[:, :V].set(params["out_w"].T)
    out_b = jnp.zeros((1, Vp), jnp.float32).at[:, :V].set(params["out_b"][None, :])

    return dict(
        enc_w1_t=enc_w1_t,
        enc_b1=params["enc_b1"][None, :],
        enc_w2_t=params["enc_w2"].T,
        enc_b2=params["enc_b2"][None, :],
        embed=params["embed"],
        gru_wih_t=params["gru_wih"].T,
        gru_whh_t=params["gru_whh"].T,
        gru_bih=params["gru_bih"][None, :],
        gru_bhh=params["gru_bhh"][None, :],
        out_w_t=out_w_t,
        out_b=out_b,
    )


# ------------------------------- full model ----------------------------------
@jax.jit
def inverse_gen_forward(prep, p_target, num_qubits, tgt_ids):
    """p_target: (B, 64) f32, num_qubits: (B,) int, tgt_ids: (B, T) int -> (B, T, V)."""
    B, T = tgt_ids.shape
    Din = p_target.shape[1] + 1
    Dp = prep["enc_w1_t"].shape[0]
    V = prep["embed"].shape[0]
    Vp = prep["out_w_t"].shape[1]
    Bp = ((B + 7) // 8) * 8            # pad batch to one f32 sublane tile

    # encoder input, lane-padded to Dp and sublane-padded to Bp with zero rows/cols
    nq_norm = (num_qubits.astype(jnp.float32) / 6.0)[:, None]
    enc_in = jnp.concatenate(
        [p_target.astype(jnp.float32), nq_norm,
         jnp.zeros((B, Dp - Din), jnp.float32)], axis=1)
    enc_in = jnp.concatenate([enc_in, jnp.zeros((Bp - B, Dp), jnp.float32)], axis=0)

    # time-major flattened token ids (row = t*Bp + b); padded rows reuse token 0
    ids = jnp.zeros((Bp, T), jnp.int32).at[:B, :].set(tgt_ids.astype(jnp.int32))
    ids_flat = jnp.transpose(ids, (1, 0)).reshape(T * Bp)

    logits_pad = run_fused(
        ids_flat, enc_in,
        prep["enc_w1_t"], prep["enc_b1"], prep["enc_w2_t"], prep["enc_b2"],
        prep["embed"],
        prep["gru_wih_t"], prep["gru_whh_t"], prep["gru_bih"], prep["gru_bhh"],
        prep["out_w_t"], prep["out_b"])                       # (T*Bp, Vp)

    logits = logits_pad.reshape(T, Bp, Vp)[:, :B, :V]
    return jnp.transpose(logits, (1, 0, 2))                   # (B, T, V)


# ------------------------------ pure-JAX reference ----------------------------
def reference_forward(params, p_target, num_qubits, tgt_ids):
    H = params["enc_w1"].shape[0]
    nq_norm = (num_qubits.astype(jnp.float32) / 6.0)[:, None]
    enc_in = jnp.concatenate([p_target, nq_norm], axis=1)
    h = jax.nn.relu(enc_in @ params["enc_w1"].T + params["enc_b1"])
    ctx = h @ params["enc_w2"].T + params["enc_b2"]
    emb = params["embed"][tgt_ids]                                # (B, T, H)

    def step(hprev, x_t):
        gx = x_t @ params["gru_wih"].T + params["gru_bih"]
        gh = hprev @ params["gru_whh"].T + params["gru_bhh"]
        r = jax.nn.sigmoid(gx[:, :H] + gh[:, :H])
        z = jax.nn.sigmoid(gx[:, H:2 * H] + gh[:, H:2 * H])
        n = jnp.tanh(gx[:, 2 * H:] + r * gh[:, 2 * H:])
        hnew = (1.0 - z) * n + z * hprev
        return hnew, hnew

    _, outs = jax.lax.scan(step, ctx, jnp.transpose(emb, (1, 0, 2)))   # (T, B, H)
    outs = jnp.transpose(outs, (1, 0, 2))                              # (B, T, H)
    return outs @ params["out_w"].T + params["out_b"]


# ----------------------------------- main -------------------------------------
if __name__ == "__main__":
    B, T = 2, 8
    INPUT_DIM = 64          # p_target feature dim (module docstring: (B, 64))
    VOCAB = 32
    HIDDEN = 128

    key = jax.random.PRNGKey(0)
    kp, kx, kq, kt = jax.random.split(key, 4)

    params = init_params(kp, INPUT_DIM, VOCAB, HIDDEN)
    prep = prepare_inference_params(params)     # one-time weight layout prep

    p_target = jax.random.normal(kx, (B, INPUT_DIM), jnp.float32)
    num_qubits = jax.random.randint(kq, (B,), 2, 7, jnp.int32)
    tgt_ids = jax.random.randint(kt, (B, T), 0, VOCAB, jnp.int32)

    logits = inverse_gen_forward(prep, p_target, num_qubits, tgt_ids)
    logits = jax.block_until_ready(logits)
    assert logits.shape == (B, T, VOCAB), logits.shape

    ref = jax.block_until_ready(reference_forward(params, p_target, num_qubits, tgt_ids))
    np.testing.assert_allclose(np.asarray(logits), np.asarray(ref), rtol=1e-4, atol=1e-4)

    print("KERNEL_OK")
</pallas_src>

<mosaic_0001>
module attributes {stable_mosaic.version = 11 : i64} {
  func.func @fused_kernel(%arg0: i32, %arg1: memref<64xi32, #tpu.memory_space<smem>>, %arg2: memref<8x128xf32, #tpu.memory_space<vmem>>, %arg3: memref<128x128xf32, #tpu.memory_space<vmem>>, %arg4: memref<1x128xf32, #tpu.memory_space<vmem>>, %arg5: memref<128x128xf32, #tpu.memory_space<vmem>>, %arg6: memref<1x128xf32, #tpu.memory_space<vmem>>, %arg7: memref<32x128xf32, #tpu.memory_space<any>>, %arg8: memref<128x384xf32, #tpu.memory_space<vmem>>, %arg9: memref<128x384xf32, #tpu.memory_space<vmem>>, %arg10: memref<1x384xf32, #tpu.memory_space<vmem>>, %arg11: memref<1x384xf32, #tpu.memory_space<vmem>>, %arg12: memref<128x128xf32, #tpu.memory_space<vmem>>, %arg13: memref<1x128xf32, #tpu.memory_space<vmem>>, %arg14: memref<64x128xf32, #tpu.memory_space<vmem>>, %arg15: memref<64x128xf32, #tpu.memory_space<vmem>>, %arg16: memref<!tpu.dma_semaphore, #tpu.memory_space<semaphore_mem>>) attributes {dimension_semantics = [#tpu.dimension_semantics<arbitrary>], iteration_bounds = array<i64: 1>, scalar_prefetch = 1 : i64, scratch_operands = 2 : i64, tpu.core_type = #tpu.core_type<tc>, window_params = [{pipeline_mode = #tpu.pipeline_mode<synchronous>, transform_indices = @transform_0, window_bounds = array<i64: 8, 128>}, {pipeline_mode = #tpu.pipeline_mode<synchronous>, transform_indices = @transform_1, window_bounds = array<i64: 128, 128>}, {pipeline_mode = #tpu.pipeline_mode<synchronous>, transform_indices = @transform_2, window_bounds = array<i64: 1, 128>}, {pipeline_mode = #tpu.pipeline_mode<synchronous>, transform_indices = @transform_3, window_bounds = array<i64: 128, 128>}, {pipeline_mode = #tpu.pipeline_mode<synchronous>, transform_indices = @transform_4, window_bounds = array<i64: 1, 128>}, {}, {pipeline_mode = #tpu.pipeline_mode<synchronous>, transform_indices = @transform_6, window_bounds = array<i64: 128, 384>}, {pipeline_mode = #tpu.pipeline_mode<synchronous>, transform_indices = @transform_7, window_bounds = array<i64: 128, 384>}, {pipeline_mode = #tpu.pipeline_mode<synchronous>, transform_indices = @transform_8, window_bounds = array<i64: 1, 384>}, {pipeline_mode = #tpu.pipeline_mode<synchronous>, transform_indices = @transform_9, window_bounds = array<i64: 1, 384>}, {pipeline_mode = #tpu.pipeline_mode<synchronous>, transform_indices = @transform_10, window_bounds = array<i64: 128, 128>}, {pipeline_mode = #tpu.pipeline_mode<synchronous>, transform_indices = @transform_11, window_bounds = array<i64: 1, 128>}, {pipeline_mode = #tpu.pipeline_mode<synchronous>, transform_indices = @transform_12, window_bounds = array<i64: 64, 128>}]} {
    %c0 = arith.constant 0 : index
    %0 = memref.load %arg1[%c0] : memref<64xi32, #tpu.memory_space<smem>>
    %c0_i32 = arith.constant 0 : i32
    %1 = tpu.memref_slice %arg7[%0, %c0_i32] : memref<32x128xf32, #tpu.memory_space<any>> -> memref<1x128xf32, #tpu.memory_space<any>>
    %c0_i32_0 = arith.constant 0 : i32
    %c0_i32_1 = arith.constant 0 : i32
    %2 = tpu.memref_slice %arg15[%c0_i32_0, %c0_i32_1] : memref<64x128xf32, #tpu.memory_space<vmem>> -> memref<1x128xf32, #tpu.memory_space<vmem>>
    tpu.enqueue_dma source(%1 : memref<1x128xf32, #tpu.memory_space<any>>) target(%2 : memref<1x128xf32, #tpu.memory_space<vmem>>) target_semaphore(%arg16 : memref<!tpu.dma_semaphore, #tpu.memory_space<semaphore_mem>>)
    %c1 = arith.constant 1 : index
    %3 = memref.load %arg1[%c1] : memref<64xi32, #tpu.memory_space<smem>>
    %c0_i32_2 = arith.constant 0 : i32
    %4 = tpu.memref_slice %arg7[%3, %c0_i32_2] : memref<32x128xf32, #tpu.memory_space<any>> -> memref<1x128xf32, #tpu.memory_space<any>>
    %c1_i32 = arith.constant 1 : i32
    %c0_i32_3 = arith.constant 0 : i32
    %5 = tpu.memref_slice %arg15[%c1_i32, %c0_i32_3] : memref<64x128xf32, #tpu.memory_space<vmem>> -> memref<1x128xf32, #tpu.memory_space<vmem>>
    tpu.enqueue_dma source(%4 : memref<1x128xf32, #tpu.memory_space<any>>) target(%5 : memref<1x128xf32, #tpu.memory_space<vmem>>) target_semaphore(%arg16 : memref<!tpu.dma_semaphore, #tpu.memory_space<semaphore_mem>>)
    %c2 = arith.constant 2 : index
    %6 = memref.load %arg1[%c2] : memref<64xi32, #tpu.memory_space<smem>>
    %c0_i32_4 = arith.constant 0 : i32
    %7 = tpu.memref_slice %arg7[%6, %c0_i32_4] : memref<32x128xf32, #tpu.memory_space<any>> -> memref<1x128xf32, #tpu.memory_space<any>>
    %c2_i32 = arith.constant 2 : i32
    %c0_i32_5 = arith.constant 0 : i32
    %8 = tpu.memref_slice %arg15[%c2_i32, %c0_i32_5] : memref<64x128xf32, #tpu.memory_space<vmem>> -> memref<1x128xf32, #tpu.memory_space<vmem>>
    tpu.enqueue_dma source(%7 : memref<1x128xf32, #tpu.memory_space<any>>) target(%8 : memref<1x128xf32, #tpu.memory_space<vmem>>) target_semaphore(%arg16 : memref<!tpu.dma_semaphore, #tpu.memory_space<semaphore_mem>>)
    %c3 = arith.constant 3 : index
    %9 = memref.load %arg1[%c3] : memref<64xi32, #tpu.memory_space<smem>>
    %c0_i32_6 = arith.constant 0 : i32
    %10 = tpu.memref_slice %arg7[%9, %c0_i32_6] : memref<32x128xf32, #tpu.memory_space<any>> -> memref<1x128xf32, #tpu.memory_space<any>>
    %c3_i32 = arith.constant 3 : i32
    %c0_i32_7 = arith.constant 0 : i32
    %11 = tpu.memref_slice %arg15[%c3_i32, %c0_i32_7] : memref<64x128xf32, #tpu.memory_space<vmem>> -> memref<1x128xf32, #tpu.memory_space<vmem>>
    tpu.enqueue_dma source(%10 : memref<1x128xf32, #tpu.memory_space<any>>) target(%11 : memref<1x128xf32, #tpu.memory_space<vmem>>) target_semaphore(%arg16 : memref<!tpu.dma_semaphore, #tpu.memory_space<semaphore_mem>>)
    %c4 = arith.constant 4 : index
    %12 = memref.load %arg1[%c4] : memref<64xi32, #tpu.memory_space<smem>>
    %c0_i32_8 = arith.constant 0 : i32
    %13 = tpu.memref_slice %arg7[%12, %c0_i32_8] : memref<32x128xf32, #tpu.memory_space<any>> -> memref<1x128xf32, #tpu.memory_space<any>>
    %c4_i32 = arith.constant 4 : i32
    %c0_i32_9 = arith.constant 0 : i32
    %14 = tpu.memref_slice %arg15[%c4_i32, %c0_i32_9] : memref<64x128xf32, #tpu.memory_space<vmem>> -> memref<1x128xf32, #tpu.memory_space<vmem>>
    tpu.enqueue_dma source(%13 : memref<1x128xf32, #tpu.memory_space<any>>) target(%14 : memref<1x128xf32, #tpu.memory_space<vmem>>) target_semaphore(%arg16 : memref<!tpu.dma_semaphore, #tpu.memory_space<semaphore_mem>>)
    %c5 = arith.constant 5 : index
    %15 = memref.load %arg1[%c5] : memref<64xi32, #tpu.memory_space<smem>>
    %c0_i32_10 = arith.constant 0 : i32
    %16 = tpu.memref_slice %arg7[%15, %c0_i32_10] : memref<32x128xf32, #tpu.memory_space<any>> -> memref<1x128xf32, #tpu.memory_space<any>>
    %c5_i32 = arith.constant 5 : i32
    %c0_i32_11 = arith.constant 0 : i32
    %17 = tpu.memref_slice %arg15[%c5_i32, %c0_i32_11] : memref<64x128xf32, #tpu.memory_space<vmem>> -> memref<1x128xf32, #tpu.memory_space<vmem>>
    tpu.enqueue_dma source(%16 : memref<1x128xf32, #tpu.memory_space<any>>) target(%17 : memref<1x128xf32, #tpu.memory_space<vmem>>) target_semaphore(%arg16 : memref<!tpu.dma_semaphore, #tpu.memory_space<semaphore_mem>>)
    %c6 = arith.constant 6 : index
    %18 = memref.load %arg1[%c6] : memref<64xi32, #tpu.memory_space<smem>>
    %c0_i32_12 = arith.constant 0 : i32
    %19 = tpu.memref_slice %arg7[%18, %c0_i32_12] : memref<32x128xf32, #tpu.memory_space<any>> -> memref<1x128xf32, #tpu.memory_space<any>>
    %c6_i32 = arith.constant 6 : i32
    %c0_i32_13 = arith.constant 0 : i32
    %20 = tpu.memref_slice %arg15[%c6_i32, %c0_i32_13] : memref<64x128xf32, #tpu.memory_space<vmem>> -> memref<1x128xf32, #tpu.memory_space<vmem>>
    tpu.enqueue_dma source(%19 : memref<1x128xf32, #tpu.memory_space<any>>) target(%20 : memref<1x128xf32, #tpu.memory_space<vmem>>) target_semaphore(%arg16 : memref<!tpu.dma_semaphore, #tpu.memory_space<semaphore_mem>>)
    %c7 = arith.constant 7 : index
    %21 = memref.load %arg1[%c7] : memref<64xi32, #tpu.memory_space<smem>>
    %c0_i32_14 = arith.constant 0 : i32
    %22 = tpu.memref_slice %arg7[%21, %c0_i32_14] : memref<32x128xf32, #tpu.memory_space<any>> -> memref<1x128xf32, #tpu.memory_space<any>>
    %c7_i32 = arith.constant 7 : i32
    %c0_i32_15 = arith.constant 0 : i32
    %23 = tpu.memref_slice %arg15[%c7_i32, %c0_i32_15] : memref<64x128xf32, #tpu.memory_space<vmem>> -> memref<1x128xf32, #tpu.memory_space<vmem>>
    tpu.enqueue_dma source(%22 : memref<1x128xf32, #tpu.memory_space<any>>) target(%23 : memref<1x128xf32, #tpu.memory_space<vmem>>) target_semaphore(%arg16 : memref<!tpu.dma_semaphore, #tpu.memory_space<semaphore_mem>>)
    %c8 = arith.constant 8 : index
    %24 = memref.load %arg1[%c8] : memref<64xi32, #tpu.memory_space<smem>>
    %c0_i32_16 = arith.constant 0 : i32
    %25 = tpu.memref_slice %arg7[%24, %c0_i32_16] : memref<32x128xf32, #tpu.memory_space<any>> -> memref<1x128xf32, #tpu.memory_space<any>>
    %c8_i32 = arith.constant 8 : i32
    %c0_i32_17 = arith.constant 0 : i32
    %26 = tpu.memref_slice %arg15[%c8_i32, %c0_i32_17] : memref<64x128xf32, #tpu.memory_space<vmem>> -> memref<1x128xf32, #tpu.memory_space<vmem>>
    tpu.enqueue_dma source(%25 : memref<1x128xf32, #tpu.memory_space<any>>) target(%26 : memref<1x128xf32, #tpu.memory_space<vmem>>) target_semaphore(%arg16 : memref<!tpu.dma_semaphore, #tpu.memory_space<semaphore_mem>>)
    %c9 = arith.constant 9 : index
    %27 = memref.load %arg1[%c9] : memref<64xi32, #tpu.memory_space<smem>>
    %c0_i32_18 = arith.constant 0 : i32
    %28 = tpu.memref_slice %arg7[%27, %c0_i32_18] : memref<32x128xf32, #tpu.memory_space<any>> -> memref<1x128xf32, #tpu.memory_space<any>>
    %c9_i32 = arith.constant 9 : i32
    %c0_i32_19 = arith.constant 0 : i32
    %29 = tpu.memref_slice %arg15[%c9_i32, %c0_i32_19] : memref<64x128xf32, #tpu.memory_space<vmem>> -> memref<1x128xf32, #tpu.memory_space<vmem>>
    tpu.enqueue_dma source(%28 : memref<1x128xf32, #tpu.memory_space<any>>) target(%29 : memref<1x128xf32, #tpu.memory_space<vmem>>) target_semaphore(%arg16 : memref<!tpu.dma_semaphore, #tpu.memory_space<semaphore_mem>>)
    %c10 = arith.constant 10 : index
    %30 = memref.load %arg1[%c10] : memref<64xi32, #tpu.memory_space<smem>>
    %c0_i32_20 = arith.constant 0 : i32
    %31 = tpu.memref_slice %arg7[%30, %c0_i32_20] : memref<32x128xf32, #tpu.memory_space<any>> -> memref<1x128xf32, #tpu.memory_space<any>>
    %c10_i32 = arith.constant 10 : i32
    %c0_i32_21 = arith.constant 0 : i32
    %32 = tpu.memref_slice %arg15[%c10_i32, %c0_i32_21] : memref<64x128xf32, #tpu.memory_space<vmem>> -> memref<1x128xf32, #tpu.memory_space<vmem>>
    tpu.enqueue_dma source(%31 : memref<1x128xf32, #tpu.memory_space<any>>) target(%32 : memref<1x128xf32, #tpu.memory_space<vmem>>) target_semaphore(%arg16 : memref<!tpu.dma_semaphore, #tpu.memory_space<semaphore_mem>>)
    %c11 = arith.constant 11 : index
    %33 = memref.load %arg1[%c11] : memref<64xi32, #tpu.memory_space<smem>>
    %c0_i32_22 = arith.constant 0 : i32
    %34 = tpu.memref_slice %arg7[%33, %c0_i32_22] : memref<32x128xf32, #tpu.memory_space<any>> -> memref<1x128xf32, #tpu.memory_space<any>>
    %c11_i32 = arith.constant 11 : i32
    %c0_i32_23 = arith.constant 0 : i32
    %35 = tpu.memref_slice %arg15[%c11_i32, %c0_i32_23] : memref<64x128xf32, #tpu.memory_space<vmem>> -> memref<1x128xf32, #tpu.memory_space<vmem>>
    tpu.enqueue_dma source(%34 : memref<1x128xf32, #tpu.memory_space<any>>) target(%35 : memref<1x128xf32, #tpu.memory_space<vmem>>) target_semaphore(%arg16 : memref<!tpu.dma_semaphore, #tpu.memory_space<semaphore_mem>>)
    %c12 = arith.constant 12 : index
    %36 = memref.load %arg1[%c12] : memref<64xi32, #tpu.memory_space<smem>>
    %c0_i32_24 = arith.constant 0 : i32
    %37 = tpu.memref_slice %arg7[%36, %c0_i32_24] : memref<32x128xf32, #tpu.memory_space<any>> -> memref<1x128xf32, #tpu.memory_space<any>>
    %c12_i32 = arith.constant 12 : i32
    %c0_i32_25 = arith.constant 0 : i32
    %38 = tpu.memref_slice %arg15[%c12_i32, %c0_i32_25] : memref<64x128xf32, #tpu.memory_space<vmem>> -> memref<1x128xf32, #tpu.memory_space<vmem>>
    tpu.enqueue_dma source(%37 : memref<1x128xf32, #tpu.memory_space<any>>) target(%38 : memref<1x128xf32, #tpu.memory_space<vmem>>) target_semaphore(%arg16 : memref<!tpu.dma_semaphore, #tpu.memory_space<semaphore_mem>>)
    %c13 = arith.constant 13 : index
    %39 = memref.load %arg1[%c13] : memref<64xi32, #tpu.memory_space<smem>>
    %c0_i32_26 = arith.constant 0 : i32
    %40 = tpu.memref_slice %arg7[%39, %c0_i32_26] : memref<32x128xf32, #tpu.memory_space<any>> -> memref<1x128xf32, #tpu.memory_space<any>>
    %c13_i32 = arith.constant 13 : i32
    %c0_i32_27 = arith.constant 0 : i32
    %41 = tpu.memref_slice %arg15[%c13_i32, %c0_i32_27] : memref<64x128xf32, #tpu.memory_space<vmem>> -> memref<1x128xf32, #tpu.memory_space<vmem>>
    tpu.enqueue_dma source(%40 : memref<1x128xf32, #tpu.memory_space<any>>) target(%41 : memref<1x128xf32, #tpu.memory_space<vmem>>) target_semaphore(%arg16 : memref<!tpu.dma_semaphore, #tpu.memory_space<semaphore_mem>>)
    %c14 = arith.constant 14 : index
    %42 = memref.load %arg1[%c14] : memref<64xi32, #tpu.memory_space<smem>>
    %c0_i32_28 = arith.constant 0 : i32
    %43 = tpu.memref_slice %arg7[%42, %c0_i32_28] : memref<32x128xf32, #tpu.memory_space<any>> -> memref<1x128xf32, #tpu.memory_space<any>>
    %c14_i32 = arith.constant 14 : i32
    %c0_i32_29 = arith.constant 0 : i32
    %44 = tpu.memref_slice %arg15[%c14_i32, %c0_i32_29] : memref<64x128xf32, #tpu.memory_space<vmem>> -> memref<1x128xf32, #tpu.memory_space<vmem>>
    tpu.enqueue_dma source(%43 : memref<1x128xf32, #tpu.memory_space<any>>) target(%44 : memref<1x128xf32, #tpu.memory_space<vmem>>) target_semaphore(%arg16 : memref<!tpu.dma_semaphore, #tpu.memory_space<semaphore_mem>>)
    %c15 = arith.constant 15 : index
    %45 = memref.load %arg1[%c15] : memref<64xi32, #tpu.memory_space<smem>>
    %c0_i32_30 = arith.constant 0 : i32
    %46 = tpu.memref_slice %arg7[%45, %c0_i32_30] : memref<32x128xf32, #tpu.memory_space<any>> -> memref<1x128xf32, #tpu.memory_space<any>>
    %c15_i32 = arith.constant 15 : i32
    %c0_i32_31 = arith.constant 0 : i32
    %47 = tpu.memref_slice %arg15[%c15_i32, %c0_i32_31] : memref<64x128xf32, #tpu.memory_space<vmem>> -> memref<1x128xf32, #tpu.memory_space<vmem>>
    tpu.enqueue_dma source(%46 : memref<1x128xf32, #tpu.memory_space<any>>) target(%47 : memref<1x128xf32, #tpu.memory_space<vmem>>) target_semaphore(%arg16 : memref<!tpu.dma_semaphore, #tpu.memory_space<semaphore_mem>>)
    %c16 = arith.constant 16 : index
    %48 = memref.load %arg1[%c16] : memref<64xi32, #tpu.memory_space<smem>>
    %c0_i32_32 = arith.constant 0 : i32
    %49 = tpu.memref_slice %arg7[%48, %c0_i32_32] : memref<32x128xf32, #tpu.memory_space<any>> -> memref<1x128xf32, #tpu.memory_space<any>>
    %c16_i32 = arith.constant 16 : i32
    %c0_i32_33 = arith.constant 0 : i32
    %50 = tpu.memref_slice %arg15[%c16_i32, %c0_i32_33] : memref<64x128xf32, #tpu.memory_space<vmem>> -> memref<1x128xf32, #tpu.memory_space<vmem>>
    tpu.enqueue_dma source(%49 : memref<1x128xf32, #tpu.memory_space<any>>) target(%50 : memref<1x128xf32, #tpu.memory_space<vmem>>) target_semaphore(%arg16 : memref<!tpu.dma_semaphore, #tpu.memory_space<semaphore_mem>>)
    %c17 = arith.constant 17 : index
    %51 = memref.load %arg1[%c17] : memref<64xi32, #tpu.memory_space<smem>>
    %c0_i32_34 = arith.constant 0 : i32
    %52 = tpu.memref_slice %arg7[%51, %c0_i32_34] : memref<32x128xf32, #tpu.memory_space<any>> -> memref<1x128xf32, #tpu.memory_space<any>>
    %c17_i32 = arith.constant 17 : i32
    %c0_i32_35 = arith.constant 0 : i32
    %53 = tpu.memref_slice %arg15[%c17_i32, %c0_i32_35] : memref<64x128xf32, #tpu.memory_space<vmem>> -> memref<1x128xf32, #tpu.memory_space<vmem>>
    tpu.enqueue_dma source(%52 : memref<1x128xf32, #tpu.memory_space<any>>) target(%53 : memref<1x128xf32, #tpu.memory_space<vmem>>) target_semaphore(%arg16 : memref<!tpu.dma_semaphore, #tpu.memory_space<semaphore_mem>>)
    %c18 = arith.constant 18 : index
    %54 = memref.load %arg1[%c18] : memref<64xi32, #tpu.memory_space<smem>>
    %c0_i32_36 = arith.constant 0 : i32
    %55 = tpu.memref_slice %arg7[%54, %c0_i32_36] : memref<32x128xf32, #tpu.memory_space<any>> -> memref<1x128xf32, #tpu.memory_space<any>>
    %c18_i32 = arith.constant 18 : i32
    %c0_i32_37 = arith.constant 0 : i32
    %56 = tpu.memref_slice %arg15[%c18_i32, %c0_i32_37] : memref<64x128xf32, #tpu.memory_space<vmem>> -> memref<1x128xf32, #tpu.memory_space<vmem>>
    tpu.enqueue_dma source(%55 : memref<1x128xf32, #tpu.memory_space<any>>) target(%56 : memref<1x128xf32, #tpu.memory_space<vmem>>) target_semaphore(%arg16 : memref<!tpu.dma_semaphore, #tpu.memory_space<semaphore_mem>>)
    %c19 = arith.constant 19 : index
    %57 = memref.load %arg1[%c19] : memref<64xi32, #tpu.memory_space<smem>>
    %c0_i32_38 = arith.constant 0 : i32
    %58 = tpu.memref_slice %arg7[%57, %c0_i32_38] : memref<32x128xf32, #tpu.memory_space<any>> -> memref<1x128xf32, #tpu.memory_space<any>>
    %c19_i32 = arith.constant 19 : i32
    %c0_i32_39 = arith.constant 0 : i32
    %59 = tpu.memref_slice %arg15[%c19_i32, %c0_i32_39] : memref<64x128xf32, #tpu.memory_space<vmem>> -> memref<1x128xf32, #tpu.memory_space<vmem>>
    tpu.enqueue_dma source(%58 : memref<1x128xf32, #tpu.memory_space<any>>) target(%59 : memref<1x128xf32, #tpu.memory_space<vmem>>) target_semaphore(%arg16 : memref<!tpu.dma_semaphore, #tpu.memory_space<semaphore_mem>>)
    %c20 = arith.constant 20 : index
    %60 = memref.load %arg1[%c20] : memref<64xi32, #tpu.memory_space<smem>>
    %c0_i32_40 = arith.constant 0 : i32
    %61 = tpu.memref_slice %arg7[%60, %c0_i32_40] : memref<32x128xf32, #tpu.memory_space<any>> -> memref<1x128xf32, #tpu.memory_space<any>>
    %c20_i32 = arith.constant 20 : i32
    %c0_i32_41 = arith.constant 0 : i32
    %62 = tpu.memref_slice %arg15[%c20_i32, %c0_i32_41] : memref<64x128xf32, #tpu.memory_space<vmem>> -> memref<1x128xf32, #tpu.memory_space<vmem>>
    tpu.enqueue_dma source(%61 : memref<1x128xf32, #tpu.memory_space<any>>) target(%62 : memref<1x128xf32, #tpu.memory_space<vmem>>) target_semaphore(%arg16 : memref<!tpu.dma_semaphore, #tpu.memory_space<semaphore_mem>>)
    %c21 = arith.constant 21 : index
    %63 = memref.load %arg1[%c21] : memref<64xi32, #tpu.memory_space<smem>>
    %c0_i32_42 = arith.constant 0 : i32
    %64 = tpu.memref_slice %arg7[%63, %c0_i32_42] : memref<32x128xf32, #tpu.memory_space<any>> -> memref<1x128xf32, #tpu.memory_space<any>>
    %c21_i32 = arith.constant 21 : i32
    %c0_i32_43 = arith.constant 0 : i32
    %65 = tpu.memref_slice %arg15[%c21_i32, %c0_i32_43] : memref<64x128xf32, #tpu.memory_space<vmem>> -> memref<1x128xf32, #tpu.memory_space<vmem>>
    tpu.enqueue_dma source(%64 : memref<1x128xf32, #tpu.memory_space<any>>) target(%65 : memref<1x128xf32, #tpu.memory_space<vmem>>) target_semaphore(%arg16 : memref<!tpu.dma_semaphore, #tpu.memory_space<semaphore_mem>>)
    %c22 = arith.constant 22 : index
    %66 = memref.load %arg1[%c22] : memref<64xi32, #tpu.memory_space<smem>>
    %c0_i32_44 = arith.constant 0 : i32
    %67 = tpu.memref_slice %arg7[%66, %c0_i32_44] : memref<32x128xf32, #tpu.memory_space<any>> -> memref<1x128xf32, #tpu.memory_space<any>>
    %c22_i32 = arith.constant 22 : i32
    %c0_i32_45 = arith.constant 0 : i32
    %68 = tpu.memref_slice %arg15[%c22_i32, %c0_i32_45] : memref<64x128xf32, #tpu.memory_space<vmem>> -> memref<1x128xf32, #tpu.memory_space<vmem>>
    tpu.enqueue_dma source(%67 : memref<1x128xf32, #tpu.memory_space<any>>) target(%68 : memref<1x128xf32, #tpu.memory_space<vmem>>) target_semaphore(%arg16 : memref<!tpu.dma_semaphore, #tpu.memory_space<semaphore_mem>>)
    %c23 = arith.constant 23 : index
    %69 = memref.load %arg1[%c23] : memref<64xi32, #tpu.memory_space<smem>>
    %c0_i32_46 = arith.constant 0 : i32
    %70 = tpu.memref_slice %arg7[%69, %c0_i32_46] : memref<32x128xf32, #tpu.memory_space<any>> -> memref<1x128xf32, #tpu.memory_space<any>>
    %c23_i32 = arith.constant 23 : i32
    %c0_i32_47 = arith.constant 0 : i32
    %71 = tpu.memref_slice %arg15[%c23_i32, %c0_i32_47] : memref<64x128xf32, #tpu.memory_space<vmem>> -> memref<1x128xf32, #tpu.memory_space<vmem>>
    tpu.enqueue_dma source(%70 : memref<1x128xf32, #tpu.memory_space<any>>) target(%71 : memref<1x128xf32, #tpu.memory_space<vmem>>) target_semaphore(%arg16 : memref<!tpu.dma_semaphore, #tpu.memory_space<semaphore_mem>>)
    %c24 = arith.constant 24 : index
    %72 = memref.load %arg1[%c24] : memref<64xi32, #tpu.memory_space<smem>>
    %c0_i32_48 = arith.constant 0 : i32
    %73 = tpu.memref_slice %arg7[%72, %c0_i32_48] : memref<32x128xf32, #tpu.memory_space<any>> -> memref<1x128xf32, #tpu.memory_space<any>>
    %c24_i32 = arith.constant 24 : i32
    %c0_i32_49 = arith.constant 0 : i32
    %74 = tpu.memref_slice %arg15[%c24_i32, %c0_i32_49] : memref<64x128xf32, #tpu.memory_space<vmem>> -> memref<1x128xf32, #tpu.memory_space<vmem>>
    tpu.enqueue_dma source(%73 : memref<1x128xf32, #tpu.memory_space<any>>) target(%74 : memref<1x128xf32, #tpu.memory_space<vmem>>) target_semaphore(%arg16 : memref<!tpu.dma_semaphore, #tpu.memory_space<semaphore_mem>>)
    %c25 = arith.constant 25 : index
    %75 = memref.load %arg1[%c25] : memref<64xi32, #tpu.memory_space<smem>>
    %c0_i32_50 = arith.constant 0 : i32
    %76 = tpu.memref_slice %arg7[%75, %c0_i32_50] : memref<32x128xf32, #tpu.memory_space<any>> -> memref<1x128xf32, #tpu.memory_space<any>>
    %c25_i32 = arith.constant 25 : i32
    %c0_i32_51 = arith.constant 0 : i32
    %77 = tpu.memref_slice %arg15[%c25_i32, %c0_i32_51] : memref<64x128xf32, #tpu.memory_space<vmem>> -> memref<1x128xf32, #tpu.memory_space<vmem>>
    tpu.enqueue_dma source(%76 : memref<1x128xf32, #tpu.memory_space<any>>) target(%77 : memref<1x128xf32, #tpu.memory_space<vmem>>) target_semaphore(%arg16 : memref<!tpu.dma_semaphore, #tpu.memory_space<semaphore_mem>>)
    %c26 = arith.constant 26 : index
    %78 = memref.load %arg1[%c26] : memref<64xi32, #tpu.memory_space<smem>>
    %c0_i32_52 = arith.constant 0 : i32
    %79 = tpu.memref_slice %arg7[%78, %c0_i32_52] : memref<32x128xf32, #tpu.memory_space<any>> -> memref<1x128xf32, #tpu.memory_space<any>>
    %c26_i32 = arith.constant 26 : i32
    %c0_i32_53 = arith.constant 0 : i32
    %80 = tpu.memref_slice %arg15[%c26_i32, %c0_i32_53] : memref<64x128xf32, #tpu.memory_space<vmem>> -> memref<1x128xf32, #tpu.memory_space<vmem>>
    tpu.enqueue_dma source(%79 : memref<1x128xf32, #tpu.memory_space<any>>) target(%80 : memref<1x128xf32, #tpu.memory_space<vmem>>) target_semaphore(%arg16 : memref<!tpu.dma_semaphore, #tpu.memory_space<semaphore_mem>>)
    %c27 = arith.constant 27 : index
    %81 = memref.load %arg1[%c27] : memref<64xi32, #tpu.memory_space<smem>>
    %c0_i32_54 = arith.constant 0 : i32
    %82 = tpu.memref_slice %arg7[%81, %c0_i32_54] : memref<32x128xf32, #tpu.memory_space<any>> -> memref<1x128xf32, #tpu.memory_space<any>>
    %c27_i32 = arith.constant 27 : i32
    %c0_i32_55 = arith.constant 0 : i32
    %83 = tpu.memref_slice %arg15[%c27_i32, %c0_i32_55] : memref<64x128xf32, #tpu.memory_space<vmem>> -> memref<1x128xf32, #tpu.memory_space<vmem>>
    tpu.enqueue_dma source(%82 : memref<1x128xf32, #tpu.memory_space<any>>) target(%83 : memref<1x128xf32, #tpu.memory_space<vmem>>) target_semaphore(%arg16 : memref<!tpu.dma_semaphore, #tpu.memory_space<semaphore_mem>>)
    %c28 = arith.constant 28 : index
    %84 = memref.load %arg1[%c28] : memref<64xi32, #tpu.memory_space<smem>>
    %c0_i32_56 = arith.constant 0 : i32
    %85 = tpu.memref_slice %arg7[%84, %c0_i32_56] : memref<32x128xf32, #tpu.memory_space<any>> -> memref<1x128xf32, #tpu.memory_space<any>>
    %c28_i32 = arith.constant 28 : i32
    %c0_i32_57 = arith.constant 0 : i32
    %86 = tpu.memref_slice %arg15[%c28_i32, %c0_i32_57] : memref<64x128xf32, #tpu.memory_space<vmem>> -> memref<1x128xf32, #tpu.memory_space<vmem>>
    tpu.enqueue_dma source(%85 : memref<1x128xf32, #tpu.memory_space<any>>) target(%86 : memref<1x128xf32, #tpu.memory_space<vmem>>) target_semaphore(%arg16 : memref<!tpu.dma_semaphore, #tpu.memory_space<semaphore_mem>>)
    %c29 = arith.constant 29 : index
    %87 = memref.load %arg1[%c29] : memref<64xi32, #tpu.memory_space<smem>>
    %c0_i32_58 = arith.constant 0 : i32
    %88 = tpu.memref_slice %arg7[%87, %c0_i32_58] : memref<32x128xf32, #tpu.memory_space<any>> -> memref<1x128xf32, #tpu.memory_space<any>>
    %c29_i32 = arith.constant 29 : i32
    %c0_i32_59 = arith.constant 0 : i32
    %89 = tpu.memref_slice %arg15[%c29_i32, %c0_i32_59] : memref<64x128xf32, #tpu.memory_space<vmem>> -> memref<1x128xf32, #tpu.memory_space<vmem>>
    tpu.enqueue_dma source(%88 : memref<1x128xf32, #tpu.memory_space<any>>) target(%89 : memref<1x128xf32, #tpu.memory_space<vmem>>) target_semaphore(%arg16 : memref<!tpu.dma_semaphore, #tpu.memory_space<semaphore_mem>>)
    %c30 = arith.constant 30 : index
    %90 = memref.load %arg1[%c30] : memref<64xi32, #tpu.memory_space<smem>>
    %c0_i32_60 = arith.constant 0 : i32
    %91 = tpu.memref_slice %arg7[%90, %c0_i32_60] : memref<32x128xf32, #tpu.memory_space<any>> -> memref<1x128xf32, #tpu.memory_space<any>>
    %c30_i32 = arith.constant 30 : i32
    %c0_i32_61 = arith.constant 0 : i32
    %92 = tpu.memref_slice %arg15[%c30_i32, %c0_i32_61] : memref<64x128xf32, #tpu.memory_space<vmem>> -> memref<1x128xf32, #tpu.memory_space<vmem>>
    tpu.enqueue_dma source(%91 : memref<1x128xf32, #tpu.memory_space<any>>) target(%92 : memref<1x128xf32, #tpu.memory_space<vmem>>) target_semaphore(%arg16 : memref<!tpu.dma_semaphore, #tpu.memory_space<semaphore_mem>>)
    %c31 = arith.constant 31 : index
    %93 = memref.load %arg1[%c31] : memref<64xi32, #tpu.memory_space<smem>>
    %c0_i32_62 = arith.constant 0 : i32
    %94 = tpu.memref_slice %arg7[%93, %c0_i32_62] : memref<32x128xf32, #tpu.memory_space<any>> -> memref<1x128xf32, #tpu.memory_space<any>>
    %c31_i32 = arith.constant 31 : i32
    %c0_i32_63 = arith.constant 0 : i32
    %95 = tpu.memref_slice %arg15[%c31_i32, %c0_i32_63] : memref<64x128xf32, #tpu.memory_space<vmem>> -> memref<1x128xf32, #tpu.memory_space<vmem>>
    tpu.enqueue_dma source(%94 : memref<1x128xf32, #tpu.memory_space<any>>) target(%95 : memref<1x128xf32, #tpu.memory_space<vmem>>) target_semaphore(%arg16 : memref<!tpu.dma_semaphore, #tpu.memory_space<semaphore_mem>>)
    %c32 = arith.constant 32 : index
    %96 = memref.load %arg1[%c32] : memref<64xi32, #tpu.memory_space<smem>>
    %c0_i32_64 = arith.constant 0 : i32
    %97 = tpu.memref_slice %arg7[%96, %c0_i32_64] : memref<32x128xf32, #tpu.memory_space<any>> -> memref<1x128xf32, #tpu.memory_space<any>>
    %c32_i32 = arith.constant 32 : i32
    %c0_i32_65 = arith.constant 0 : i32
    %98 = tpu.memref_slice %arg15[%c32_i32, %c0_i32_65] : memref<64x128xf32, #tpu.memory_space<vmem>> -> memref<1x128xf32, #tpu.memory_space<vmem>>
    tpu.enqueue_dma source(%97 : memref<1x128xf32, #tpu.memory_space<any>>) target(%98 : memref<1x128xf32, #tpu.memory_space<vmem>>) target_semaphore(%arg16 : memref<!tpu.dma_semaphore, #tpu.memory_space<semaphore_mem>>)
    %c33 = arith.constant 33 : index
    %99 = memref.load %arg1[%c33] : memref<64xi32, #tpu.memory_space<smem>>
    %c0_i32_66 = arith.constant 0 : i32
    %100 = tpu.memref_slice %arg7[%99, %c0_i32_66] : memref<32x128xf32, #tpu.memory_space<any>> -> memref<1x128xf32, #tpu.memory_space<any>>
    %c33_i32 = arith.constant 33 : i32
    %c0_i32_67 = arith.constant 0 : i32
    %101 = tpu.memref_slice %arg15[%c33_i32, %c0_i32_67] : memref<64x128xf32, #tpu.memory_space<vmem>> -> memref<1x128xf32, #tpu.memory_space<vmem>>
    tpu.enqueue_dma source(%100 : memref<1x128xf32, #tpu.memory_space<any>>) target(%101 : memref<1x128xf32, #tpu.memory_space<vmem>>) target_semaphore(%arg16 : memref<!tpu.dma_semaphore, #tpu.memory_space<semaphore_mem>>)
    %c34 = arith.constant 34 : index
    %102 = memref.load %arg1[%c34] : memref<64xi32, #tpu.memory_space<smem>>
    %c0_i32_68 = arith.constant 0 : i32
    %103 = tpu.memref_slice %arg7[%102, %c0_i32_68] : memref<32x128xf32, #tpu.memory_space<any>> -> memref<1x128xf32, #tpu.memory_space<any>>
    %c34_i32 = arith.constant 34 : i32
    %c0_i32_69 = arith.constant 0 : i32
    %104 = tpu.memref_slice %arg15[%c34_i32, %c0_i32_69] : memref<64x128xf32, #tpu.memory_space<vmem>> -> memref<1x128xf32, #tpu.memory_space<vmem>>
    tpu.enqueue_dma source(%103 : memref<1x128xf32, #tpu.memory_space<any>>) target(%104 : memref<1x128xf32, #tpu.memory_space<vmem>>) target_semaphore(%arg16 : memref<!tpu.dma_semaphore, #tpu.memory_space<semaphore_mem>>)
    %c35 = arith.constant 35 : index
    %105 = memref.load %arg1[%c35] : memref<64xi32, #tpu.memory_space<smem>>
    %c0_i32_70 = arith.constant 0 : i32
    %106 = tpu.memref_slice %arg7[%105, %c0_i32_70] : memref<32x128xf32, #tpu.memory_space<any>> -> memref<1x128xf32, #tpu.memory_space<any>>
    %c35_i32 = arith.constant 35 : i32
    %c0_i32_71 = arith.constant 0 : i32
    %107 = tpu.memref_slice %arg15[%c35_i32, %c0_i32_71] : memref<64x128xf32, #tpu.memory_space<vmem>> -> memref<1x128xf32, #tpu.memory_space<vmem>>
    tpu.enqueue_dma source(%106 : memref<1x128xf32, #tpu.memory_space<any>>) target(%107 : memref<1x128xf32, #tpu.memory_space<vmem>>) target_semaphore(%arg16 : memref<!tpu.dma_semaphore, #tpu.memory_space<semaphore_mem>>)
    %c36 = arith.constant 36 : index
    %108 = memref.load %arg1[%c36] : memref<64xi32, #tpu.memory_space<smem>>
    %c0_i32_72 = arith.constant 0 : i32
    %109 = tpu.memref_slice %arg7[%108, %c0_i32_72] : memref<32x128xf32, #tpu.memory_space<any>> -> memref<1x128xf32, #tpu.memory_space<any>>
    %c36_i32 = arith.constant 36 : i32
    %c0_i32_73 = arith.constant 0 : i32
    %110 = tpu.memref_slice %arg15[%c36_i32, %c0_i32_73] : memref<64x128xf32, #tpu.memory_space<vmem>> -> memref<1x128xf32, #tpu.memory_space<vmem>>
    tpu.enqueue_dma source(%109 : memref<1x128xf32, #tpu.memory_space<any>>) target(%110 : memref<1x128xf32, #tpu.memory_space<vmem>>) target_semaphore(%arg16 : memref<!tpu.dma_semaphore, #tpu.memory_space<semaphore_mem>>)
    %c37 = arith.constant 37 : index
    %111 = memref.load %arg1[%c37] : memref<64xi32, #tpu.memory_space<smem>>
    %c0_i32_74 = arith.constant 0 : i32
    %112 = tpu.memref_slice %arg7[%111, %c0_i32_74] : memref<32x128xf32, #tpu.memory_space<any>> -> memref<1x128xf32, #tpu.memory_space<any>>
    %c37_i32 = arith.constant 37 : i32
    %c0_i32_75 = arith.constant 0 : i32
    %113 = tpu.memref_slice %arg15[%c37_i32, %c0_i32_75] : memref<64x128xf32, #tpu.memory_space<vmem>> -> memref<1x128xf32, #tpu.memory_space<vmem>>
    tpu.enqueue_dma source(%112 : memref<1x128xf32, #tpu.memory_space<any>>) target(%113 : memref<1x128xf32, #tpu.memory_space<vmem>>) target_semaphore(%arg16 : memref<!tpu.dma_semaphore, #tpu.memory_space<semaphore_mem>>)
    %c38 = arith.constant 38 : index
    %114 = memref.load %arg1[%c38] : memref<64xi32, #tpu.memory_space<smem>>
    %c0_i32_76 = arith.constant 0 : i32
    %115 = tpu.memref_slice %arg7[%114, %c0_i32_76] : memref<32x128xf32, #tpu.memory_space<any>> -> memref<1x128xf32, #tpu.memory_space<any>>
    %c38_i32 = arith.constant 38 : i32
    %c0_i32_77 = arith.constant 0 : i32
    %116 = tpu.memref_slice %arg15[%c38_i32, %c0_i32_77] : memref<64x128xf32, #tpu.memory_space<vmem>> -> memref<1x128xf32, #tpu.memory_space<vmem>>
    tpu.enqueue_dma source(%115 : memref<1x128xf32, #tpu.memory_space<any>>) target(%116 : memref<1x128xf32, #tpu.memory_space<vmem>>) target_semaphore(%arg16 : memref<!tpu.dma_semaphore, #tpu.memory_space<semaphore_mem>>)
    %c39 = arith.constant 39 : index
    %117 = memref.load %arg1[%c39] : memref<64xi32, #tpu.memory_space<smem>>
    %c0_i32_78 = arith.constant 0 : i32
    %118 = tpu.memref_slice %arg7[%117, %c0_i32_78] : memref<32x128xf32, #tpu.memory_space<any>> -> memref<1x128xf32, #tpu.memory_space<any>>
    %c39_i32 = arith.constant 39 : i32
    %c0_i32_79 = arith.constant 0 : i32
    %119 = tpu.memref_slice %arg15[%c39_i32, %c0_i32_79] : memref<64x128xf32, #tpu.memory_space<vmem>> -> memref<1x128xf32, #tpu.memory_space<vmem>>
    tpu.enqueue_dma source(%118 : memref<1x128xf32, #tpu.memory_space<any>>) target(%119 : memref<1x128xf32, #tpu.memory_space<vmem>>) target_semaphore(%arg16 : memref<!tpu.dma_semaphore, #tpu.memory_space<semaphore_mem>>)
    %c40 = arith.constant 40 : index
    %120 = memref.load %arg1[%c40] : memref<64xi32, #tpu.memory_space<smem>>
    %c0_i32_80 = arith.constant 0 : i32
    %121 = tpu.memref_slice %arg7[%120, %c0_i32_80] : memref<32x128xf32, #tpu.memory_space<any>> -> memref<1x128xf32, #tpu.memory_space<any>>
    %c40_i32 = arith.constant 40 : i32
    %c0_i32_81 = arith.constant 0 : i32
    %122 = tpu.memref_slice %arg15[%c40_i32, %c0_i32_81] : memref<64x128xf32, #tpu.memory_space<vmem>> -> memref<1x128xf32, #tpu.memory_space<vmem>>
    tpu.enqueue_dma source(%121 : memref<1x128xf32, #tpu.memory_space<any>>) target(%122 : memref<1x128xf32, #tpu.memory_space<vmem>>) target_semaphore(%arg16 : memref<!tpu.dma_semaphore, #tpu.memory_space<semaphore_mem>>)
    %c41 = arith.constant 41 : index
    %123 = memref.load %arg1[%c41] : memref<64xi32, #tpu.memory_space<smem>>
    %c0_i32_82 = arith.constant 0 : i32
    %124 = tpu.memref_slice %arg7[%123, %c0_i32_82] : memref<32x128xf32, #tpu.memory_space<any>> -> memref<1x128xf32, #tpu.memory_space<any>>
    %c41_i32 = arith.constant 41 : i32
    %c0_i32_83 = arith.constant 0 : i32
    %125 = tpu.memref_slice %arg15[%c41_i32, %c0_i32_83] : memref<64x128xf32, #tpu.memory_space<vmem>> -> memref<1x128xf32, #tpu.memory_space<vmem>>
    tpu.enqueue_dma source(%124 : memref<1x128xf32, #tpu.memory_space<any>>) target(%125 : memref<1x128xf32, #tpu.memory_space<vmem>>) target_semaphore(%arg16 : memref<!tpu.dma_semaphore, #tpu.memory_space<semaphore_mem>>)
    %c42 = arith.constant 42 : index
    %126 = memref.load %arg1[%c42] : memref<64xi32, #tpu.memory_space<smem>>
    %c0_i32_84 = arith.constant 0 : i32
    %127 = tpu.memref_slice %arg7[%126, %c0_i32_84] : memref<32x128xf32, #tpu.memory_space<any>> -> memref<1x128xf32, #tpu.memory_space<any>>
    %c42_i32 = arith.constant 42 : i32
    %c0_i32_85 = arith.constant 0 : i32
    %128 = tpu.memref_slice %arg15[%c42_i32, %c0_i32_85] : memref<64x128xf32, #tpu.memory_space<vmem>> -> memref<1x128xf32, #tpu.memory_space<vmem>>
    tpu.enqueue_dma source(%127 : memref<1x128xf32, #tpu.memory_space<any>>) target(%128 : memref<1x128xf32, #tpu.memory_space<vmem>>) target_semaphore(%arg16 : memref<!tpu.dma_semaphore, #tpu.memory_space<semaphore_mem>>)
    %c43 = arith.constant 43 : index
    %129 = memref.load %arg1[%c43] : memref<64xi32, #tpu.memory_space<smem>>
    %c0_i32_86 = arith.constant 0 : i32
    %130 = tpu.memref_slice %arg7[%129, %c0_i32_86] : memref<32x128xf32, #tpu.memory_space<any>> -> memref<1x128xf32, #tpu.memory_space<any>>
    %c43_i32 = arith.constant 43 : i32
    %c0_i32_87 = arith.constant 0 : i32
    %131 = tpu.memref_slice %arg15[%c43_i32, %c0_i32_87] : memref<64x128xf32, #tpu.memory_space<vmem>> -> memref<1x128xf32, #tpu.memory_space<vmem>>
    tpu.enqueue_dma source(%130 : memref<1x128xf32, #tpu.memory_space<any>>) target(%131 : memref<1x128xf32, #tpu.memory_space<vmem>>) target_semaphore(%arg16 : memref<!tpu.dma_semaphore, #tpu.memory_space<semaphore_mem>>)
    %c44 = arith.constant 44 : index
    %132 = memref.load %arg1[%c44] : memref<64xi32, #tpu.memory_space<smem>>
    %c0_i32_88 = arith.constant 0 : i32
    %133 = tpu.memref_slice %arg7[%132, %c0_i32_88] : memref<32x128xf32, #tpu.memory_space<any>> -> memref<1x128xf32, #tpu.memory_space<any>>
    %c44_i32 = arith.constant 44 : i32
    %c0_i32_89 = arith.constant 0 : i32
    %134 = tpu.memref_slice %arg15[%c44_i32, %c0_i32_89] : memref<64x128xf32, #tpu.memory_space<vmem>> -> memref<1x128xf32, #tpu.memory_space<vmem>>
    tpu.enqueue_dma source(%133 : memref<1x128xf32, #tpu.memory_space<any>>) target(%134 : memref<1x128xf32, #tpu.memory_space<vmem>>) target_semaphore(%arg16 : memref<!tpu.dma_semaphore, #tpu.memory_space<semaphore_mem>>)
    %c45 = arith.constant 45 : index
    %135 = memref.load %arg1[%c45] : memref<64xi32, #tpu.memory_space<smem>>
    %c0_i32_90 = arith.constant 0 : i32
    %136 = tpu.memref_slice %arg7[%135, %c0_i32_90] : memref<32x128xf32, #tpu.memory_space<any>> -> memref<1x128xf32, #tpu.memory_space<any>>
    %c45_i32 = arith.constant 45 : i32
    %c0_i32_91 = arith.constant 0 : i32
    %137 = tpu.memref_slice %arg15[%c45_i32, %c0_i32_91] : memref<64x128xf32, #tpu.memory_space<vmem>> -> memref<1x128xf32, #tpu.memory_space<vmem>>
    tpu.enqueue_dma source(%136 : memref<1x128xf32, #tpu.memory_space<any>>) target(%137 : memref<1x128xf32, #tpu.memory_space<vmem>>) target_semaphore(%arg16 : memref<!tpu.dma_semaphore, #tpu.memory_space<semaphore_mem>>)
    %c46 = arith.constant 46 : index
    %138 = memref.load %arg1[%c46] : memref<64xi32, #tpu.memory_space<smem>>
    %c0_i32_92 = arith.constant 0 : i32
    %139 = tpu.memref_slice %arg7[%138, %c0_i32_92] : memref<32x128xf32, #tpu.memory_space<any>> -> memref<1x128xf32, #tpu.memory_space<any>>
    %c46_i32 = arith.constant 46 : i32
    %c0_i32_93 = arith.constant 0 : i32
    %140 = tpu.memref_slice %arg15[%c46_i32, %c0_i32_93] : memref<64x128xf32, #tpu.memory_space<vmem>> -> memref<1x128xf32, #tpu.memory_space<vmem>>
    tpu.enqueue_dma source(%139 : memref<1x128xf32, #tpu.memory_space<any>>) target(%140 : memref<1x128xf32, #tpu.memory_space<vmem>>) target_semaphore(%arg16 : memref<!tpu.dma_semaphore, #tpu.memory_space<semaphore_mem>>)
    %c47 = arith.constant 47 : index
    %141 = memref.load %arg1[%c47] : memref<64xi32, #tpu.memory_space<smem>>
    %c0_i32_94 = arith.constant 0 : i32
    %142 = tpu.memref_slice %arg7[%141, %c0_i32_94] : memref<32x128xf32, #tpu.memory_space<any>> -> memref<1x128xf32, #tpu.memory_space<any>>
    %c47_i32 = arith.constant 47 : i32
    %c0_i32_95 = arith.constant 0 : i32
    %143 = tpu.memref_slice %arg15[%c47_i32, %c0_i32_95] : memref<64x128xf32, #tpu.memory_space<vmem>> -> memref<1x128xf32, #tpu.memory_space<vmem>>
    tpu.enqueue_dma source(%142 : memref<1x128xf32, #tpu.memory_space<any>>) target(%143 : memref<1x128xf32, #tpu.memory_space<vmem>>) target_semaphore(%arg16 : memref<!tpu.dma_semaphore, #tpu.memory_space<semaphore_mem>>)
    %c48 = arith.constant 48 : index
    %144 = memref.load %arg1[%c48] : memref<64xi32, #tpu.memory_space<smem>>
    %c0_i32_96 = arith.constant 0 : i32
    %145 = tpu.memref_slice %arg7[%144, %c0_i32_96] : memref<32x128xf32, #tpu.memory_space<any>> -> memref<1x128xf32, #tpu.memory_space<any>>
    %c48_i32 = arith.constant 48 : i32
    %c0_i32_97 = arith.constant 0 : i32
    %146 = tpu.memref_slice %arg15[%c48_i32, %c0_i32_97] : memref<64x128xf32, #tpu.memory_space<vmem>> -> memref<1x128xf32, #tpu.memory_space<vmem>>
    tpu.enqueue_dma source(%145 : memref<1x128xf32, #tpu.memory_space<any>>) target(%146 : memref<1x128xf32, #tpu.memory_space<vmem>>) target_semaphore(%arg16 : memref<!tpu.dma_semaphore, #tpu.memory_space<semaphore_mem>>)
    %c49 = arith.constant 49 : index
    %147 = memref.load %arg1[%c49] : memref<64xi32, #tpu.memory_space<smem>>
    %c0_i32_98 = arith.constant 0 : i32
    %148 = tpu.memref_slice %arg7[%147, %c0_i32_98] : memref<32x128xf32, #tpu.memory_space<any>> -> memref<1x128xf32, #tpu.memory_space<any>>
    %c49_i32 = arith.constant 49 : i32
    %c0_i32_99 = arith.constant 0 : i32
    %149 = tpu.memref_slice %arg15[%c49_i32, %c0_i32_99] : memref<64x128xf32, #tpu.memory_space<vmem>> -> memref<1x128xf32, #tpu.memory_space<vmem>>
    tpu.enqueue_dma source(%148 : memref<1x128xf32, #tpu.memory_space<any>>) target(%149 : memref<1x128xf32, #tpu.memory_space<vmem>>) target_semaphore(%arg16 : memref<!tpu.dma_semaphore, #tpu.memory_space<semaphore_mem>>)
    %c50 = arith.constant 50 : index
    %150 = memref.load %arg1[%c50] : memref<64xi32, #tpu.memory_space<smem>>
    %c0_i32_100 = arith.constant 0 : i32
    %151 = tpu.memref_slice %arg7[%150, %c0_i32_100] : memref<32x128xf32, #tpu.memory_space<any>> -> memref<1x128xf32, #tpu.memory_space<any>>
    %c50_i32 = arith.constant 50 : i32
    %c0_i32_101 = arith.constant 0 : i32
    %152 = tpu.memref_slice %arg15[%c50_i32, %c0_i32_101] : memref<64x128xf32, #tpu.memory_space<vmem>> -> memref<1x128xf32, #tpu.memory_space<vmem>>
    tpu.enqueue_dma source(%151 : memref<1x128xf32, #tpu.memory_space<any>>) target(%152 : memref<1x128xf32, #tpu.memory_space<vmem>>) target_semaphore(%arg16 : memref<!tpu.dma_semaphore, #tpu.memory_space<semaphore_mem>>)
    %c51 = arith.constant 51 : index
    %153 = memref.load %arg1[%c51] : memref<64xi32, #tpu.memory_space<smem>>
    %c0_i32_102 = arith.constant 0 : i32
    %154 = tpu.memref_slice %arg7[%153, %c0_i32_102] : memref<32x128xf32, #tpu.memory_space<any>> -> memref<1x128xf32, #tpu.memory_space<any>>
    %c51_i32 = arith.constant 51 : i32
    %c0_i32_103 = arith.constant 0 : i32
    %155 = tpu.memref_slice %arg15[%c51_i32, %c0_i32_103] : memref<64x128xf32, #tpu.memory_space<vmem>> -> memref<1x128xf32, #tpu.memory_space<vmem>>
    tpu.enqueue_dma source(%154 : memref<1x128xf32, #tpu.memory_space<any>>) target(%155 : memref<1x128xf32, #tpu.memory_space<vmem>>) target_semaphore(%arg16 : memref<!tpu.dma_semaphore, #tpu.memory_space<semaphore_mem>>)
    %c52 = arith.constant 52 : index
    %156 = memref.load %arg1[%c52] : memref<64xi32, #tpu.memory_space<smem>>
    %c0_i32_104 = arith.constant 0 : i32
    %157 = tpu.memref_slice %arg7[%156, %c0_i32_104] : memref<32x128xf32, #tpu.memory_space<any>> -> memref<1x128xf32, #tpu.memory_space<any>>
    %c52_i32 = arith.constant 52 : i32
    %c0_i32_105 = arith.constant 0 : i32
    %158 = tpu.memref_slice %arg15[%c52_i32, %c0_i32_105] : memref<64x128xf32, #tpu.memory_space<vmem>> -> memref<1x128xf32, #tpu.memory_space<vmem>>
    tpu.enqueue_dma source(%157 : memref<1x128xf32, #tpu.memory_space<any>>) target(%158 : memref<1x128xf32, #tpu.memory_space<vmem>>) target_semaphore(%arg16 : memref<!tpu.dma_semaphore, #tpu.memory_space<semaphore_mem>>)
    %c53 = arith.constant 53 : index
    %159 = memref.load %arg1[%c53] : memref<64xi32, #tpu.memory_space<smem>>
    %c0_i32_106 = arith.constant 0 : i32
    %160 = tpu.memref_slice %arg7[%159, %c0_i32_106] : memref<32x128xf32, #tpu.memory_space<any>> -> memref<1x128xf32, #tpu.memory_space<any>>
    %c53_i32 = arith.constant 53 : i32
    %c0_i32_107 = arith.constant 0 : i32
    %161 = tpu.memref_slice %arg15[%c53_i32, %c0_i32_107] : memref<64x128xf32, #tpu.memory_space<vmem>> -> memref<1x128xf32, #tpu.memory_space<vmem>>
    tpu.enqueue_dma source(%160 : memref<1x128xf32, #tpu.memory_space<any>>) target(%161 : memref<1x128xf32, #tpu.memory_space<vmem>>) target_semaphore(%arg16 : memref<!tpu.dma_semaphore, #tpu.memory_space<semaphore_mem>>)
    %c54 = arith.constant 54 : index
    %162 = memref.load %arg1[%c54] : memref<64xi32, #tpu.memory_space<smem>>
    %c0_i32_108 = arith.constant 0 : i32
    %163 = tpu.memref_slice %arg7[%162, %c0_i32_108] : memref<32x128xf32, #tpu.memory_space<any>> -> memref<1x128xf32, #tpu.memory_space<any>>
    %c54_i32 = arith.constant 54 : i32
    %c0_i32_109 = arith.constant 0 : i32
    %164 = tpu.memref_slice %arg15[%c54_i32, %c0_i32_109] : memref<64x128xf32, #tpu.memory_space<vmem>> -> memref<1x128xf32, #tpu.memory_space<vmem>>
    tpu.enqueue_dma source(%163 : memref<1x128xf32, #tpu.memory_space<any>>) target(%164 : memref<1x128xf32, #tpu.memory_space<vmem>>) target_semaphore(%arg16 : memref<!tpu.dma_semaphore, #tpu.memory_space<semaphore_mem>>)
    %c55 = arith.constant 55 : index
    %165 = memref.load %arg1[%c55] : memref<64xi32, #tpu.memory_space<smem>>
    %c0_i32_110 = arith.constant 0 : i32
    %166 = tpu.memref_slice %arg7[%165, %c0_i32_110] : memref<32x128xf32, #tpu.memory_space<any>> -> memref<1x128xf32, #tpu.memory_space<any>>
    %c55_i32 = arith.constant 55 : i32
    %c0_i32_111 = arith.constant 0 : i32
    %167 = tpu.memref_slice %arg15[%c55_i32, %c0_i32_111] : memref<64x128xf32, #tpu.memory_space<vmem>> -> memref<1x128xf32, #tpu.memory_space<vmem>>
    tpu.enqueue_dma source(%166 : memref<1x128xf32, #tpu.memory_space<any>>) target(%167 : memref<1x128xf32, #tpu.memory_space<vmem>>) target_semaphore(%arg16 : memref<!tpu.dma_semaphore, #tpu.memory_space<semaphore_mem>>)
    %c56 = arith.constant 56 : index
    %168 = memref.load %arg1[%c56] : memref<64xi32, #tpu.memory_space<smem>>
    %c0_i32_112 = arith.constant 0 : i32
    %169 = tpu.memref_slice %arg7[%168, %c0_i32_112] : memref<32x128xf32, #tpu.memory_space<any>> -> memref<1x128xf32, #tpu.memory_space<any>>
    %c56_i32 = arith.constant 56 : i32
    %c0_i32_113 = arith.constant 0 : i32
    %170 = tpu.memref_slice %arg15[%c56_i32, %c0_i32_113] : memref<64x128xf32, #tpu.memory_space<vmem>> -> memref<1x128xf32, #tpu.memory_space<vmem>>
    tpu.enqueue_dma source(%169 : memref<1x128xf32, #tpu.memory_space<any>>) target(%170 : memref<1x128xf32, #tpu.memory_space<vmem>>) target_semaphore(%arg16 : memref<!tpu.dma_semaphore, #tpu.memory_space<semaphore_mem>>)
    %c57 = arith.constant 57 : index
    %171 = memref.load %arg1[%c57] : memref<64xi32, #tpu.memory_space<smem>>
    %c0_i32_114 = arith.constant 0 : i32
    %172 = tpu.memref_slice %arg7[%171, %c0_i32_114] : memref<32x128xf32, #tpu.memory_space<any>> -> memref<1x128xf32, #tpu.memory_space<any>>
    %c57_i32 = arith.constant 57 : i32
    %c0_i32_115 = arith.constant 0 : i32
    %173 = tpu.memref_slice %arg15[%c57_i32, %c0_i32_115] : memref<64x128xf32, #tpu.memory_space<vmem>> -> memref<1x128xf32, #tpu.memory_space<vmem>>
    tpu.enqueue_dma source(%172 : memref<1x128xf32, #tpu.memory_space<any>>) target(%173 : memref<1x128xf32, #tpu.memory_space<vmem>>) target_semaphore(%arg16 : memref<!tpu.dma_semaphore, #tpu.memory_space<semaphore_mem>>)
    %c58 = arith.constant 58 : index
    %174 = memref.load %arg1[%c58] : memref<64xi32, #tpu.memory_space<smem>>
    %c0_i32_116 = arith.constant 0 : i32
    %175 = tpu.memref_slice %arg7[%174, %c0_i32_116] : memref<32x128xf32, #tpu.memory_space<any>> -> memref<1x128xf32, #tpu.memory_space<any>>
    %c58_i32 = arith.constant 58 : i32
    %c0_i32_117 = arith.constant 0 : i32
    %176 = tpu.memref_slice %arg15[%c58_i32, %c0_i32_117] : memref<64x128xf32, #tpu.memory_space<vmem>> -> memref<1x128xf32, #tpu.memory_space<vmem>>
    tpu.enqueue_dma source(%175 : memref<1x128xf32, #tpu.memory_space<any>>) target(%176 : memref<1x128xf32, #tpu.memory_space<vmem>>) target_semaphore(%arg16 : memref<!tpu.dma_semaphore, #tpu.memory_space<semaphore_mem>>)
    %c59 = arith.constant 59 : index
    %177 = memref.load %arg1[%c59] : memref<64xi32, #tpu.memory_space<smem>>
    %c0_i32_118 = arith.constant 0 : i32
    %178 = tpu.memref_slice %arg7[%177, %c0_i32_118] : memref<32x128xf32, #tpu.memory_space<any>> -> memref<1x128xf32, #tpu.memory_space<any>>
    %c59_i32 = arith.constant 59 : i32
    %c0_i32_119 = arith.constant 0 : i32
    %179 = tpu.memref_slice %arg15[%c59_i32, %c0_i32_119] : memref<64x128xf32, #tpu.memory_space<vmem>> -> memref<1x128xf32, #tpu.memory_space<vmem>>
    tpu.enqueue_dma source(%178 : memref<1x128xf32, #tpu.memory_space<any>>) target(%179 : memref<1x128xf32, #tpu.memory_space<vmem>>) target_semaphore(%arg16 : memref<!tpu.dma_semaphore, #tpu.memory_space<semaphore_mem>>)
    %c60 = arith.constant 60 : index
    %180 = memref.load %arg1[%c60] : memref<64xi32, #tpu.memory_space<smem>>
    %c0_i32_120 = arith.constant 0 : i32
    %181 = tpu.memref_slice %arg7[%180, %c0_i32_120] : memref<32x128xf32, #tpu.memory_space<any>> -> memref<1x128xf32, #tpu.memory_space<any>>
    %c60_i32 = arith.constant 60 : i32
    %c0_i32_121 = arith.constant 0 : i32
    %182 = tpu.memref_slice %arg15[%c60_i32, %c0_i32_121] : memref<64x128xf32, #tpu.memory_space<vmem>> -> memref<1x128xf32, #tpu.memory_space<vmem>>
    tpu.enqueue_dma source(%181 : memref<1x128xf32, #tpu.memory_space<any>>) target(%182 : memref<1x128xf32, #tpu.memory_space<vmem>>) target_semaphore(%arg16 : memref<!tpu.dma_semaphore, #tpu.memory_space<semaphore_mem>>)
    %c61 = arith.constant 61 : index
    %183 = memref.load %arg1[%c61] : memref<64xi32, #tpu.memory_space<smem>>
    %c0_i32_122 = arith.constant 0 : i32
    %184 = tpu.memref_slice %arg7[%183, %c0_i32_122] : memref<32x128xf32, #tpu.memory_space<any>> -> memref<1x128xf32, #tpu.memory_space<any>>
    %c61_i32 = arith.constant 61 : i32
    %c0_i32_123 = arith.constant 0 : i32
    %185 = tpu.memref_slice %arg15[%c61_i32, %c0_i32_123] : memref<64x128xf32, #tpu.memory_space<vmem>> -> memref<1x128xf32, #tpu.memory_space<vmem>>
    tpu.enqueue_dma source(%184 : memref<1x128xf32, #tpu.memory_space<any>>) target(%185 : memref<1x128xf32, #tpu.memory_space<vmem>>) target_semaphore(%arg16 : memref<!tpu.dma_semaphore, #tpu.memory_space<semaphore_mem>>)
    %c62 = arith.constant 62 : index
    %186 = memref.load %arg1[%c62] : memref<64xi32, #tpu.memory_space<smem>>
    %c0_i32_124 = arith.constant 0 : i32
    %187 = tpu.memref_slice %arg7[%186, %c0_i32_124] : memref<32x128xf32, #tpu.memory_space<any>> -> memref<1x128xf32, #tpu.memory_space<any>>
    %c62_i32 = arith.constant 62 : i32
    %c0_i32_125 = arith.constant 0 : i32
    %188 = tpu.memref_slice %arg15[%c62_i32, %c0_i32_125] : memref<64x128xf32, #tpu.memory_space<vmem>> -> memref<1x128xf32, #tpu.memory_space<vmem>>
    tpu.enqueue_dma source(%187 : memref<1x128xf32, #tpu.memory_space<any>>) target(%188 : memref<1x128xf32, #tpu.memory_space<vmem>>) target_semaphore(%arg16 : memref<!tpu.dma_semaphore, #tpu.memory_space<semaphore_mem>>)
    %c63 = arith.constant 63 : index
    %189 = memref.load %arg1[%c63] : memref<64xi32, #tpu.memory_space<smem>>
    %c0_i32_126 = arith.constant 0 : i32
    %190 = tpu.memref_slice %arg7[%189, %c0_i32_126] : memref<32x128xf32, #tpu.memory_space<any>> -> memref<1x128xf32, #tpu.memory_space<any>>
    %c63_i32 = arith.constant 63 : i32
    %c0_i32_127 = arith.constant 0 : i32
    %191 = tpu.memref_slice %arg15[%c63_i32, %c0_i32_127] : memref<64x128xf32, #tpu.memory_space<vmem>> -> memref<1x128xf32, #tpu.memory_space<vmem>>
    tpu.enqueue_dma source(%190 : memref<1x128xf32, #tpu.memory_space<any>>) target(%191 : memref<1x128xf32, #tpu.memory_space<vmem>>) target_semaphore(%arg16 : memref<!tpu.dma_semaphore, #tpu.memory_space<semaphore_mem>>)
    %c0_128 = arith.constant 0 : index
    %c0_129 = arith.constant 0 : index
    %192 = vector.load %arg2[%c0_128, %c0_129] : memref<8x128xf32, #tpu.memory_space<vmem>>, vector<8x128xf32>
    %c0_130 = arith.constant 0 : index
    %c0_131 = arith.constant 0 : index
    %193 = vector.load %arg3[%c0_130, %c0_131] : memref<128x128xf32, #tpu.memory_space<vmem>>, vector<128x128xf32>
    %cst = arith.constant dense<0.000000e+00> : vector<8x128xf32>
    %194 = tpu.matmul %192, %193, %cst {dimension_numbers = #tpu.dot_dimension_numbers<[1], [0], [0], [1], [0, 0, 1, 1], [], []>} : vector<8x128xf32>, vector<128x128xf32>, vector<8x128xf32> -> vector<8x128xf32>
    %c0_132 = arith.constant 0 : index
    %c0_133 = arith.constant 0 : index
    %195 = vector.load %arg4[%c0_132, %c0_133] : memref<1x128xf32, #tpu.memory_space<vmem>>, vector<1x128xf32>
    %196 = vector.broadcast %195 : vector<1x128xf32> to vector<8x128xf32>
    %197 = arith.addf %194, %196 : vector<8x128xf32>
    %cst_134 = arith.constant 0.000000e+00 : f32
    %198 = vector.broadcast %cst_134 : f32 to vector<8x128xf32>
    %199 = arith.maximumf %197, %198 : vector<8x128xf32>
    %c0_135 = arith.constant 0 : index
    %c0_136 = arith.constant 0 : index
    %200 = vector.load %arg5[%c0_135, %c0_136] : memref<128x128xf32, #tpu.memory_space<vmem>>, vector<128x128xf32>
    %cst_137 = arith.constant dense<0.000000e+00> : vector<8x128xf32>
    %201 = tpu.matmul %199, %200, %cst_137 {dimension_numbers = #tpu.dot_dimension_numbers<[1], [0], [0], [1], [0, 0, 1, 1], [], []>} : vector<8x128xf32>, vector<128x128xf32>, vector<8x128xf32> -> vector<8x128xf32>
    %c0_138 = arith.constant 0 : index
    %c0_139 = arith.constant 0 : index
    %202 = vector.load %arg6[%c0_138, %c0_139] : memref<1x128xf32, #tpu.memory_space<vmem>>, vector<1x128xf32>
    %203 = vector.broadcast %202 : vector<1x128xf32> to vector<8x128xf32>
    %204 = arith.addf %201, %203 : vector<8x128xf32>
    %c0_140 = arith.constant 0 : index
    %205 = memref.load %arg1[%c0_140] : memref<64xi32, #tpu.memory_space<smem>>
    %c0_i32_141 = arith.constant 0 : i32
    %206 = tpu.memref_slice %arg7[%205, %c0_i32_141] : memref<32x128xf32, #tpu.memory_space<any>> -> memref<1x128xf32, #tpu.memory_space<any>>
    %c0_i32_142 = arith.constant 0 : i32
    %c0_i32_143 = arith.constant 0 : i32
    %207 = tpu.memref_slice %arg15[%c0_i32_142, %c0_i32_143] : memref<64x128xf32, #tpu.memory_space<vmem>> -> memref<1x128xf32, #tpu.memory_space<vmem>>
    tpu.wait_dma2 semaphore(%arg16 : memref<!tpu.dma_semaphore, #tpu.memory_space<semaphore_mem>>) src(%206 : memref<1x128xf32, #tpu.memory_space<any>>) dst(%207 : memref<1x128xf32, #tpu.memory_space<vmem>>)
    %c1_144 = arith.constant 1 : index
    %208 = memref.load %arg1[%c1_144] : memref<64xi32, #tpu.memory_space<smem>>
    %c0_i32_145 = arith.constant 0 : i32
    %209 = tpu.memref_slice %arg7[%208, %c0_i32_145] : memref<32x128xf32, #tpu.memory_space<any>> -> memref<1x128xf32, #tpu.memory_space<any>>
    %c1_i32_146 = arith.constant 1 : i32
    %c0_i32_147 = arith.constant 0 : i32
    %210 = tpu.memref_slice %arg15[%c1_i32_146, %c0_i32_147] : memref<64x128xf32, #tpu.memory_space<vmem>> -> memref<1x128xf32, #tpu.memory_space<vmem>>
    tpu.wait_dma2 semaphore(%arg16 : memref<!tpu.dma_semaphore, #tpu.memory_space<semaphore_mem>>) src(%209 : memref<1x128xf32, #tpu.memory_space<any>>) dst(%210 : memref<1x128xf32, #tpu.memory_space<vmem>>)
    %c2_148 = arith.constant 2 : index
    %211 = memref.load %arg1[%c2_148] : memref<64xi32, #tpu.memory_space<smem>>
    %c0_i32_149 = arith.constant 0 : i32
    %212 = tpu.memref_slice %arg7[%211, %c0_i32_149] : memref<32x128xf32, #tpu.memory_space<any>> -> memref<1x128xf32, #tpu.memory_space<any>>
    %c2_i32_150 = arith.constant 2 : i32
    %c0_i32_151 = arith.constant 0 : i32
    %213 = tpu.memref_slice %arg15[%c2_i32_150, %c0_i32_151] : memref<64x128xf32, #tpu.memory_space<vmem>> -> memref<1x128xf32, #tpu.memory_space<vmem>>
    tpu.wait_dma2 semaphore(%arg16 : memref<!tpu.dma_semaphore, #tpu.memory_space<semaphore_mem>>) src(%212 : memref<1x128xf32, #tpu.memory_space<any>>) dst(%213 : memref<1x128xf32, #tpu.memory_space<vmem>>)
    %c3_152 = arith.constant 3 : index
    %214 = memref.load %arg1[%c3_152] : memref<64xi32, #tpu.memory_space<smem>>
    %c0_i32_153 = arith.constant 0 : i32
    %215 = tpu.memref_slice %arg7[%214, %c0_i32_153] : memref<32x128xf32, #tpu.memory_space<any>> -> memref<1x128xf32, #tpu.memory_space<any>>
    %c3_i32_154 = arith.constant 3 : i32
    %c0_i32_155 = arith.constant 0 : i32
    %216 = tpu.memref_slice %arg15[%c3_i32_154, %c0_i32_155] : memref<64x128xf32, #tpu.memory_space<vmem>> -> memref<1x128xf32, #tpu.memory_space<vmem>>
    tpu.wait_dma2 semaphore(%arg16 : memref<!tpu.dma_semaphore, #tpu.memory_space<semaphore_mem>>) src(%215 : memref<1x128xf32, #tpu.memory_space<any>>) dst(%216 : memref<1x128xf32, #tpu.memory_space<vmem>>)
    %c4_156 = arith.constant 4 : index
    %217 = memref.load %arg1[%c4_156] : memref<64xi32, #tpu.memory_space<smem>>
    %c0_i32_157 = arith.constant 0 : i32
    %218 = tpu.memref_slice %arg7[%217, %c0_i32_157] : memref<32x128xf32, #tpu.memory_space<any>> -> memref<1x128xf32, #tpu.memory_space<any>>
    %c4_i32_158 = arith.constant 4 : i32
    %c0_i32_159 = arith.constant 0 : i32
    %219 = tpu.memref_slice %arg15[%c4_i32_158, %c0_i32_159] : memref<64x128xf32, #tpu.memory_space<vmem>> -> memref<1x128xf32, #tpu.memory_space<vmem>>
    tpu.wait_dma2 semaphore(%arg16 : memref<!tpu.dma_semaphore, #tpu.memory_space<semaphore_mem>>) src(%218 : memref<1x128xf32, #tpu.memory_space<any>>) dst(%219 : memref<1x128xf32, #tpu.memory_space<vmem>>)
    %c5_160 = arith.constant 5 : index
    %220 = memref.load %arg1[%c5_160] : memref<64xi32, #tpu.memory_space<smem>>
    %c0_i32_161 = arith.constant 0 : i32
    %221 = tpu.memref_slice %arg7[%220, %c0_i32_161] : memref<32x128xf32, #tpu.memory_space<any>> -> memref<1x128xf32, #tpu.memory_space<any>>
    %c5_i32_162 = arith.constant 5 : i32
    %c0_i32_163 = arith.constant 0 : i32
    %222 = tpu.memref_slice %arg15[%c5_i32_162, %c0_i32_163] : memref<64x128xf32, #tpu.memory_space<vmem>> -> memref<1x128xf32, #tpu.memory_space<vmem>>
    tpu.wait_dma2 semaphore(%arg16 : memref<!tpu.dma_semaphore, #tpu.memory_space<semaphore_mem>>) src(%221 : memref<1x128xf32, #tpu.memory_space<any>>) dst(%222 : memref<1x128xf32, #tpu.memory_space<vmem>>)
    %c6_164 = arith.constant 6 : index
    %223 = memref.load %arg1[%c6_164] : memref<64xi32, #tpu.memory_space<smem>>
    %c0_i32_165 = arith.constant 0 : i32
    %224 = tpu.memref_slice %arg7[%223, %c0_i32_165] : memref<32x128xf32, #tpu.memory_space<any>> -> memref<1x128xf32, #tpu.memory_space<any>>
    %c6_i32_166 = arith.constant 6 : i32
    %c0_i32_167 = arith.constant 0 : i32
    %225 = tpu.memref_slice %arg15[%c6_i32_166, %c0_i32_167] : memref<64x128xf32, #tpu.memory_space<vmem>> -> memref<1x128xf32, #tpu.memory_space<vmem>>
    tpu.wait_dma2 semaphore(%arg16 : memref<!tpu.dma_semaphore, #tpu.memory_space<semaphore_mem>>) src(%224 : memref<1x128xf32, #tpu.memory_space<any>>) dst(%225 : memref<1x128xf32, #tpu.memory_space<vmem>>)
    %c7_168 = arith.constant 7 : index
    %226 = memref.load %arg1[%c7_168] : memref<64xi32, #tpu.memory_space<smem>>
    %c0_i32_169 = arith.constant 0 : i32
    %227 = tpu.memref_slice %arg7[%226, %c0_i32_169] : memref<32x128xf32, #tpu.memory_space<any>> -> memref<1x128xf32, #tpu.memory_space<any>>
    %c7_i32_170 = arith.constant 7 : i32
    %c0_i32_171 = arith.constant 0 : i32
    %228 = tpu.memref_slice %arg15[%c7_i32_170, %c0_i32_171] : memref<64x128xf32, #tpu.memory_space<vmem>> -> memref<1x128xf32, #tpu.memory_space<vmem>>
    tpu.wait_dma2 semaphore(%arg16 : memref<!tpu.dma_semaphore, #tpu.memory_space<semaphore_mem>>) src(%227 : memref<1x128xf32, #tpu.memory_space<any>>) dst(%228 : memref<1x128xf32, #tpu.memory_space<vmem>>)
    %c8_172 = arith.constant 8 : index
    %229 = memref.load %arg1[%c8_172] : memref<64xi32, #tpu.memory_space<smem>>
    %c0_i32_173 = arith.constant 0 : i32
    %230 = tpu.memref_slice %arg7[%229, %c0_i32_173] : memref<32x128xf32, #tpu.memory_space<any>> -> memref<1x128xf32, #tpu.memory_space<any>>
    %c8_i32_174 = arith.constant 8 : i32
    %c0_i32_175 = arith.constant 0 : i32
    %231 = tpu.memref_slice %arg15[%c8_i32_174, %c0_i32_175] : memref<64x128xf32, #tpu.memory_space<vmem>> -> memref<1x128xf32, #tpu.memory_space<vmem>>
    tpu.wait_dma2 semaphore(%arg16 : memref<!tpu.dma_semaphore, #tpu.memory_space<semaphore_mem>>) src(%230 : memref<1x128xf32, #tpu.memory_space<any>>) dst(%231 : memref<1x128xf32, #tpu.memory_space<vmem>>)
    %c9_176 = arith.constant 9 : index
    %232 = memref.load %arg1[%c9_176] : memref<64xi32, #tpu.memory_space<smem>>
    %c0_i32_177 = arith.constant 0 : i32
    %233 = tpu.memref_slice %arg7[%232, %c0_i32_177] : memref<32x128xf32, #tpu.memory_space<any>> -> memref<1x128xf32, #tpu.memory_space<any>>
    %c9_i32_178 = arith.constant 9 : i32
    %c0_i32_179 = arith.constant 0 : i32
    %234 = tpu.memref_slice %arg15[%c9_i32_178, %c0_i32_179] : memref<64x128xf32, #tpu.memory_space<vmem>> -> memref<1x128xf32, #tpu.memory_space<vmem>>
    tpu.wait_dma2 semaphore(%arg16 : memref<!tpu.dma_semaphore, #tpu.memory_space<semaphore_mem>>) src(%233 : memref<1x128xf32, #tpu.memory_space<any>>) dst(%234 : memref<1x128xf32, #tpu.memory_space<vmem>>)
    %c10_180 = arith.constant 10 : index
    %235 = memref.load %arg1[%c10_180] : memref<64xi32, #tpu.memory_space<smem>>
    %c0_i32_181 = arith.constant 0 : i32
    %236 = tpu.memref_slice %arg7[%235, %c0_i32_181] : memref<32x128xf32, #tpu.memory_space<any>> -> memref<1x128xf32, #tpu.memory_space<any>>
    %c10_i32_182 = arith.constant 10 : i32
    %c0_i32_183 = arith.constant 0 : i32
    %237 = tpu.memref_slice %arg15[%c10_i32_182, %c0_i32_183] : memref<64x128xf32, #tpu.memory_space<vmem>> -> memref<1x128xf32, #tpu.memory_space<vmem>>
    tpu.wait_dma2 semaphore(%arg16 : memref<!tpu.dma_semaphore, #tpu.memory_space<semaphore_mem>>) src(%236 : memref<1x128xf32, #tpu.memory_space<any>>) dst(%237 : memref<1x128xf32, #tpu.memory_space<vmem>>)
    %c11_184 = arith.constant 11 : index
    %238 = memref.load %arg1[%c11_184] : memref<64xi32, #tpu.memory_space<smem>>
    %c0_i32_185 = arith.constant 0 : i32
    %239 = tpu.memref_slice %arg7[%238, %c0_i32_185] : memref<32x128xf32, #tpu.memory_space<any>> -> memref<1x128xf32, #tpu.memory_space<any>>
    %c11_i32_186 = arith.constant 11 : i32
    %c0_i32_187 = arith.constant 0 : i32
    %240 = tpu.memref_slice %arg15[%c11_i32_186, %c0_i32_187] : memref<64x128xf32, #tpu.memory_space<vmem>> -> memref<1x128xf32, #tpu.memory_space<vmem>>
    tpu.wait_dma2 semaphore(%arg16 : memref<!tpu.dma_semaphore, #tpu.memory_space<semaphore_mem>>) src(%239 : memref<1x128xf32, #tpu.memory_space<any>>) dst(%240 : memref<1x128xf32, #tpu.memory_space<vmem>>)
    %c12_188 = arith.constant 12 : index
    %241 = memref.load %arg1[%c12_188] : memref<64xi32, #tpu.memory_space<smem>>
    %c0_i32_189 = arith.constant 0 : i32
    %242 = tpu.memref_slice %arg7[%241, %c0_i32_189] : memref<32x128xf32, #tpu.memory_space<any>> -> memref<1x128xf32, #tpu.memory_space<any>>
    %c12_i32_190 = arith.constant 12 : i32
    %c0_i32_191 = arith.constant 0 : i32
    %243 = tpu.memref_slice %arg15[%c12_i32_190, %c0_i32_191] : memref<64x128xf32, #tpu.memory_space<vmem>> -> memref<1x128xf32, #tpu.memory_space<vmem>>
    tpu.wait_dma2 semaphore(%arg16 : memref<!tpu.dma_semaphore, #tpu.memory_space<semaphore_mem>>) src(%242 : memref<1x128xf32, #tpu.memory_space<any>>) dst(%243 : memref<1x128xf32, #tpu.memory_space<vmem>>)
    %c13_192 = arith.constant 13 : index
    %244 = memref.load %arg1[%c13_192] : memref<64xi32, #tpu.memory_space<smem>>
    %c0_i32_193 = arith.constant 0 : i32
    %245 = tpu.memref_slice %arg7[%244, %c0_i32_193] : memref<32x128xf32, #tpu.memory_space<any>> -> memref<1x128xf32, #tpu.memory_space<any>>
    %c13_i32_194 = arith.constant 13 : i32
    %c0_i32_195 = arith.constant 0 : i32
    %246 = tpu.memref_slice %arg15[%c13_i32_194, %c0_i32_195] : memref<64x128xf32, #tpu.memory_space<vmem>> -> memref<1x128xf32, #tpu.memory_space<vmem>>
    tpu.wait_dma2 semaphore(%arg16 : memref<!tpu.dma_semaphore, #tpu.memory_space<semaphore_mem>>) src(%245 : memref<1x128xf32, #tpu.memory_space<any>>) dst(%246 : memref<1x128xf32, #tpu.memory_space<vmem>>)
    %c14_196 = arith.constant 14 : index
    %247 = memref.load %arg1[%c14_196] : memref<64xi32, #tpu.memory_space<smem>>
    %c0_i32_197 = arith.constant 0 : i32
    %248 = tpu.memref_slice %arg7[%247, %c0_i32_197] : memref<32x128xf32, #tpu.memory_space<any>> -> memref<1x128xf32, #tpu.memory_space<any>>
    %c14_i32_198 = arith.constant 14 : i32
    %c0_i32_199 = arith.constant 0 : i32
    %249 = tpu.memref_slice %arg15[%c14_i32_198, %c0_i32_199] : memref<64x128xf32, #tpu.memory_space<vmem>> -> memref<1x128xf32, #tpu.memory_space<vmem>>
    tpu.wait_dma2 semaphore(%arg16 : memref<!tpu.dma_semaphore, #tpu.memory_space<semaphore_mem>>) src(%248 : memref<1x128xf32, #tpu.memory_space<any>>) dst(%249 : memref<1x128xf32, #tpu.memory_space<vmem>>)
    %c15_200 = arith.constant 15 : index
    %250 = memref.load %arg1[%c15_200] : memref<64xi32, #tpu.memory_space<smem>>
    %c0_i32_201 = arith.constant 0 : i32
    %251 = tpu.memref_slice %arg7[%250, %c0_i32_201] : memref<32x128xf32, #tpu.memory_space<any>> -> memref<1x128xf32, #tpu.memory_space<any>>
    %c15_i32_202 = arith.constant 15 : i32
    %c0_i32_203 = arith.constant 0 : i32
    %252 = tpu.memref_slice %arg15[%c15_i32_202, %c0_i32_203] : memref<64x128xf32, #tpu.memory_space<vmem>> -> memref<1x128xf32, #tpu.memory_space<vmem>>
    tpu.wait_dma2 semaphore(%arg16 : memref<!tpu.dma_semaphore, #tpu.memory_space<semaphore_mem>>) src(%251 : memref<1x128xf32, #tpu.memory_space<any>>) dst(%252 : memref<1x128xf32, #tpu.memory_space<vmem>>)
    %c16_204 = arith.constant 16 : index
    %253 = memref.load %arg1[%c16_204] : memref<64xi32, #tpu.memory_space<smem>>
    %c0_i32_205 = arith.constant 0 : i32
    %254 = tpu.memref_slice %arg7[%253, %c0_i32_205] : memref<32x128xf32, #tpu.memory_space<any>> -> memref<1x128xf32, #tpu.memory_space<any>>
    %c16_i32_206 = arith.constant 16 : i32
    %c0_i32_207 = arith.constant 0 : i32
    %255 = tpu.memref_slice %arg15[%c16_i32_206, %c0_i32_207] : memref<64x128xf32, #tpu.memory_space<vmem>> -> memref<1x128xf32, #tpu.memory_space<vmem>>
    tpu.wait_dma2 semaphore(%arg16 : memref<!tpu.dma_semaphore, #tpu.memory_space<semaphore_mem>>) src(%254 : memref<1x128xf32, #tpu.memory_space<any>>) dst(%255 : memref<1x128xf32, #tpu.memory_space<vmem>>)
    %c17_208 = arith.constant 17 : index
    %256 = memref.load %arg1[%c17_208] : memref<64xi32, #tpu.memory_space<smem>>
    %c0_i32_209 = arith.constant 0 : i32
    %257 = tpu.memref_slice %arg7[%256, %c0_i32_209] : memref<32x128xf32, #tpu.memory_space<any>> -> memref<1x128xf32, #tpu.memory_space<any>>
    %c17_i32_210 = arith.constant 17 : i32
    %c0_i32_211 = arith.constant 0 : i32
    %258 = tpu.memref_slice %arg15[%c17_i32_210, %c0_i32_211] : memref<64x128xf32, #tpu.memory_space<vmem>> -> memref<1x128xf32, #tpu.memory_space<vmem>>
    tpu.wait_dma2 semaphore(%arg16 : memref<!tpu.dma_semaphore, #tpu.memory_space<semaphore_mem>>) src(%257 : memref<1x128xf32, #tpu.memory_space<any>>) dst(%258 : memref<1x128xf32, #tpu.memory_space<vmem>>)
    %c18_212 = arith.constant 18 : index
    %259 = memref.load %arg1[%c18_212] : memref<64xi32, #tpu.memory_space<smem>>
    %c0_i32_213 = arith.constant 0 : i32
    %260 = tpu.memref_slice %arg7[%259, %c0_i32_213] : memref<32x128xf32, #tpu.memory_space<any>> -> memref<1x128xf32, #tpu.memory_space<any>>
    %c18_i32_214 = arith.constant 18 : i32
    %c0_i32_215 = arith.constant 0 : i32
    %261 = tpu.memref_slice %arg15[%c18_i32_214, %c0_i32_215] : memref<64x128xf32, #tpu.memory_space<vmem>> -> memref<1x128xf32, #tpu.memory_space<vmem>>
    tpu.wait_dma2 semaphore(%arg16 : memref<!tpu.dma_semaphore, #tpu.memory_space<semaphore_mem>>) src(%260 : memref<1x128xf32, #tpu.memory_space<any>>) dst(%261 : memref<1x128xf32, #tpu.memory_space<vmem>>)
    %c19_216 = arith.constant 19 : index
    %262 = memref.load %arg1[%c19_216] : memref<64xi32, #tpu.memory_space<smem>>
    %c0_i32_217 = arith.constant 0 : i32
    %263 = tpu.memref_slice %arg7[%262, %c0_i32_217] : memref<32x128xf32, #tpu.memory_space<any>> -> memref<1x128xf32, #tpu.memory_space<any>>
    %c19_i32_218 = arith.constant 19 : i32
    %c0_i32_219 = arith.constant 0 : i32
    %264 = tpu.memref_slice %arg15[%c19_i32_218, %c0_i32_219] : memref<64x128xf32, #tpu.memory_space<vmem>> -> memref<1x128xf32, #tpu.memory_space<vmem>>
    tpu.wait_dma2 semaphore(%arg16 : memref<!tpu.dma_semaphore, #tpu.memory_space<semaphore_mem>>) src(%263 : memref<1x128xf32, #tpu.memory_space<any>>) dst(%264 : memref<1x128xf32, #tpu.memory_space<vmem>>)
    %c20_220 = arith.constant 20 : index
    %265 = memref.load %arg1[%c20_220] : memref<64xi32, #tpu.memory_space<smem>>
    %c0_i32_221 = arith.constant 0 : i32
    %266 = tpu.memref_slice %arg7[%265, %c0_i32_221] : memref<32x128xf32, #tpu.memory_space<any>> -> memref<1x128xf32, #tpu.memory_space<any>>
    %c20_i32_222 = arith.constant 20 : i32
    %c0_i32_223 = arith.constant 0 : i32
    %267 = tpu.memref_slice %arg15[%c20_i32_222, %c0_i32_223] : memref<64x128xf32, #tpu.memory_space<vmem>> -> memref<1x128xf32, #tpu.memory_space<vmem>>
    tpu.wait_dma2 semaphore(%arg16 : memref<!tpu.dma_semaphore, #tpu.memory_space<semaphore_mem>>) src(%266 : memref<1x128xf32, #tpu.memory_space<any>>) dst(%267 : memref<1x128xf32, #tpu.memory_space<vmem>>)
    %c21_224 = arith.constant 21 : index
    %268 = memref.load %arg1[%c21_224] : memref<64xi32, #tpu.memory_space<smem>>
    %c0_i32_225 = arith.constant 0 : i32
    %269 = tpu.memref_slice %arg7[%268, %c0_i32_225] : memref<32x128xf32, #tpu.memory_space<any>> -> memref<1x128xf32, #tpu.memory_space<any>>
    %c21_i32_226 = arith.constant 21 : i32
    %c0_i32_227 = arith.constant 0 : i32
    %270 = tpu.memref_slice %arg15[%c21_i32_226, %c0_i32_227] : memref<64x128xf32, #tpu.memory_space<vmem>> -> memref<1x128xf32, #tpu.memory_space<vmem>>
    tpu.wait_dma2 semaphore(%arg16 : memref<!tpu.dma_semaphore, #tpu.memory_space<semaphore_mem>>) src(%269 : memref<1x128xf32, #tpu.memory_space<any>>) dst(%270 : memref<1x128xf32, #tpu.memory_space<vmem>>)
    %c22_228 = arith.constant 22 : index
    %271 = memref.load %arg1[%c22_228] : memref<64xi32, #tpu.memory_space<smem>>
    %c0_i32_229 = arith.constant 0 : i32
    %272 = tpu.memref_slice %arg7[%271, %c0_i32_229] : memref<32x128xf32, #tpu.memory_space<any>> -> memref<1x128xf32, #tpu.memory_space<any>>
    %c22_i32_230 = arith.constant 22 : i32
    %c0_i32_231 = arith.constant 0 : i32
    %273 = tpu.memref_slice %arg15[%c22_i32_230, %c0_i32_231] : memref<64x128xf32, #tpu.memory_space<vmem>> -> memref<1x128xf32, #tpu.memory_space<vmem>>
    tpu.wait_dma2 semaphore(%arg16 : memref<!tpu.dma_semaphore, #tpu.memory_space<semaphore_mem>>) src(%272 : memref<1x128xf32, #tpu.memory_space<any>>) dst(%273 : memref<1x128xf32, #tpu.memory_space<vmem>>)
    %c23_232 = arith.constant 23 : index
    %274 = memref.load %arg1[%c23_232] : memref<64xi32, #tpu.memory_space<smem>>
    %c0_i32_233 = arith.constant 0 : i32
    %275 = tpu.memref_slice %arg7[%274, %c0_i32_233] : memref<32x128xf32, #tpu.memory_space<any>> -> memref<1x128xf32, #tpu.memory_space<any>>
    %c23_i32_234 = arith.constant 23 : i32
    %c0_i32_235 = arith.constant 0 : i32
    %276 = tpu.memref_slice %arg15[%c23_i32_234, %c0_i32_235] : memref<64x128xf32, #tpu.memory_space<vmem>> -> memref<1x128xf32, #tpu.memory_space<vmem>>
    tpu.wait_dma2 semaphore(%arg16 : memref<!tpu.dma_semaphore, #tpu.memory_space<semaphore_mem>>) src(%275 : memref<1x128xf32, #tpu.memory_space<any>>) dst(%276 : memref<1x128xf32, #tpu.memory_space<vmem>>)
    %c24_236 = arith.constant 24 : index
    %277 = memref.load %arg1[%c24_236] : memref<64xi32, #tpu.memory_space<smem>>
    %c0_i32_237 = arith.constant 0 : i32
    %278 = tpu.memref_slice %arg7[%277, %c0_i32_237] : memref<32x128xf32, #tpu.memory_space<any>> -> memref<1x128xf32, #tpu.memory_space<any>>
    %c24_i32_238 = arith.constant 24 : i32
    %c0_i32_239 = arith.constant 0 : i32
    %279 = tpu.memref_slice %arg15[%c24_i32_238, %c0_i32_239] : memref<64x128xf32, #tpu.memory_space<vmem>> -> memref<1x128xf32, #tpu.memory_space<vmem>>
    tpu.wait_dma2 semaphore(%arg16 : memref<!tpu.dma_semaphore, #tpu.memory_space<semaphore_mem>>) src(%278 : memref<1x128xf32, #tpu.memory_space<any>>) dst(%279 : memref<1x128xf32, #tpu.memory_space<vmem>>)
    %c25_240 = arith.constant 25 : index
    %280 = memref.load %arg1[%c25_240] : memref<64xi32, #tpu.memory_space<smem>>
    %c0_i32_241 = arith.constant 0 : i32
    %281 = tpu.memref_slice %arg7[%280, %c0_i32_241] : memref<32x128xf32, #tpu.memory_space<any>> -> memref<1x128xf32, #tpu.memory_space<any>>
    %c25_i32_242 = arith.constant 25 : i32
    %c0_i32_243 = arith.constant 0 : i32
    %282 = tpu.memref_slice %arg15[%c25_i32_242, %c0_i32_243] : memref<64x128xf32, #tpu.memory_space<vmem>> -> memref<1x128xf32, #tpu.memory_space<vmem>>
    tpu.wait_dma2 semaphore(%arg16 : memref<!tpu.dma_semaphore, #tpu.memory_space<semaphore_mem>>) src(%281 : memref<1x128xf32, #tpu.memory_space<any>>) dst(%282 : memref<1x128xf32, #tpu.memory_space<vmem>>)
    %c26_244 = arith.constant 26 : index
    %283 = memref.load %arg1[%c26_244] : memref<64xi32, #tpu.memory_space<smem>>
    %c0_i32_245 = arith.constant 0 : i32
    %284 = tpu.memref_slice %arg7[%283, %c0_i32_245] : memref<32x128xf32, #tpu.memory_space<any>> -> memref<1x128xf32, #tpu.memory_space<any>>
    %c26_i32_246 = arith.constant 26 : i32
    %c0_i32_247 = arith.constant 0 : i32
    %285 = tpu.memref_slice %arg15[%c26_i32_246, %c0_i32_247] : memref<64x128xf32, #tpu.memory_space<vmem>> -> memref<1x128xf32, #tpu.memory_space<vmem>>
    tpu.wait_dma2 semaphore(%arg16 : memref<!tpu.dma_semaphore, #tpu.memory_space<semaphore_mem>>) src(%284 : memref<1x128xf32, #tpu.memory_space<any>>) dst(%285 : memref<1x128xf32, #tpu.memory_space<vmem>>)
    %c27_248 = arith.constant 27 : index
    %286 = memref.load %arg1[%c27_248] : memref<64xi32, #tpu.memory_space<smem>>
    %c0_i32_249 = arith.constant 0 : i32
    %287 = tpu.memref_slice %arg7[%286, %c0_i32_249] : memref<32x128xf32, #tpu.memory_space<any>> -> memref<1x128xf32, #tpu.memory_space<any>>
    %c27_i32_250 = arith.constant 27 : i32
    %c0_i32_251 = arith.constant 0 : i32
    %288 = tpu.memref_slice %arg15[%c27_i32_250, %c0_i32_251] : memref<64x128xf32, #tpu.memory_space<vmem>> -> memref<1x128xf32, #tpu.memory_space<vmem>>
    tpu.wait_dma2 semaphore(%arg16 : memref<!tpu.dma_semaphore, #tpu.memory_space<semaphore_mem>>) src(%287 : memref<1x128xf32, #tpu.memory_space<any>>) dst(%288 : memref<1x128xf32, #tpu.memory_space<vmem>>)
    %c28_252 = arith.constant 28 : index
    %289 = memref.load %arg1[%c28_252] : memref<64xi32, #tpu.memory_space<smem>>
    %c0_i32_253 = arith.constant 0 : i32
    %290 = tpu.memref_slice %arg7[%289, %c0_i32_253] : memref<32x128xf32, #tpu.memory_space<any>> -> memref<1x128xf32, #tpu.memory_space<any>>
    %c28_i32_254 = arith.constant 28 : i32
    %c0_i32_255 = arith.constant 0 : i32
    %291 = tpu.memref_slice %arg15[%c28_i32_254, %c0_i32_255] : memref<64x128xf32, #tpu.memory_space<vmem>> -> memref<1x128xf32, #tpu.memory_space<vmem>>
    tpu.wait_dma2 semaphore(%arg16 : memref<!tpu.dma_semaphore, #tpu.memory_space<semaphore_mem>>) src(%290 : memref<1x128xf32, #tpu.memory_space<any>>) dst(%291 : memref<1x128xf32, #tpu.memory_space<vmem>>)
    %c29_256 = arith.constant 29 : index
    %292 = memref.load %arg1[%c29_256] : memref<64xi32, #tpu.memory_space<smem>>
    %c0_i32_257 = arith.constant 0 : i32
    %293 = tpu.memref_slice %arg7[%292, %c0_i32_257] : memref<32x128xf32, #tpu.memory_space<any>> -> memref<1x128xf32, #tpu.memory_space<any>>
    %c29_i32_258 = arith.constant 29 : i32
    %c0_i32_259 = arith.constant 0 : i32
    %294 = tpu.memref_slice %arg15[%c29_i32_258, %c0_i32_259] : memref<64x128xf32, #tpu.memory_space<vmem>> -> memref<1x128xf32, #tpu.memory_space<vmem>>
    tpu.wait_dma2 semaphore(%arg16 : memref<!tpu.dma_semaphore, #tpu.memory_space<semaphore_mem>>) src(%293 : memref<1x128xf32, #tpu.memory_space<any>>) dst(%294 : memref<1x128xf32, #tpu.memory_space<vmem>>)
    %c30_260 = arith.constant 30 : index
    %295 = memref.load %arg1[%c30_260] : memref<64xi32, #tpu.memory_space<smem>>
    %c0_i32_261 = arith.constant 0 : i32
    %296 = tpu.memref_slice %arg7[%295, %c0_i32_261] : memref<32x128xf32, #tpu.memory_space<any>> -> memref<1x128xf32, #tpu.memory_space<any>>
    %c30_i32_262 = arith.constant 30 : i32
    %c0_i32_263 = arith.constant 0 : i32
    %297 = tpu.memref_slice %arg15[%c30_i32_262, %c0_i32_263] : memref<64x128xf32, #tpu.memory_space<vmem>> -> memref<1x128xf32, #tpu.memory_space<vmem>>
    tpu.wait_dma2 semaphore(%arg16 : memref<!tpu.dma_semaphore, #tpu.memory_space<semaphore_mem>>) src(%296 : memref<1x128xf32, #tpu.memory_space<any>>) dst(%297 : memref<1x128xf32, #tpu.memory_space<vmem>>)
    %c31_264 = arith.constant 31 : index
    %298 = memref.load %arg1[%c31_264] : memref<64xi32, #tpu.memory_space<smem>>
    %c0_i32_265 = arith.constant 0 : i32
    %299 = tpu.memref_slice %arg7[%298, %c0_i32_265] : memref<32x128xf32, #tpu.memory_space<any>> -> memref<1x128xf32, #tpu.memory_space<any>>
    %c31_i32_266 = arith.constant 31 : i32
    %c0_i32_267 = arith.constant 0 : i32
    %300 = tpu.memref_slice %arg15[%c31_i32_266, %c0_i32_267] : memref<64x128xf32, #tpu.memory_space<vmem>> -> memref<1x128xf32, #tpu.memory_space<vmem>>
    tpu.wait_dma2 semaphore(%arg16 : memref<!tpu.dma_semaphore, #tpu.memory_space<semaphore_mem>>) src(%299 : memref<1x128xf32, #tpu.memory_space<any>>) dst(%300 : memref<1x128xf32, #tpu.memory_space<vmem>>)
    %c32_268 = arith.constant 32 : index
    %301 = memref.load %arg1[%c32_268] : memref<64xi32, #tpu.memory_space<smem>>
    %c0_i32_269 = arith.constant 0 : i32
    %302 = tpu.memref_slice %arg7[%301, %c0_i32_269] : memref<32x128xf32, #tpu.memory_space<any>> -> memref<1x128xf32, #tpu.memory_space<any>>
    %c32_i32_270 = arith.constant 32 : i32
    %c0_i32_271 = arith.constant 0 : i32
    %303 = tpu.memref_slice %arg15[%c32_i32_270, %c0_i32_271] : memref<64x128xf32, #tpu.memory_space<vmem>> -> memref<1x128xf32, #tpu.memory_space<vmem>>
    tpu.wait_dma2 semaphore(%arg16 : memref<!tpu.dma_semaphore, #tpu.memory_space<semaphore_mem>>) src(%302 : memref<1x128xf32, #tpu.memory_space<any>>) dst(%303 : memref<1x128xf32, #tpu.memory_space<vmem>>)
    %c33_272 = arith.constant 33 : index
    %304 = memref.load %arg1[%c33_272] : memref<64xi32, #tpu.memory_space<smem>>
    %c0_i32_273 = arith.constant 0 : i32
    %305 = tpu.memref_slice %arg7[%304, %c0_i32_273] : memref<32x128xf32, #tpu.memory_space<any>> -> memref<1x128xf32, #tpu.memory_space<any>>
    %c33_i32_274 = arith.constant 33 : i32
    %c0_i32_275 = arith.constant 0 : i32
    %306 = tpu.memref_slice %arg15[%c33_i32_274, %c0_i32_275] : memref<64x128xf32, #tpu.memory_space<vmem>> -> memref<1x128xf32, #tpu.memory_space<vmem>>
    tpu.wait_dma2 semaphore(%arg16 : memref<!tpu.dma_semaphore, #tpu.memory_space<semaphore_mem>>) src(%305 : memref<1x128xf32, #tpu.memory_space<any>>) dst(%306 : memref<1x128xf32, #tpu.memory_space<vmem>>)
    %c34_276 = arith.constant 34 : index
    %307 = memref.load %arg1[%c34_276] : memref<64xi32, #tpu.memory_space<smem>>
    %c0_i32_277 = arith.constant 0 : i32
    %308 = tpu.memref_slice %arg7[%307, %c0_i32_277] : memref<32x128xf32, #tpu.memory_space<any>> -> memref<1x128xf32, #tpu.memory_space<any>>
    %c34_i32_278 = arith.constant 34 : i32
    %c0_i32_279 = arith.constant 0 : i32
    %309 = tpu.memref_slice %arg15[%c34_i32_278, %c0_i32_279] : memref<64x128xf32, #tpu.memory_space<vmem>> -> memref<1x128xf32, #tpu.memory_space<vmem>>
    tpu.wait_dma2 semaphore(%arg16 : memref<!tpu.dma_semaphore, #tpu.memory_space<semaphore_mem>>) src(%308 : memref<1x128xf32, #tpu.memory_space<any>>) dst(%309 : memref<1x128xf32, #tpu.memory_space<vmem>>)
    %c35_280 = arith.constant 35 : index
    %310 = memref.load %arg1[%c35_280] : memref<64xi32, #tpu.memory_space<smem>>
    %c0_i32_281 = arith.constant 0 : i32
    %311 = tpu.memref_slice %arg7[%310, %c0_i32_281] : memref<32x128xf32, #tpu.memory_space<any>> -> memref<1x128xf32, #tpu.memory_space<any>>
    %c35_i32_282 = arith.constant 35 : i32
    %c0_i32_283 = arith.constant 0 : i32
    %312 = tpu.memref_slice %arg15[%c35_i32_282, %c0_i32_283] : memref<64x128xf32, #tpu.memory_space<vmem>> -> memref<1x128xf32, #tpu.memory_space<vmem>>
    tpu.wait_dma2 semaphore(%arg16 : memref<!tpu.dma_semaphore, #tpu.memory_space<semaphore_mem>>) src(%311 : memref<1x128xf32, #tpu.memory_space<any>>) dst(%312 : memref<1x128xf32, #tpu.memory_space<vmem>>)
    %c36_284 = arith.constant 36 : index
    %313 = memref.load %arg1[%c36_284] : memref<64xi32, #tpu.memory_space<smem>>
    %c0_i32_285 = arith.constant 0 : i32
    %314 = tpu.memref_slice %arg7[%313, %c0_i32_285] : memref<32x128xf32, #tpu.memory_space<any>> -> memref<1x128xf32, #tpu.memory_space<any>>
    %c36_i32_286 = arith.constant 36 : i32
    %c0_i32_287 = arith.constant 0 : i32
    %315 = tpu.memref_slice %arg15[%c36_i32_286, %c0_i32_287] : memref<64x128xf32, #tpu.memory_space<vmem>> -> memref<1x128xf32, #tpu.memory_space<vmem>>
    tpu.wait_dma2 semaphore(%arg16 : memref<!tpu.dma_semaphore, #tpu.memory_space<semaphore_mem>>) src(%314 : memref<1x128xf32, #tpu.memory_space<any>>) dst(%315 : memref<1x128xf32, #tpu.memory_space<vmem>>)
    %c37_288 = arith.constant 37 : index
    %316 = memref.load %arg1[%c37_288] : memref<64xi32, #tpu.memory_space<smem>>
    %c0_i32_289 = arith.constant 0 : i32
    %317 = tpu.memref_slice %arg7[%316, %c0_i32_289] : memref<32x128xf32, #tpu.memory_space<any>> -> memref<1x128xf32, #tpu.memory_space<any>>
    %c37_i32_290 = arith.constant 37 : i32
    %c0_i32_291 = arith.constant 0 : i32
    %318 = tpu.memref_slice %arg15[%c37_i32_290, %c0_i32_291] : memref<64x128xf32, #tpu.memory_space<vmem>> -> memref<1x128xf32, #tpu.memory_space<vmem>>
    tpu.wait_dma2 semaphore(%arg16 : memref<!tpu.dma_semaphore, #tpu.memory_space<semaphore_mem>>) src(%317 : memref<1x128xf32, #tpu.memory_space<any>>) dst(%318 : memref<1x128xf32, #tpu.memory_space<vmem>>)
    %c38_292 = arith.constant 38 : index
    %319 = memref.load %arg1[%c38_292] : memref<64xi32, #tpu.memory_space<smem>>
    %c0_i32_293 = arith.constant 0 : i32
    %320 = tpu.memref_slice %arg7[%319, %c0_i32_293] : memref<32x128xf32, #tpu.memory_space<any>> -> memref<1x128xf32, #tpu.memory_space<any>>
    %c38_i32_294 = arith.constant 38 : i32
    %c0_i32_295 = arith.constant 0 : i32
    %321 = tpu.memref_slice %arg15[%c38_i32_294, %c0_i32_295] : memref<64x128xf32, #tpu.memory_space<vmem>> -> memref<1x128xf32, #tpu.memory_space<vmem>>
    tpu.wait_dma2 semaphore(%arg16 : memref<!tpu.dma_semaphore, #tpu.memory_space<semaphore_mem>>) src(%320 : memref<1x128xf32, #tpu.memory_space<any>>) dst(%321 : memref<1x128xf32, #tpu.memory_space<vmem>>)
    %c39_296 = arith.constant 39 : index
    %322 = memref.load %arg1[%c39_296] : memref<64xi32, #tpu.memory_space<smem>>
    %c0_i32_297 = arith.constant 0 : i32
    %323 = tpu.memref_slice %arg7[%322, %c0_i32_297] : memref<32x128xf32, #tpu.memory_space<any>> -> memref<1x128xf32, #tpu.memory_space<any>>
    %c39_i32_298 = arith.constant 39 : i32
    %c0_i32_299 = arith.constant 0 : i32
    %324 = tpu.memref_slice %arg15[%c39_i32_298, %c0_i32_299] : memref<64x128xf32, #tpu.memory_space<vmem>> -> memref<1x128xf32, #tpu.memory_space<vmem>>
    tpu.wait_dma2 semaphore(%arg16 : memref<!tpu.dma_semaphore, #tpu.memory_space<semaphore_mem>>) src(%323 : memref<1x128xf32, #tpu.memory_space<any>>) dst(%324 : memref<1x128xf32, #tpu.memory_space<vmem>>)
    %c40_300 = arith.constant 40 : index
    %325 = memref.load %arg1[%c40_300] : memref<64xi32, #tpu.memory_space<smem>>
    %c0_i32_301 = arith.constant 0 : i32
    %326 = tpu.memref_slice %arg7[%325, %c0_i32_301] : memref<32x128xf32, #tpu.memory_space<any>> -> memref<1x128xf32, #tpu.memory_space<any>>
    %c40_i32_302 = arith.constant 40 : i32
    %c0_i32_303 = arith.constant 0 : i32
    %327 = tpu.memref_slice %arg15[%c40_i32_302, %c0_i32_303] : memref<64x128xf32, #tpu.memory_space<vmem>> -> memref<1x128xf32, #tpu.memory_space<vmem>>
    tpu.wait_dma2 semaphore(%arg16 : memref<!tpu.dma_semaphore, #tpu.memory_space<semaphore_mem>>) src(%326 : memref<1x128xf32, #tpu.memory_space<any>>) dst(%327 : memref<1x128xf32, #tpu.memory_space<vmem>>)
    %c41_304 = arith.constant 41 : index
    %328 = memref.load %arg1[%c41_304] : memref<64xi32, #tpu.memory_space<smem>>
    %c0_i32_305 = arith.constant 0 : i32
    %329 = tpu.memref_slice %arg7[%328, %c0_i32_305] : memref<32x128xf32, #tpu.memory_space<any>> -> memref<1x128xf32, #tpu.memory_space<any>>
    %c41_i32_306 = arith.constant 41 : i32
    %c0_i32_307 = arith.constant 0 : i32
    %330 = tpu.memref_slice %arg15[%c41_i32_306, %c0_i32_307] : memref<64x128xf32, #tpu.memory_space<vmem>> -> memref<1x128xf32, #tpu.memory_space<vmem>>
    tpu.wait_dma2 semaphore(%arg16 : memref<!tpu.dma_semaphore, #tpu.memory_space<semaphore_mem>>) src(%329 : memref<1x128xf32, #tpu.memory_space<any>>) dst(%330 : memref<1x128xf32, #tpu.memory_space<vmem>>)
    %c42_308 = arith.constant 42 : index
    %331 = memref.load %arg1[%c42_308] : memref<64xi32, #tpu.memory_space<smem>>
    %c0_i32_309 = arith.constant 0 : i32
    %332 = tpu.memref_slice %arg7[%331, %c0_i32_309] : memref<32x128xf32, #tpu.memory_space<any>> -> memref<1x128xf32, #tpu.memory_space<any>>
    %c42_i32_310 = arith.constant 42 : i32
    %c0_i32_311 = arith.constant 0 : i32
    %333 = tpu.memref_slice %arg15[%c42_i32_310, %c0_i32_311] : memref<64x128xf32, #tpu.memory_space<vmem>> -> memref<1x128xf32, #tpu.memory_space<vmem>>
    tpu.wait_dma2 semaphore(%arg16 : memref<!tpu.dma_semaphore, #tpu.memory_space<semaphore_mem>>) src(%332 : memref<1x128xf32, #tpu.memory_space<any>>) dst(%333 : memref<1x128xf32, #tpu.memory_space<vmem>>)
    %c43_312 = arith.constant 43 : index
    %334 = memref.load %arg1[%c43_312] : memref<64xi32, #tpu.memory_space<smem>>
    %c0_i32_313 = arith.constant 0 : i32
    %335 = tpu.memref_slice %arg7[%334, %c0_i32_313] : memref<32x128xf32, #tpu.memory_space<any>> -> memref<1x128xf32, #tpu.memory_space<any>>
    %c43_i32_314 = arith.constant 43 : i32
    %c0_i32_315 = arith.constant 0 : i32
    %336 = tpu.memref_slice %arg15[%c43_i32_314, %c0_i32_315] : memref<64x128xf32, #tpu.memory_space<vmem>> -> memref<1x128xf32, #tpu.memory_space<vmem>>
    tpu.wait_dma2 semaphore(%arg16 : memref<!tpu.dma_semaphore, #tpu.memory_space<semaphore_mem>>) src(%335 : memref<1x128xf32, #tpu.memory_space<any>>) dst(%336 : memref<1x128xf32, #tpu.memory_space<vmem>>)
    %c44_316 = arith.constant 44 : index
    %337 = memref.load %arg1[%c44_316] : memref<64xi32, #tpu.memory_space<smem>>
    %c0_i32_317 = arith.constant 0 : i32
    %338 = tpu.memref_slice %arg7[%337, %c0_i32_317] : memref<32x128xf32, #tpu.memory_space<any>> -> memref<1x128xf32, #tpu.memory_space<any>>
    %c44_i32_318 = arith.constant 44 : i32
    %c0_i32_319 = arith.constant 0 : i32
    %339 = tpu.memref_slice %arg15[%c44_i32_318, %c0_i32_319] : memref<64x128xf32, #tpu.memory_space<vmem>> -> memref<1x128xf32, #tpu.memory_space<vmem>>
    tpu.wait_dma2 semaphore(%arg16 : memref<!tpu.dma_semaphore, #tpu.memory_space<semaphore_mem>>) src(%338 : memref<1x128xf32, #tpu.memory_space<any>>) dst(%339 : memref<1x128xf32, #tpu.memory_space<vmem>>)
    %c45_320 = arith.constant 45 : index
    %340 = memref.load %arg1[%c45_320] : memref<64xi32, #tpu.memory_space<smem>>
    %c0_i32_321 = arith.constant 0 : i32
    %341 = tpu.memref_slice %arg7[%340, %c0_i32_321] : memref<32x128xf32, #tpu.memory_space<any>> -> memref<1x128xf32, #tpu.memory_space<any>>
    %c45_i32_322 = arith.constant 45 : i32
    %c0_i32_323 = arith.constant 0 : i32
    %342 = tpu.memref_slice %arg15[%c45_i32_322, %c0_i32_323] : memref<64x128xf32, #tpu.memory_space<vmem>> -> memref<1x128xf32, #tpu.memory_space<vmem>>
    tpu.wait_dma2 semaphore(%arg16 : memref<!tpu.dma_semaphore, #tpu.memory_space<semaphore_mem>>) src(%341 : memref<1x128xf32, #tpu.memory_space<any>>) dst(%342 : memref<1x128xf32, #tpu.memory_space<vmem>>)
    %c46_324 = arith.constant 46 : index
    %343 = memref.load %arg1[%c46_324] : memref<64xi32, #tpu.memory_space<smem>>
    %c0_i32_325 = arith.constant 0 : i32
    %344 = tpu.memref_slice %arg7[%343, %c0_i32_325] : memref<32x128xf32, #tpu.memory_space<any>> -> memref<1x128xf32, #tpu.memory_space<any>>
    %c46_i32_326 = arith.constant 46 : i32
    %c0_i32_327 = arith.constant 0 : i32
    %345 = tpu.memref_slice %arg15[%c46_i32_326, %c0_i32_327] : memref<64x128xf32, #tpu.memory_space<vmem>> -> memref<1x128xf32, #tpu.memory_space<vmem>>
    tpu.wait_dma2 semaphore(%arg16 : memref<!tpu.dma_semaphore, #tpu.memory_space<semaphore_mem>>) src(%344 : memref<1x128xf32, #tpu.memory_space<any>>) dst(%345 : memref<1x128xf32, #tpu.memory_space<vmem>>)
    %c47_328 = arith.constant 47 : index
    %346 = memref.load %arg1[%c47_328] : memref<64xi32, #tpu.memory_space<smem>>
    %c0_i32_329 = arith.constant 0 : i32
    %347 = tpu.memref_slice %arg7[%346, %c0_i32_329] : memref<32x128xf32, #tpu.memory_space<any>> -> memref<1x128xf32, #tpu.memory_space<any>>
    %c47_i32_330 = arith.constant 47 : i32
    %c0_i32_331 = arith.constant 0 : i32
    %348 = tpu.memref_slice %arg15[%c47_i32_330, %c0_i32_331] : memref<64x128xf32, #tpu.memory_space<vmem>> -> memref<1x128xf32, #tpu.memory_space<vmem>>
    tpu.wait_dma2 semaphore(%arg16 : memref<!tpu.dma_semaphore, #tpu.memory_space<semaphore_mem>>) src(%347 : memref<1x128xf32, #tpu.memory_space<any>>) dst(%348 : memref<1x128xf32, #tpu.memory_space<vmem>>)
    %c48_332 = arith.constant 48 : index
    %349 = memref.load %arg1[%c48_332] : memref<64xi32, #tpu.memory_space<smem>>
    %c0_i32_333 = arith.constant 0 : i32
    %350 = tpu.memref_slice %arg7[%349, %c0_i32_333] : memref<32x128xf32, #tpu.memory_space<any>> -> memref<1x128xf32, #tpu.memory_space<any>>
    %c48_i32_334 = arith.constant 48 : i32
    %c0_i32_335 = arith.constant 0 : i32
    %351 = tpu.memref_slice %arg15[%c48_i32_334, %c0_i32_335] : memref<64x128xf32, #tpu.memory_space<vmem>> -> memref<1x128xf32, #tpu.memory_space<vmem>>
    tpu.wait_dma2 semaphore(%arg16 : memref<!tpu.dma_semaphore, #tpu.memory_space<semaphore_mem>>) src(%350 : memref<1x128xf32, #tpu.memory_space<any>>) dst(%351 : memref<1x128xf32, #tpu.memory_space<vmem>>)
    %c49_336 = arith.constant 49 : index
    %352 = memref.load %arg1[%c49_336] : memref<64xi32, #tpu.memory_space<smem>>
    %c0_i32_337 = arith.constant 0 : i32
    %353 = tpu.memref_slice %arg7[%352, %c0_i32_337] : memref<32x128xf32, #tpu.memory_space<any>> -> memref<1x128xf32, #tpu.memory_space<any>>
    %c49_i32_338 = arith.constant 49 : i32
    %c0_i32_339 = arith.constant 0 : i32
    %354 = tpu.memref_slice %arg15[%c49_i32_338, %c0_i32_339] : memref<64x128xf32, #tpu.memory_space<vmem>> -> memref<1x128xf32, #tpu.memory_space<vmem>>
    tpu.wait_dma2 semaphore(%arg16 : memref<!tpu.dma_semaphore, #tpu.memory_space<semaphore_mem>>) src(%353 : memref<1x128xf32, #tpu.memory_space<any>>) dst(%354 : memref<1x128xf32, #tpu.memory_space<vmem>>)
    %c50_340 = arith.constant 50 : index
    %355 = memref.load %arg1[%c50_340] : memref<64xi32, #tpu.memory_space<smem>>
    %c0_i32_341 = arith.constant 0 : i32
    %356 = tpu.memref_slice %arg7[%355, %c0_i32_341] : memref<32x128xf32, #tpu.memory_space<any>> -> memref<1x128xf32, #tpu.memory_space<any>>
    %c50_i32_342 = arith.constant 50 : i32
    %c0_i32_343 = arith.constant 0 : i32
    %357 = tpu.memref_slice %arg15[%c50_i32_342, %c0_i32_343] : memref<64x128xf32, #tpu.memory_space<vmem>> -> memref<1x128xf32, #tpu.memory_space<vmem>>
    tpu.wait_dma2 semaphore(%arg16 : memref<!tpu.dma_semaphore, #tpu.memory_space<semaphore_mem>>) src(%356 : memref<1x128xf32, #tpu.memory_space<any>>) dst(%357 : memref<1x128xf32, #tpu.memory_space<vmem>>)
    %c51_344 = arith.constant 51 : index
    %358 = memref.load %arg1[%c51_344] : memref<64xi32, #tpu.memory_space<smem>>
    %c0_i32_345 = arith.constant 0 : i32
    %359 = tpu.memref_slice %arg7[%358, %c0_i32_345] : memref<32x128xf32, #tpu.memory_space<any>> -> memref<1x128xf32, #tpu.memory_space<any>>
    %c51_i32_346 = arith.constant 51 : i32
    %c0_i32_347 = arith.constant 0 : i32
    %360 = tpu.memref_slice %arg15[%c51_i32_346, %c0_i32_347] : memref<64x128xf32, #tpu.memory_space<vmem>> -> memref<1x128xf32, #tpu.memory_space<vmem>>
    tpu.wait_dma2 semaphore(%arg16 : memref<!tpu.dma_semaphore, #tpu.memory_space<semaphore_mem>>) src(%359 : memref<1x128xf32, #tpu.memory_space<any>>) dst(%360 : memref<1x128xf32, #tpu.memory_space<vmem>>)
    %c52_348 = arith.constant 52 : index
    %361 = memref.load %arg1[%c52_348] : memref<64xi32, #tpu.memory_space<smem>>
    %c0_i32_349 = arith.constant 0 : i32
    %362 = tpu.memref_slice %arg7[%361, %c0_i32_349] : memref<32x128xf32, #tpu.memory_space<any>> -> memref<1x128xf32, #tpu.memory_space<any>>
    %c52_i32_350 = arith.constant 52 : i32
    %c0_i32_351 = arith.constant 0 : i32
    %363 = tpu.memref_slice %arg15[%c52_i32_350, %c0_i32_351] : memref<64x128xf32, #tpu.memory_space<vmem>> -> memref<1x128xf32, #tpu.memory_space<vmem>>
    tpu.wait_dma2 semaphore(%arg16 : memref<!tpu.dma_semaphore, #tpu.memory_space<semaphore_mem>>) src(%362 : memref<1x128xf32, #tpu.memory_space<any>>) dst(%363 : memref<1x128xf32, #tpu.memory_space<vmem>>)
    %c53_352 = arith.constant 53 : index
    %364 = memref.load %arg1[%c53_352] : memref<64xi32, #tpu.memory_space<smem>>
    %c0_i32_353 = arith.constant 0 : i32
    %365 = tpu.memref_slice %arg7[%364, %c0_i32_353] : memref<32x128xf32, #tpu.memory_space<any>> -> memref<1x128xf32, #tpu.memory_space<any>>
    %c53_i32_354 = arith.constant 53 : i32
    %c0_i32_355 = arith.constant 0 : i32
    %366 = tpu.memref_slice %arg15[%c53_i32_354, %c0_i32_355] : memref<64x128xf32, #tpu.memory_space<vmem>> -> memref<1x128xf32, #tpu.memory_space<vmem>>
    tpu.wait_dma2 semaphore(%arg16 : memref<!tpu.dma_semaphore, #tpu.memory_space<semaphore_mem>>) src(%365 : memref<1x128xf32, #tpu.memory_space<any>>) dst(%366 : memref<1x128xf32, #tpu.memory_space<vmem>>)
    %c54_356 = arith.constant 54 : index
    %367 = memref.load %arg1[%c54_356] : memref<64xi32, #tpu.memory_space<smem>>
    %c0_i32_357 = arith.constant 0 : i32
    %368 = tpu.memref_slice %arg7[%367, %c0_i32_357] : memref<32x128xf32, #tpu.memory_space<any>> -> memref<1x128xf32, #tpu.memory_space<any>>
    %c54_i32_358 = arith.constant 54 : i32
    %c0_i32_359 = arith.constant 0 : i32
    %369 = tpu.memref_slice %arg15[%c54_i32_358, %c0_i32_359] : memref<64x128xf32, #tpu.memory_space<vmem>> -> memref<1x128xf32, #tpu.memory_space<vmem>>
    tpu.wait_dma2 semaphore(%arg16 : memref<!tpu.dma_semaphore, #tpu.memory_space<semaphore_mem>>) src(%368 : memref<1x128xf32, #tpu.memory_space<any>>) dst(%369 : memref<1x128xf32, #tpu.memory_space<vmem>>)
    %c55_360 = arith.constant 55 : index
    %370 = memref.load %arg1[%c55_360] : memref<64xi32, #tpu.memory_space<smem>>
    %c0_i32_361 = arith.constant 0 : i32
    %371 = tpu.memref_slice %arg7[%370, %c0_i32_361] : memref<32x128xf32, #tpu.memory_space<any>> -> memref<1x128xf32, #tpu.memory_space<any>>
    %c55_i32_362 = arith.constant 55 : i32
    %c0_i32_363 = arith.constant 0 : i32
    %372 = tpu.memref_slice %arg15[%c55_i32_362, %c0_i32_363] : memref<64x128xf32, #tpu.memory_space<vmem>> -> memref<1x128xf32, #tpu.memory_space<vmem>>
    tpu.wait_dma2 semaphore(%arg16 : memref<!tpu.dma_semaphore, #tpu.memory_space<semaphore_mem>>) src(%371 : memref<1x128xf32, #tpu.memory_space<any>>) dst(%372 : memref<1x128xf32, #tpu.memory_space<vmem>>)
    %c56_364 = arith.constant 56 : index
    %373 = memref.load %arg1[%c56_364] : memref<64xi32, #tpu.memory_space<smem>>
    %c0_i32_365 = arith.constant 0 : i32
    %374 = tpu.memref_slice %arg7[%373, %c0_i32_365] : memref<32x128xf32, #tpu.memory_space<any>> -> memref<1x128xf32, #tpu.memory_space<any>>
    %c56_i32_366 = arith.constant 56 : i32
    %c0_i32_367 = arith.constant 0 : i32
    %375 = tpu.memref_slice %arg15[%c56_i32_366, %c0_i32_367] : memref<64x128xf32, #tpu.memory_space<vmem>> -> memref<1x128xf32, #tpu.memory_space<vmem>>
    tpu.wait_dma2 semaphore(%arg16 : memref<!tpu.dma_semaphore, #tpu.memory_space<semaphore_mem>>) src(%374 : memref<1x128xf32, #tpu.memory_space<any>>) dst(%375 : memref<1x128xf32, #tpu.memory_space<vmem>>)
    %c57_368 = arith.constant 57 : index
    %376 = memref.load %arg1[%c57_368] : memref<64xi32, #tpu.memory_space<smem>>
    %c0_i32_369 = arith.constant 0 : i32
    %377 = tpu.memref_slice %arg7[%376, %c0_i32_369] : memref<32x128xf32, #tpu.memory_space<any>> -> memref<1x128xf32, #tpu.memory_space<any>>
    %c57_i32_370 = arith.constant 57 : i32
    %c0_i32_371 = arith.constant 0 : i32
    %378 = tpu.memref_slice %arg15[%c57_i32_370, %c0_i32_371] : memref<64x128xf32, #tpu.memory_space<vmem>> -> memref<1x128xf32, #tpu.memory_space<vmem>>
    tpu.wait_dma2 semaphore(%arg16 : memref<!tpu.dma_semaphore, #tpu.memory_space<semaphore_mem>>) src(%377 : memref<1x128xf32, #tpu.memory_space<any>>) dst(%378 : memref<1x128xf32, #tpu.memory_space<vmem>>)
    %c58_372 = arith.constant 58 : index
    %379 = memref.load %arg1[%c58_372] : memref<64xi32, #tpu.memory_space<smem>>
    %c0_i32_373 = arith.constant 0 : i32
    %380 = tpu.memref_slice %arg7[%379, %c0_i32_373] : memref<32x128xf32, #tpu.memory_space<any>> -> memref<1x128xf32, #tpu.memory_space<any>>
    %c58_i32_374 = arith.constant 58 : i32
    %c0_i32_375 = arith.constant 0 : i32
    %381 = tpu.memref_slice %arg15[%c58_i32_374, %c0_i32_375] : memref<64x128xf32, #tpu.memory_space<vmem>> -> memref<1x128xf32, #tpu.memory_space<vmem>>
    tpu.wait_dma2 semaphore(%arg16 : memref<!tpu.dma_semaphore, #tpu.memory_space<semaphore_mem>>) src(%380 : memref<1x128xf32, #tpu.memory_space<any>>) dst(%381 : memref<1x128xf32, #tpu.memory_space<vmem>>)
    %c59_376 = arith.constant 59 : index
    %382 = memref.load %arg1[%c59_376] : memref<64xi32, #tpu.memory_space<smem>>
    %c0_i32_377 = arith.constant 0 : i32
    %383 = tpu.memref_slice %arg7[%382, %c0_i32_377] : memref<32x128xf32, #tpu.memory_space<any>> -> memref<1x128xf32, #tpu.memory_space<any>>
    %c59_i32_378 = arith.constant 59 : i32
    %c0_i32_379 = arith.constant 0 : i32
    %384 = tpu.memref_slice %arg15[%c59_i32_378, %c0_i32_379] : memref<64x128xf32, #tpu.memory_space<vmem>> -> memref<1x128xf32, #tpu.memory_space<vmem>>
    tpu.wait_dma2 semaphore(%arg16 : memref<!tpu.dma_semaphore, #tpu.memory_space<semaphore_mem>>) src(%383 : memref<1x128xf32, #tpu.memory_space<any>>) dst(%384 : memref<1x128xf32, #tpu.memory_space<vmem>>)
    %c60_380 = arith.constant 60 : index
    %385 = memref.load %arg1[%c60_380] : memref<64xi32, #tpu.memory_space<smem>>
    %c0_i32_381 = arith.constant 0 : i32
    %386 = tpu.memref_slice %arg7[%385, %c0_i32_381] : memref<32x128xf32, #tpu.memory_space<any>> -> memref<1x128xf32, #tpu.memory_space<any>>
    %c60_i32_382 = arith.constant 60 : i32
    %c0_i32_383 = arith.constant 0 : i32
    %387 = tpu.memref_slice %arg15[%c60_i32_382, %c0_i32_383] : memref<64x128xf32, #tpu.memory_space<vmem>> -> memref<1x128xf32, #tpu.memory_space<vmem>>
    tpu.wait_dma2 semaphore(%arg16 : memref<!tpu.dma_semaphore, #tpu.memory_space<semaphore_mem>>) src(%386 : memref<1x128xf32, #tpu.memory_space<any>>) dst(%387 : memref<1x128xf32, #tpu.memory_space<vmem>>)
    %c61_384 = arith.constant 61 : index
    %388 = memref.load %arg1[%c61_384] : memref<64xi32, #tpu.memory_space<smem>>
    %c0_i32_385 = arith.constant 0 : i32
    %389 = tpu.memref_slice %arg7[%388, %c0_i32_385] : memref<32x128xf32, #tpu.memory_space<any>> -> memref<1x128xf32, #tpu.memory_space<any>>
    %c61_i32_386 = arith.constant 61 : i32
    %c0_i32_387 = arith.constant 0 : i32
    %390 = tpu.memref_slice %arg15[%c61_i32_386, %c0_i32_387] : memref<64x128xf32, #tpu.memory_space<vmem>> -> memref<1x128xf32, #tpu.memory_space<vmem>>
    tpu.wait_dma2 semaphore(%arg16 : memref<!tpu.dma_semaphore, #tpu.memory_space<semaphore_mem>>) src(%389 : memref<1x128xf32, #tpu.memory_space<any>>) dst(%390 : memref<1x128xf32, #tpu.memory_space<vmem>>)
    %c62_388 = arith.constant 62 : index
    %391 = memref.load %arg1[%c62_388] : memref<64xi32, #tpu.memory_space<smem>>
    %c0_i32_389 = arith.constant 0 : i32
    %392 = tpu.memref_slice %arg7[%391, %c0_i32_389] : memref<32x128xf32, #tpu.memory_space<any>> -> memref<1x128xf32, #tpu.memory_space<any>>
    %c62_i32_390 = arith.constant 62 : i32
    %c0_i32_391 = arith.constant 0 : i32
    %393 = tpu.memref_slice %arg15[%c62_i32_390, %c0_i32_391] : memref<64x128xf32, #tpu.memory_space<vmem>> -> memref<1x128xf32, #tpu.memory_space<vmem>>
    tpu.wait_dma2 semaphore(%arg16 : memref<!tpu.dma_semaphore, #tpu.memory_space<semaphore_mem>>) src(%392 : memref<1x128xf32, #tpu.memory_space<any>>) dst(%393 : memref<1x128xf32, #tpu.memory_space<vmem>>)
    %c63_392 = arith.constant 63 : index
    %394 = memref.load %arg1[%c63_392] : memref<64xi32, #tpu.memory_space<smem>>
    %c0_i32_393 = arith.constant 0 : i32
    %395 = tpu.memref_slice %arg7[%394, %c0_i32_393] : memref<32x128xf32, #tpu.memory_space<any>> -> memref<1x128xf32, #tpu.memory_space<any>>
    %c63_i32_394 = arith.constant 63 : i32
    %c0_i32_395 = arith.constant 0 : i32
    %396 = tpu.memref_slice %arg15[%c63_i32_394, %c0_i32_395] : memref<64x128xf32, #tpu.memory_space<vmem>> -> memref<1x128xf32, #tpu.memory_space<vmem>>
    tpu.wait_dma2 semaphore(%arg16 : memref<!tpu.dma_semaphore, #tpu.memory_space<semaphore_mem>>) src(%395 : memref<1x128xf32, #tpu.memory_space<any>>) dst(%396 : memref<1x128xf32, #tpu.memory_space<vmem>>)
    %c0_396 = arith.constant 0 : index
    %c0_397 = arith.constant 0 : index
    %397 = vector.load %arg15[%c0_396, %c0_397] : memref<64x128xf32, #tpu.memory_space<vmem>>, vector<64x128xf32>
    %c0_398 = arith.constant 0 : index
    %c0_399 = arith.constant 0 : index
    %398 = vector.load %arg8[%c0_398, %c0_399] : memref<128x384xf32, #tpu.memory_space<vmem>>, vector<128x384xf32>
    %cst_400 = arith.constant dense<0.000000e+00> : vector<64x384xf32>
    %399 = tpu.matmul %397, %398, %cst_400 {dimension_numbers = #tpu.dot_dimension_numbers<[1], [0], [0], [1], [0, 0, 1, 1], [], []>} : vector<64x128xf32>, vector<128x384xf32>, vector<64x384xf32> -> vector<64x384xf32>
    %c0_401 = arith.constant 0 : index
    %c0_402 = arith.constant 0 : index
    %400 = vector.load %arg10[%c0_401, %c0_402] : memref<1x384xf32, #tpu.memory_space<vmem>>, vector<1x384xf32>
    %401 = vector.broadcast %400 : vector<1x384xf32> to vector<64x384xf32>
    %402 = arith.addf %399, %401 : vector<64x384xf32>
    %c0_403 = arith.constant 0 : index
    %c0_404 = arith.constant 0 : index
    %403 = vector.load %arg9[%c0_403, %c0_404] : memref<128x384xf32, #tpu.memory_space<vmem>>, vector<128x384xf32>
    %c0_405 = arith.constant 0 : index
    %c0_406 = arith.constant 0 : index
    %404 = vector.load %arg11[%c0_405, %c0_406] : memref<1x384xf32, #tpu.memory_space<vmem>>, vector<1x384xf32>
    %405 = vector.extract_strided_slice %402 {offsets = [0, 0], sizes = [8, 384], strides = [1, 1]} : vector<64x384xf32> to vector<8x384xf32>
    %cst_407 = arith.constant dense<0.000000e+00> : vector<8x384xf32>
    %406 = tpu.matmul %204, %403, %cst_407 {dimension_numbers = #tpu.dot_dimension_numbers<[1], [0], [0], [1], [0, 0, 1, 1], [], []>} : vector<8x128xf32>, vector<128x384xf32>, vector<8x384xf32> -> vector<8x384xf32>
    %407 = vector.broadcast %404 : vector<1x384xf32> to vector<8x384xf32>
    %408 = arith.addf %406, %407 : vector<8x384xf32>
    %409 = vector.extract_strided_slice %405 {offsets = [0, 0], sizes = [8, 128], strides = [1, 1]} : vector<8x384xf32> to vector<8x128xf32>
    %410 = vector.extract_strided_slice %408 {offsets = [0, 0], sizes = [8, 128], strides = [1, 1]} : vector<8x384xf32> to vector<8x128xf32>
    %411 = arith.addf %409, %410 : vector<8x128xf32>
    %412 = arith.negf %411 : vector<8x128xf32>
    %413 = math.exp %412 : vector<8x128xf32>
    %cst_408 = arith.constant 1.000000e+00 : f32
    %414 = vector.broadcast %cst_408 : f32 to vector<8x128xf32>
    %415 = arith.addf %414, %413 : vector<8x128xf32>
    %416 = arith.divf %414, %415 : vector<8x128xf32>
    %417 = vector.extract_strided_slice %405 {offsets = [0, 128], sizes = [8, 128], strides = [1, 1]} : vector<8x384xf32> to vector<8x128xf32>
    %418 = vector.extract_strided_slice %408 {offsets = [0, 128], sizes = [8, 128], strides = [1, 1]} : vector<8x384xf32> to vector<8x128xf32>
    %419 = arith.addf %417, %418 : vector<8x128xf32>
    %420 = arith.negf %419 : vector<8x128xf32>
    %421 = math.exp %420 : vector<8x128xf32>
    %cst_409 = arith.constant 1.000000e+00 : f32
    %422 = vector.broadcast %cst_409 : f32 to vector<8x128xf32>
    %423 = arith.addf %422, %421 : vector<8x128xf32>
    %424 = arith.divf %422, %423 : vector<8x128xf32>
    %425 = vector.extract_strided_slice %405 {offsets = [0, 256], sizes = [8, 128], strides = [1, 1]} : vector<8x384xf32> to vector<8x128xf32>
    %426 = vector.extract_strided_slice %408 {offsets = [0, 256], sizes = [8, 128], strides = [1, 1]} : vector<8x384xf32> to vector<8x128xf32>
    %427 = arith.mulf %416, %426 : vector<8x128xf32>
    %428 = arith.addf %425, %427 : vector<8x128xf32>
    %429 = math.tanh %428 : vector<8x128xf32>
    %cst_410 = arith.constant 1.000000e+00 : f32
    %430 = vector.broadcast %cst_410 : f32 to vector<8x128xf32>
    %431 = arith.subf %430, %424 : vector<8x128xf32>
    %432 = arith.mulf %431, %429 : vector<8x128xf32>
    %433 = arith.mulf %424, %204 : vector<8x128xf32>
    %434 = arith.addf %432, %433 : vector<8x128xf32>
    %435 = vector.extract_strided_slice %402 {offsets = [8, 0], sizes = [8, 384], strides = [1, 1]} : vector<64x384xf32> to vector<8x384xf32>
    %cst_411 = arith.constant dense<0.000000e+00> : vector<8x384xf32>
    %436 = tpu.matmul %434, %403, %cst_411 {dimension_numbers = #tpu.dot_dimension_numbers<[1], [0], [0], [1], [0, 0, 1, 1], [], []>} : vector<8x128xf32>, vector<128x384xf32>, vector<8x384xf32> -> vector<8x384xf32>
    %437 = vector.broadcast %404 : vector<1x384xf32> to vector<8x384xf32>
    %438 = arith.addf %436, %437 : vector<8x384xf32>
    %439 = vector.extract_strided_slice %435 {offsets = [0, 0], sizes = [8, 128], strides = [1, 1]} : vector<8x384xf32> to vector<8x128xf32>
    %440 = vector.extract_strided_slice %438 {offsets = [0, 0], sizes = [8, 128], strides = [1, 1]} : vector<8x384xf32> to vector<8x128xf32>
    %441 = arith.addf %439, %440 : vector<8x128xf32>
    %442 = arith.negf %441 : vector<8x128xf32>
    %443 = math.exp %442 : vector<8x128xf32>
    %cst_412 = arith.constant 1.000000e+00 : f32
    %444 = vector.broadcast %cst_412 : f32 to vector<8x128xf32>
    %445 = arith.addf %444, %443 : vector<8x128xf32>
    %446 = arith.divf %444, %445 : vector<8x128xf32>
    %447 = vector.extract_strided_slice %435 {offsets = [0, 128], sizes = [8, 128], strides = [1, 1]} : vector<8x384xf32> to vector<8x128xf32>
    %448 = vector.extract_strided_slice %438 {offsets = [0, 128], sizes = [8, 128], strides = [1, 1]} : vector<8x384xf32> to vector<8x128xf32>
    %449 = arith.addf %447, %448 : vector<8x128xf32>
    %450 = arith.negf %449 : vector<8x128xf32>
    %451 = math.exp %450 : vector<8x128xf32>
    %cst_413 = arith.constant 1.000000e+00 : f32
    %452 = vector.broadcast %cst_413 : f32 to vector<8x128xf32>
    %453 = arith.addf %452, %451 : vector<8x128xf32>
    %454 = arith.divf %452, %453 : vector<8x128xf32>
    %455 = vector.extract_strided_slice %435 {offsets = [0, 256], sizes = [8, 128], strides = [1, 1]} : vector<8x384xf32> to vector<8x128xf32>
    %456 = vector.extract_strided_slice %438 {offsets = [0, 256], sizes = [8, 128], strides = [1, 1]} : vector<8x384xf32> to vector<8x128xf32>
    %457 = arith.mulf %446, %456 : vector<8x128xf32>
    %458 = arith.addf %455, %457 : vector<8x128xf32>
    %459 = math.tanh %458 : vector<8x128xf32>
    %cst_414 = arith.constant 1.000000e+00 : f32
    %460 = vector.broadcast %cst_414 : f32 to vector<8x128xf32>
    %461 = arith.subf %460, %454 : vector<8x128xf32>
    %462 = arith.mulf %461, %459 : vector<8x128xf32>
    %463 = arith.mulf %454, %434 : vector<8x128xf32>
    %464 = arith.addf %462, %463 : vector<8x128xf32>
    %465 = vector.extract_strided_slice %402 {offsets = [16, 0], sizes = [8, 384], strides = [1, 1]} : vector<64x384xf32> to vector<8x384xf32>
    %cst_415 = arith.constant dense<0.000000e+00> : vector<8x384xf32>
    %466 = tpu.matmul %464, %403, %cst_415 {dimension_numbers = #tpu.dot_dimension_numbers<[1], [0], [0], [1], [0, 0, 1, 1], [], []>} : vector<8x128xf32>, vector<128x384xf32>, vector<8x384xf32> -> vector<8x384xf32>
    %467 = vector.broadcast %404 : vector<1x384xf32> to vector<8x384xf32>
    %468 = arith.addf %466, %467 : vector<8x384xf32>
    %469 = vector.extract_strided_slice %465 {offsets = [0, 0], sizes = [8, 128], strides = [1, 1]} : vector<8x384xf32> to vector<8x128xf32>
    %470 = vector.extract_strided_slice %468 {offsets = [0, 0], sizes = [8, 128], strides = [1, 1]} : vector<8x384xf32> to vector<8x128xf32>
    %471 = arith.addf %469, %470 : vector<8x128xf32>
    %472 = arith.negf %471 : vector<8x128xf32>
    %473 = math.exp %472 : vector<8x128xf32>
    %cst_416 = arith.constant 1.000000e+00 : f32
    %474 = vector.broadcast %cst_416 : f32 to vector<8x128xf32>
    %475 = arith.addf %474, %473 : vector<8x128xf32>
    %476 = arith.divf %474, %475 : vector<8x128xf32>
    %477 = vector.extract_strided_slice %465 {offsets = [0, 128], sizes = [8, 128], strides = [1, 1]} : vector<8x384xf32> to vector<8x128xf32>
    %478 = vector.extract_strided_slice %468 {offsets = [0, 128], sizes = [8, 128], strides = [1, 1]} : vector<8x384xf32> to vector<8x128xf32>
    %479 = arith.addf %477, %478 : vector<8x128xf32>
    %480 = arith.negf %479 : vector<8x128xf32>
    %481 = math.exp %480 : vector<8x128xf32>
    %cst_417 = arith.constant 1.000000e+00 : f32
    %482 = vector.broadcast %cst_417 : f32 to vector<8x128xf32>
    %483 = arith.addf %482, %481 : vector<8x128xf32>
    %484 = arith.divf %482, %483 : vector<8x128xf32>
    %485 = vector.extract_strided_slice %465 {offsets = [0, 256], sizes = [8, 128], strides = [1, 1]} : vector<8x384xf32> to vector<8x128xf32>
    %486 = vector.extract_strided_slice %468 {offsets = [0, 256], sizes = [8, 128], strides = [1, 1]} : vector<8x384xf32> to vector<8x128xf32>
    %487 = arith.mulf %476, %486 : vector<8x128xf32>
    %488 = arith.addf %485, %487 : vector<8x128xf32>
    %489 = math.tanh %488 : vector<8x128xf32>
    %cst_418 = arith.constant 1.000000e+00 : f32
    %490 = vector.broadcast %cst_418 : f32 to vector<8x128xf32>
    %491 = arith.subf %490, %484 : vector<8x128xf32>
    %492 = arith.mulf %491, %489 : vector<8x128xf32>
    %493 = arith.mulf %484, %464 : vector<8x128xf32>
    %494 = arith.addf %492, %493 : vector<8x128xf32>
    %495 = vector.extract_strided_slice %402 {offsets = [24, 0], sizes = [8, 384], strides = [1, 1]} : vector<64x384xf32> to vector<8x384xf32>
    %cst_419 = arith.constant dense<0.000000e+00> : vector<8x384xf32>
    %496 = tpu.matmul %494, %403, %cst_419 {dimension_numbers = #tpu.dot_dimension_numbers<[1], [0], [0], [1], [0, 0, 1, 1], [], []>} : vector<8x128xf32>, vector<128x384xf32>, vector<8x384xf32> -> vector<8x384xf32>
    %497 = vector.broadcast %404 : vector<1x384xf32> to vector<8x384xf32>
    %498 = arith.addf %496, %497 : vector<8x384xf32>
    %499 = vector.extract_strided_slice %495 {offsets = [0, 0], sizes = [8, 128], strides = [1, 1]} : vector<8x384xf32> to vector<8x128xf32>
    %500 = vector.extract_strided_slice %498 {offsets = [0, 0], sizes = [8, 128], strides = [1, 1]} : vector<8x384xf32> to vector<8x128xf32>
    %501 = arith.addf %499, %500 : vector<8x128xf32>
    %502 = arith.negf %501 : vector<8x128xf32>
    %503 = math.exp %502 : vector<8x128xf32>
    %cst_420 = arith.constant 1.000000e+00 : f32
    %504 = vector.broadcast %cst_420 : f32 to vector<8x128xf32>
    %505 = arith.addf %504, %503 : vector<8x128xf32>
    %506 = arith.divf %504, %505 : vector<8x128xf32>
    %507 = vector.extract_strided_slice %495 {offsets = [0, 128], sizes = [8, 128], strides = [1, 1]} : vector<8x384xf32> to vector<8x128xf32>
    %508 = vector.extract_strided_slice %498 {offsets = [0, 128], sizes = [8, 128], strides = [1, 1]} : vector<8x384xf32> to vector<8x128xf32>
    %509 = arith.addf %507, %508 : vector<8x128xf32>
    %510 = arith.negf %509 : vector<8x128xf32>
    %511 = math.exp %510 : vector<8x128xf32>
    %cst_421 = arith.constant 1.000000e+00 : f32
    %512 = vector.broadcast %cst_421 : f32 to vector<8x128xf32>
    %513 = arith.addf %512, %511 : vector<8x128xf32>
    %514 = arith.divf %512, %513 : vector<8x128xf32>
    %515 = vector.extract_strided_slice %495 {offsets = [0, 256], sizes = [8, 128], strides = [1, 1]} : vector<8x384xf32> to vector<8x128xf32>
    %516 = vector.extract_strided_slice %498 {offsets = [0, 256], sizes = [8, 128], strides = [1, 1]} : vector<8x384xf32> to vector<8x128xf32>
    %517 = arith.mulf %506, %516 : vector<8x128xf32>
    %518 = arith.addf %515, %517 : vector<8x128xf32>
    %519 = math.tanh %518 : vector<8x128xf32>
    %cst_422 = arith.constant 1.000000e+00 : f32
    %520 = vector.broadcast %cst_422 : f32 to vector<8x128xf32>
    %521 = arith.subf %520, %514 : vector<8x128xf32>
    %522 = arith.mulf %521, %519 : vector<8x128xf32>
    %523 = arith.mulf %514, %494 : vector<8x128xf32>
    %524 = arith.addf %522, %523 : vector<8x128xf32>
    %525 = vector.extract_strided_slice %402 {offsets = [32, 0], sizes = [8, 384], strides = [1, 1]} : vector<64x384xf32> to vector<8x384xf32>
    %cst_423 = arith.constant dense<0.000000e+00> : vector<8x384xf32>
    %526 = tpu.matmul %524, %403, %cst_423 {dimension_numbers = #tpu.dot_dimension_numbers<[1], [0], [0], [1], [0, 0, 1, 1], [], []>} : vector<8x128xf32>, vector<128x384xf32>, vector<8x384xf32> -> vector<8x384xf32>
    %527 = vector.broadcast %404 : vector<1x384xf32> to vector<8x384xf32>
    %528 = arith.addf %526, %527 : vector<8x384xf32>
    %529 = vector.extract_strided_slice %525 {offsets = [0, 0], sizes = [8, 128], strides = [1, 1]} : vector<8x384xf32> to vector<8x128xf32>
    %530 = vector.extract_strided_slice %528 {offsets = [0, 0], sizes = [8, 128], strides = [1, 1]} : vector<8x384xf32> to vector<8x128xf32>
    %531 = arith.addf %529, %530 : vector<8x128xf32>
    %532 = arith.negf %531 : vector<8x128xf32>
    %533 = math.exp %532 : vector<8x128xf32>
    %cst_424 = arith.constant 1.000000e+00 : f32
    %534 = vector.broadcast %cst_424 : f32 to vector<8x128xf32>
    %535 = arith.addf %534, %533 : vector<8x128xf32>
    %536 = arith.divf %534, %535 : vector<8x128xf32>
    %537 = vector.extract_strided_slice %525 {offsets = [0, 128], sizes = [8, 128], strides = [1, 1]} : vector<8x384xf32> to vector<8x128xf32>
    %538 = vector.extract_strided_slice %528 {offsets = [0, 128], sizes = [8, 128], strides = [1, 1]} : vector<8x384xf32> to vector<8x128xf32>
    %539 = arith.addf %537, %538 : vector<8x128xf32>
    %540 = arith.negf %539 : vector<8x128xf32>
    %541 = math.exp %540 : vector<8x128xf32>
    %cst_425 = arith.constant 1.000000e+00 : f32
    %542 = vector.broadcast %cst_425 : f32 to vector<8x128xf32>
    %543 = arith.addf %542, %541 : vector<8x128xf32>
    %544 = arith.divf %542, %543 : vector<8x128xf32>
    %545 = vector.extract_strided_slice %525 {offsets = [0, 256], sizes = [8, 128], strides = [1, 1]} : vector<8x384xf32> to vector<8x128xf32>
    %546 = vector.extract_strided_slice %528 {offsets = [0, 256], sizes = [8, 128], strides = [1, 1]} : vector<8x384xf32> to vector<8x128xf32>
    %547 = arith.mulf %536, %546 : vector<8x128xf32>
    %548 = arith.addf %545, %547 : vector<8x128xf32>
    %549 = math.tanh %548 : vector<8x128xf32>
    %cst_426 = arith.constant 1.000000e+00 : f32
    %550 = vector.broadcast %cst_426 : f32 to vector<8x128xf32>
    %551 = arith.subf %550, %544 : vector<8x128xf32>
    %552 = arith.mulf %551, %549 : vector<8x128xf32>
    %553 = arith.mulf %544, %524 : vector<8x128xf32>
    %554 = arith.addf %552, %553 : vector<8x128xf32>
    %555 = vector.extract_strided_slice %402 {offsets = [40, 0], sizes = [8, 384], strides = [1, 1]} : vector<64x384xf32> to vector<8x384xf32>
    %cst_427 = arith.constant dense<0.000000e+00> : vector<8x384xf32>
    %556 = tpu.matmul %554, %403, %cst_427 {dimension_numbers = #tpu.dot_dimension_numbers<[1], [0], [0], [1], [0, 0, 1, 1], [], []>} : vector<8x128xf32>, vector<128x384xf32>, vector<8x384xf32> -> vector<8x384xf32>
    %557 = vector.broadcast %404 : vector<1x384xf32> to vector<8x384xf32>
    %558 = arith.addf %556, %557 : vector<8x384xf32>
    %559 = vector.extract_strided_slice %555 {offsets = [0, 0], sizes = [8, 128], strides = [1, 1]} : vector<8x384xf32> to vector<8x128xf32>
    %560 = vector.extract_strided_slice %558 {offsets = [0, 0], sizes = [8, 128], strides = [1, 1]} : vector<8x384xf32> to vector<8x128xf32>
    %561 = arith.addf %559, %560 : vector<8x128xf32>
    %562 = arith.negf %561 : vector<8x128xf32>
    %563 = math.exp %562 : vector<8x128xf32>
    %cst_428 = arith.constant 1.000000e+00 : f32
    %564 = vector.broadcast %cst_428 : f32 to vector<8x128xf32>
    %565 = arith.addf %564, %563 : vector<8x128xf32>
    %566 = arith.divf %564, %565 : vector<8x128xf32>
    %567 = vector.extract_strided_slice %555 {offsets = [0, 128], sizes = [8, 128], strides = [1, 1]} : vector<8x384xf32> to vector<8x128xf32>
    %568 = vector.extract_strided_slice %558 {offsets = [0, 128], sizes = [8, 128], strides = [1, 1]} : vector<8x384xf32> to vector<8x128xf32>
    %569 = arith.addf %567, %568 : vector<8x128xf32>
    %570 = arith.negf %569 : vector<8x128xf32>
    %571 = math.exp %570 : vector<8x128xf32>
    %cst_429 = arith.constant 1.000000e+00 : f32
    %572 = vector.broadcast %cst_429 : f32 to vector<8x128xf32>
    %573 = arith.addf %572, %571 : vector<8x128xf32>
    %574 = arith.divf %572, %573 : vector<8x128xf32>
    %575 = vector.extract_strided_slice %555 {offsets = [0, 256], sizes = [8, 128], strides = [1, 1]} : vector<8x384xf32> to vector<8x128xf32>
    %576 = vector.extract_strided_slice %558 {offsets = [0, 256], sizes = [8, 128], strides = [1, 1]} : vector<8x384xf32> to vector<8x128xf32>
    %577 = arith.mulf %566, %576 : vector<8x128xf32>
    %578 = arith.addf %575, %577 : vector<8x128xf32>
    %579 = math.tanh %578 : vector<8x128xf32>
    %cst_430 = arith.constant 1.000000e+00 : f32
    %580 = vector.broadcast %cst_430 : f32 to vector<8x128xf32>
    %581 = arith.subf %580, %574 : vector<8x128xf32>
    %582 = arith.mulf %581, %579 : vector<8x128xf32>
    %583 = arith.mulf %574, %554 : vector<8x128xf32>
    %584 = arith.addf %582, %583 : vector<8x128xf32>
    %585 = vector.extract_strided_slice %402 {offsets = [48, 0], sizes = [8, 384], strides = [1, 1]} : vector<64x384xf32> to vector<8x384xf32>
    %cst_431 = arith.constant dense<0.000000e+00> : vector<8x384xf32>
    %586 = tpu.matmul %584, %403, %cst_431 {dimension_numbers = #tpu.dot_dimension_numbers<[1], [0], [0], [1], [0, 0, 1, 1], [], []>} : vector<8x128xf32>, vector<128x384xf32>, vector<8x384xf32> -> vector<8x384xf32>
    %587 = vector.broadcast %404 : vector<1x384xf32> to vector<8x384xf32>
    %588 = arith.addf %586, %587 : vector<8x384xf32>
    %589 = vector.extract_strided_slice %585 {offsets = [0, 0], sizes = [8, 128], strides = [1, 1]} : vector<8x384xf32> to vector<8x128xf32>
    %590 = vector.extract_strided_slice %588 {offsets = [0, 0], sizes = [8, 128], strides = [1, 1]} : vector<8x384xf32> to vector<8x128xf32>
    %591 = arith.addf %589, %590 : vector<8x128xf32>
    %592 = arith.negf %591 : vector<8x128xf32>
    %593 = math.exp %592 : vector<8x128xf32>
    %cst_432 = arith.constant 1.000000e+00 : f32
    %594 = vector.broadcast %cst_432 : f32 to vector<8x128xf32>
    %595 = arith.addf %594, %593 : vector<8x128xf32>
    %596 = arith.divf %594, %595 : vector<8x128xf32>
    %597 = vector.extract_strided_slice %585 {offsets = [0, 128], sizes = [8, 128], strides = [1, 1]} : vector<8x384xf32> to vector<8x128xf32>
    %598 = vector.extract_strided_slice %588 {offsets = [0, 128], sizes = [8, 128], strides = [1, 1]} : vector<8x384xf32> to vector<8x128xf32>
    %599 = arith.addf %597, %598 : vector<8x128xf32>
    %600 = arith.negf %599 : vector<8x128xf32>
    %601 = math.exp %600 : vector<8x128xf32>
    %cst_433 = arith.constant 1.000000e+00 : f32
    %602 = vector.broadcast %cst_433 : f32 to vector<8x128xf32>
    %603 = arith.addf %602, %601 : vector<8x128xf32>
    %604 = arith.divf %602, %603 : vector<8x128xf32>
    %605 = vector.extract_strided_slice %585 {offsets = [0, 256], sizes = [8, 128], strides = [1, 1]} : vector<8x384xf32> to vector<8x128xf32>
    %606 = vector.extract_strided_slice %588 {offsets = [0, 256], sizes = [8, 128], strides = [1, 1]} : vector<8x384xf32> to vector<8x128xf32>
    %607 = arith.mulf %596, %606 : vector<8x128xf32>
    %608 = arith.addf %605, %607 : vector<8x128xf32>
    %609 = math.tanh %608 : vector<8x128xf32>
    %cst_434 = arith.constant 1.000000e+00 : f32
    %610 = vector.broadcast %cst_434 : f32 to vector<8x128xf32>
    %611 = arith.subf %610, %604 : vector<8x128xf32>
    %612 = arith.mulf %611, %609 : vector<8x128xf32>
    %613 = arith.mulf %604, %584 : vector<8x128xf32>
    %614 = arith.addf %612, %613 : vector<8x128xf32>
    %615 = vector.extract_strided_slice %402 {offsets = [56, 0], sizes = [8, 384], strides = [1, 1]} : vector<64x384xf32> to vector<8x384xf32>
    %cst_435 = arith.constant dense<0.000000e+00> : vector<8x384xf32>
    %616 = tpu.matmul %614, %403, %cst_435 {dimension_numbers = #tpu.dot_dimension_numbers<[1], [0], [0], [1], [0, 0, 1, 1], [], []>} : vector<8x128xf32>, vector<128x384xf32>, vector<8x384xf32> -> vector<8x384xf32>
    %617 = vector.broadcast %404 : vector<1x384xf32> to vector<8x384xf32>
    %618 = arith.addf %616, %617 : vector<8x384xf32>
    %619 = vector.extract_strided_slice %615 {offsets = [0, 0], sizes = [8, 128], strides = [1, 1]} : vector<8x384xf32> to vector<8x128xf32>
    %620 = vector.extract_strided_slice %618 {offsets = [0, 0], sizes = [8, 128], strides = [1, 1]} : vector<8x384xf32> to vector<8x128xf32>
    %621 = arith.addf %619, %620 : vector<8x128xf32>
    %622 = arith.negf %621 : vector<8x128xf32>
    %623 = math.exp %622 : vector<8x128xf32>
    %cst_436 = arith.constant 1.000000e+00 : f32
    %624 = vector.broadcast %cst_436 : f32 to vector<8x128xf32>
    %625 = arith.addf %624, %623 : vector<8x128xf32>
    %626 = arith.divf %624, %625 : vector<8x128xf32>
    %627 = vector.extract_strided_slice %615 {offsets = [0, 128], sizes = [8, 128], strides = [1, 1]} : vector<8x384xf32> to vector<8x128xf32>
    %628 = vector.extract_strided_slice %618 {offsets = [0, 128], sizes = [8, 128], strides = [1, 1]} : vector<8x384xf32> to vector<8x128xf32>
    %629 = arith.addf %627, %628 : vector<8x128xf32>
    %630 = arith.negf %629 : vector<8x128xf32>
    %631 = math.exp %630 : vector<8x128xf32>
    %cst_437 = arith.constant 1.000000e+00 : f32
    %632 = vector.broadcast %cst_437 : f32 to vector<8x128xf32>
    %633 = arith.addf %632, %631 : vector<8x128xf32>
    %634 = arith.divf %632, %633 : vector<8x128xf32>
    %635 = vector.extract_strided_slice %615 {offsets = [0, 256], sizes = [8, 128], strides = [1, 1]} : vector<8x384xf32> to vector<8x128xf32>
    %636 = vector.extract_strided_slice %618 {offsets = [0, 256], sizes = [8, 128], strides = [1, 1]} : vector<8x384xf32> to vector<8x128xf32>
    %637 = arith.mulf %626, %636 : vector<8x128xf32>
    %638 = arith.addf %635, %637 : vector<8x128xf32>
    %639 = math.tanh %638 : vector<8x128xf32>
    %cst_438 = arith.constant 1.000000e+00 : f32
    %640 = vector.broadcast %cst_438 : f32 to vector<8x128xf32>
    %641 = arith.subf %640, %634 : vector<8x128xf32>
    %642 = arith.mulf %641, %639 : vector<8x128xf32>
    %643 = arith.mulf %634, %614 : vector<8x128xf32>
    %644 = arith.addf %642, %643 : vector<8x128xf32>
    %645 = tpu.concatenate %434, %464, %494, %524, %554, %584, %614, %644 in 0 : vector<8x128xf32>, vector<8x128xf32>, vector<8x128xf32>, vector<8x128xf32>, vector<8x128xf32>, vector<8x128xf32>, vector<8x128xf32>, vector<8x128xf32> -> vector<64x128xf32>
    %c0_439 = arith.constant 0 : index
    %c0_440 = arith.constant 0 : index
    %646 = vector.load %arg12[%c0_439, %c0_440] : memref<128x128xf32, #tpu.memory_space<vmem>>, vector<128x128xf32>
    %cst_441 = arith.constant dense<0.000000e+00> : vector<64x128xf32>
    %647 = tpu.matmul %645, %646, %cst_441 {dimension_numbers = #tpu.dot_dimension_numbers<[1], [0], [0], [1], [0, 0, 1, 1], [], []>} : vector<64x128xf32>, vector<128x128xf32>, vector<64x128xf32> -> vector<64x128xf32>
    %c0_442 = arith.constant 0 : index
    %c0_443 = arith.constant 0 : index
    %648 = vector.load %arg13[%c0_442, %c0_443] : memref<1x128xf32, #tpu.memory_space<vmem>>, vector<1x128xf32>
    %649 = vector.broadcast %648 : vector<1x128xf32> to vector<64x128xf32>
    %650 = arith.addf %647, %649 : vector<64x128xf32>
    %c0_444 = arith.constant 0 : index
    %c0_445 = arith.constant 0 : index
    %651 = vector.load %arg14[%c0_444, %c0_445] : memref<64x128xf32, #tpu.memory_space<vmem>>, vector<64x128xf32>
    tpu.vector_store %arg14[%c0_444, %c0_445], %650 {strides = array<i32>} : memref<64x128xf32, #tpu.memory_space<vmem>>, vector<64x128xf32>,
    return
  }
  func.func @transform_0(%arg0: i32, %arg1: memref<64xi32, #tpu.memory_space<smem>>) -> (i32, i32) {
    %c0_i32 = arith.constant 0 : i32
    %c0_i32_0 = arith.constant 0 : i32
    %c0_i32_1 = arith.constant 0 : i32
    return %c0_i32, %c0_i32_0 : i32, i32
  }
  func.func @transform_1(%arg0: i32, %arg1: memref<64xi32, #tpu.memory_space<smem>>) -> (i32, i32) {
    %c0_i32 = arith.constant 0 : i32
    %c0_i32_0 = arith.constant 0 : i32
    %c0_i32_1 = arith.constant 0 : i32
    return %c0_i32, %c0_i32_0 : i32, i32
  }
  func.func @transform_2(%arg0: i32, %arg1: memref<64xi32, #tpu.memory_space<smem>>) -> (i32, i32) {
    %c0_i32 = arith.constant 0 : i32
    %c0_i32_0 = arith.constant 0 : i32
    %c0_i32_1 = arith.constant 0 : i32
    return %c0_i32, %c0_i32_0 : i32, i32
  }
  func.func @transform_3(%arg0: i32, %arg1: memref<64xi32, #tpu.memory_space<smem>>) -> (i32, i32) {
    %c0_i32 = arith.constant 0 : i32
    %c0_i32_0 = arith.constant 0 : i32
    %c0_i32_1 = arith.constant 0 : i32
    return %c0_i32, %c0_i32_0 : i32, i32
  }
  func.func @transform_4(%arg0: i32, %arg1: memref<64xi32, #tpu.memory_space<smem>>) -> (i32, i32) {
    %c0_i32 = arith.constant 0 : i32
    %c0_i32_0 = arith.constant 0 : i32
    %c0_i32_1 = arith.constant 0 : i32
    return %c0_i32, %c0_i32_0 : i32, i32
  }
  func.func @transform_6(%arg0: i32, %arg1: memref<64xi32, #tpu.memory_space<smem>>) -> (i32, i32) {
    %c0_i32 = arith.constant 0 : i32
    %c0_i32_0 = arith.constant 0 : i32
    %c0_i32_1 = arith.constant 0 : i32
    return %c0_i32, %c0_i32_0 : i32, i32
  }
  func.func @transform_7(%arg0: i32, %arg1: memref<64xi32, #tpu.memory_space<smem>>) -> (i32, i32) {
    %c0_i32 = arith.constant 0 : i32
    %c0_i32_0 = arith.constant 0 : i32
    %c0_i32_1 = arith.constant 0 : i32
    return %c0_i32, %c0_i32_0 : i32, i32
  }
  func.func @transform_8(%arg0: i32, %arg1: memref<64xi32, #tpu.memory_space<smem>>) -> (i32, i32) {
    %c0_i32 = arith.constant 0 : i32
    %c0_i32_0 = arith.constant 0 : i32
    %c0_i32_1 = arith.constant 0 : i32
    return %c0_i32, %c0_i32_0 : i32, i32
  }
  func.func @transform_9(%arg0: i32, %arg1: memref<64xi32, #tpu.memory_space<smem>>) -> (i32, i32) {
    %c0_i32 = arith.constant 0 : i32
    %c0_i32_0 = arith.constant 0 : i32
    %c0_i32_1 = arith.constant 0 : i32
    return %c0_i32, %c0_i32_0 : i32, i32
  }
  func.func @transform_10(%arg0: i32, %arg1: memref<64xi32, #tpu.memory_space<smem>>) -> (i32, i32) {
    %c0_i32 = arith.constant 0 : i32
    %c0_i32_0 = arith.constant 0 : i32
    %c0_i32_1 = arith.constant 0 : i32
    return %c0_i32, %c0_i32_0 : i32, i32
  }
  func.func @transform_11(%arg0: i32, %arg1: memref<64xi32, #tpu.memory_space<smem>>) -> (i32, i32) {
    %c0_i32 = arith.constant 0 : i32
    %c0_i32_0 = arith.constant 0 : i32
    %c0_i32_1 = arith.constant 0 : i32
    return %c0_i32, %c0_i32_0 : i32, i32
  }
  func.func @transform_12(%arg0: i32, %arg1: memref<64xi32, #tpu.memory_space<smem>>) -> (i32, i32) {
    %c0_i32 = arith.constant 0 : i32
    %c0_i32_0 = arith.constant 0 : i32
    %c0_i32_1 = arith.constant 0 : i32
    return %c0_i32, %c0_i32_0 : i32, i32
  }
}

</mosaic_0001>

<bundles_post_ra>
// kernel: inverse_gen_forward.1
= control target key start
LH: loop header
LB: loop body
LE: loop exit
PB: predicated region body
PF: predicated region fallthrough
CT: control target
= control target key end

     0   :  { %s8479_s0 = inlined_call_operand.vmem [shape: s32[64], index: 0, kind: input, shape index: {}]   ;;  %s8480_s1 = inlined_call_operand.vmem [shape: f32[8,128], index: 1, kind: input, shape index: {}]   ;;  %s8481_s2 = inlined_call_operand.hbm [shape: f32[128,128], index: 2, kind: input, shape index: {}]   ;;  %s8482_s3 = inlined_call_operand.vmem [shape: f32[1,128], index: 3, kind: input, shape index: {}]   ;;  %s8483_s4 = inlined_call_operand.hbm [shape: f32[128,128], index: 4, kind: input, shape index: {}]   ;;  %s8484_s5 = inlined_call_operand.vmem [shape: f32[1,128], index: 5, kind: input, shape index: {}]   ;;  %s8485_s6 = inlined_call_operand.vmem [shape: f32[32,128], index: 6, kind: input, shape index: {}]   ;;  %s8486_s7 = inlined_call_operand.hbm [shape: f32[128,384], index: 7, kind: input, shape index: {}]   ;;  %s8487_s8 = inlined_call_operand.hbm [shape: f32[128,384], index: 8, kind: input, shape index: {}]   ;;  %s8488_s9 = inlined_call_operand.vmem [shape: f32[1,384], index: 9, kind: input, shape index: {}]   ;;  %s8489_s10 = inlined_call_operand.vmem [shape: f32[1,384], index: 10, kind: input, shape index: {}]   ;;  %s8490_s11 = inlined_call_operand.hbm [shape: f32[128,128], index: 11, kind: input, shape index: {}]   ;;  %s8491_s12 = inlined_call_operand.vmem [shape: f32[1,128], index: 12, kind: input, shape index: {}]   ;;  %s8492_s13 = inlined_call_operand.vmem [shape: f32[64,128], index: 13, kind: output, shape index: {}]  }
   0x1   :  { %s18_s27 = sshll.u32 %s8479_s0, 4  ;;  %s19_s27 = int_to_ptr.vmem [resolvable:$true] %s18_s27 }
   0x2   :  { %s7077_s28 = scalar_lea.vmem %s19_s27, 16  ;;  %p7082_p1 = scmp.lt.s32.totalorder %s19_s27, %s19_s27 }
   0x3   :  { %p7078_p0 = scmp.ne.s32.totalorder %s19_s27, %s7077_s28  ;;  %p7083_p2 = scmp.lt.s32.totalorder %s7077_s28, %s7077_s28 }
   0x5   :  { %p7084_p3 = por %p7083_p2, %p7082_p1 }
   0x7   :  { %p7085_p4 = pnand %p7084_p3, %p7078_p0 }
   0x9   :  { %7088 = shalt.err (!%p7085_p4)  }
   0xa   :  { %s7199_s29 = smov [#allocation5]  }
   0xb   :  { %21 = dma.vmem_to_smem %s19_s27, 16, %s7199_s29, [#allocation4] }
   0xc   :  { %7189 = dma.done.wait [#allocation4], 16 }
   0xd   :  { %7190 = vsyncadd [#allocation4], 4294967280 }
   0xe   :  { %23 = sfence }
   0xf   :  { %24 = vsyncpa [#allocation7], 0 }
  0x10   :  { %25 = vsyncpa [#allocation9], 0 }
  0x11   :  { %26 = vsyncpa [#allocation12], 0  ;;  %s7200_s30 = smov [#allocation8]  }
  0x12   :  { %s48_s14 = sshll.u32 %s7200_s30, 4  ;;  %s49_s14 = int_to_ptr.vmem [resolvable:$true] %s48_s14 }
  0x13   :  { %s7097_s0 = scalar_lea.vmem %s49_s14, 2048  ;;  %p7102_p6 = scmp.lt.s32.totalorder %s49_s14, %s49_s14 }
  0x14   :  { %p7098_p5 = scmp.ne.s32.totalorder %s49_s14, %s7097_s0  ;;  %p7103_p7 = scmp.lt.s32.totalorder %s7097_s0, %s7097_s0 }
  0x16   :  { %p7104_p8 = por %p7103_p7, %p7102_p6 }
  0x18   :  { %p7105_p9 = pnand %p7104_p8, %p7098_p5 }
  0x1a   :  { %7108 = shalt.err (!%p7105_p9)
}
  0x1b   :  { %s7201_s15 = smov 128   ;;  %s7202_s16 = smov 8  }
  0x1c   :  { %54 = dma.hbm_to_vmem [thread:$0]  %s8483_s4, 2048, %s49_s14, [#allocation9], %s7201_s15, %s7201_s15, %s7202_s16  }
  0x1d   :  { %s7203_s19 = smov [#allocation11]   ;;  %s7204_s21 = smov [#allocation6]  }
  0x1e   :  { %s74_s20 = sshll.u32 %s7203_s19, 4  ;;  %s34_s22 = sshll.u32 %s7204_s21, 4  ;;  %s75_s20 = int_to_ptr.vmem [resolvable:$true] %s74_s20  ;;  %s35_s22 = int_to_ptr.vmem [resolvable:$true] %s34_s22 }
  0x1f   :  { %s7117_s23 = scalar_lea.vmem %s75_s20, 6144  ;;  %p7122_p11 = scmp.lt.s32.totalorder %s75_s20, %s75_s20 }
  0x20   :  { %p7118_p10 = scmp.ne.s32.totalorder %s75_s20, %s7117_s23  ;;  %p7123_p12 = scmp.lt.s32.totalorder %s7117_s23, %s7117_s23 }
  0x22   :  { %p7124_p13 = por %p7123_p12, %p7122_p11 }
  0x24   :  { %p7125_p0 = pnand %p7124_p13, %p7118_p10 }
  0x26   :  { %7128 = shalt.err (!%p7125_p0)
}
  0x27   :  { %s7205_s24 = smov 384   ;;  %s7206_s25 = smov 24  }
  0x28   :  { %80 = dma.hbm_to_vmem [thread:$0]  %s8487_s8, 6144, %s75_s20, [#allocation12], %s7205_s24, %s7205_s24, %s7206_s25  }
  0x29   :  { %s7137_s4 = scalar_lea.vmem %s35_s22, 2048  ;;  %p7142_p2 = scmp.lt.s32.totalorder %s35_s22, %s35_s22 }
  0x2a   :  { %p7138_p1 = scmp.ne.s32.totalorder %s35_s22, %s7137_s4  ;;  %p7143_p3 = scmp.lt.s32.totalorder %s7137_s4, %s7137_s4 }
  0x2c   :  { %p7144_p4 = por %p7143_p3, %p7142_p2 }
  0x2e   :  { %p7145_p5 = pnand %p7144_p4, %p7138_p1 }
  0x30   :  { %7148 = shalt.err (!%p7145_p5)
}
  0x31   :  { %40 = dma.hbm_to_vmem [thread:$0]  %s8481_s2, 2048, %s35_s22, [#allocation7], %s7201_s15, %s7201_s15, %s7202_s16  }
  0x32   :  { %s7207_s30 = smov [#allocation10]   ;;  %s7208_s0 = smov [#allocation13]  }
  0x33   :  { %s62_s14 = sshll.u32 %s7207_s30, 4  ;;  %s90_s8 = sshll.u32 %s7208_s0, 4  ;;  %s63_s14 = int_to_ptr.vmem [resolvable:$true] %s62_s14  ;;  %s91_s8 = int_to_ptr.vmem [resolvable:$true] %s90_s8 }
  0x34   :  { %s7157_s17 = scalar_lea.vmem %s63_s14, 6144  ;;  %p7162_p7 = scmp.lt.s32.totalorder %s63_s14, %s63_s14 }
  0x35   :  { %p7158_p6 = scmp.ne.s32.totalorder %s63_s14, %s7157_s17  ;;  %p7163_p8 = scmp.lt.s32.totalorder %s7157_s17, %s7157_s17 }
  0x37   :  { %p7164_p9 = por %p7163_p8, %p7162_p7 }
  0x39   :  { %p7165_p10 = pnand %p7164_p9, %p7158_p6 }
  0x3b   :  { %7168 = shalt.err (!%p7165_p10)
}
  0x3c   :  { %68 = dma.hbm_to_vmem [thread:$0]  %s8486_s7, 6144, %s63_s14, [#allocation9], %s7205_s24, %s7205_s24, %s7206_s25  }
  0x3d   :  { %s7177_s20 = scalar_lea.vmem %s91_s8, 2048  ;;  %p7182_p12 = scmp.lt.s32.totalorder %s91_s8, %s91_s8 }
  0x3e   :  { %p7178_p11 = scmp.ne.s32.totalorder %s91_s8, %s7177_s20  ;;  %p7183_p13 = scmp.lt.s32.totalorder %s7177_s20, %s7177_s20 }
  0x40   :  { %p7184_p0 = por %p7183_p13, %p7182_p12 }
  0x42   :  { %p7185_p1 = pnand %p7184_p0, %p7178_p11 }
  0x44   :  { %7188 = shalt.err (!%p7185_p1)
}
  0x45   :  { %96 = dma.hbm_to_vmem [thread:$0]  %s8490_s11, 2048, %s91_s8, [#allocation12], %s7201_s15, %s7201_s15, %s7202_s16  }
  0x46   :  { %7191 = dma.done.wait [#allocation7], 2048  }
  0x47   :  { %7192 = vsyncadd [#allocation7], 4294965248 }
  0x48   :  { %7193 = dma.done.wait [#allocation9], 8192  }
  0x49   :  { %7194 = vsyncadd [#allocation9], 4294959104 }
  0x4a   :  { %7195 = dma.done.wait [#allocation12], 8192  }
  0x4b   :  { %7196 = vsyncadd [#allocation12], 4294959104  ;;  %s114_s7 = sld [smem:[#allocation5]] }
  0x51   :  { %s115_s24 = scalar_lea.vmem %s8485_s6, %s114_s7 }
  0x52   :  { %v134_v0 = vld [vmem:[%s115_s24] sm:$0x1] }
  0x53   :  { %135 = vst [vmem:[#allocation2] sm:$0x1] %v134_v0 }
  0x54   :  { %161 = vsyncadd [#allocation3], 16  ;;  %s6198_s25 = sld [smem:[#allocation5 + $0x1]] }
  0x5a   :  { %s163_s4 = scalar_lea.vmem %s8485_s6, %s6198_s25 }
  0x5b   :  { %v183_v1 = vld [vmem:[%s163_s4] sm:$0x1] }
  0x5c   :  { %184 = vst [vmem:[#allocation2 + $0x1] sm:$0x1] %v183_v1 }
  0x5d   :  { %210 = vsyncadd [#allocation3], 16  ;;  %s6199_s11 = sld [smem:[#allocation5 + $0x2]] }
  0x63   :  { %s212_s28 = scalar_lea.vmem %s8485_s6, %s6199_s11 }
  0x64   :  { %v232_v2 = vld [vmem:[%s212_s28] sm:$0x1] }
  0x65   :  { %233 = vst [vmem:[#allocation2 + $0x2] sm:$0x1] %v232_v2 }
  0x66   :  { %259 = vsyncadd [#allocation3], 16  ;;  %s6200_s29 = sld [smem:[#allocation5 + $0x3]] }
  0x6c   :  { %s261_s0 = scalar_lea.vmem %s8485_s6, %s6200_s29 }
  0x6d   :  { %v281_v3 = vld [vmem:[%s261_s0] sm:$0x1] }
  0x6e   :  { %282 = vst [vmem:[#allocation2 + $0x3] sm:$0x1] %v281_v3 }
  0x6f   :  { %308 = vsyncadd [#allocation3], 16  ;;  %s6201_s8 = sld [smem:[#allocation5 + $0x4]] }
  0x75   :  { %s310_s19 = scalar_lea.vmem %s8485_s6, %s6201_s8 }
  0x76   :  { %v330_v4 = vld [vmem:[%s310_s19] sm:$0x1] }
  0x77   :  { %331 = vst [vmem:[#allocation2 + $0x4] sm:$0x1] %v330_v4 }
  0x78   :  { %357 = vsyncadd [#allocation3], 16  ;;  %s6202_s20 = sld [smem:[#allocation5 + $0x5]] }
  0x7e   :  { %s359_s7 = scalar_lea.vmem %s8485_s6, %s6202_s20 }
  0x7f   :  { %v379_v5 = vld [vmem:[%s359_s7] sm:$0x1] }
  0x80   :  { %380 = vst [vmem:[#allocation2 + $0x5] sm:$0x1] %v379_v5 }
  0x81   :  { %406 = vsyncadd [#allocation3], 16  ;;  %s6203_s22 = sld [smem:[#allocation5 + $0x6]] }
  0x87   :  { %s408_s25 = scalar_lea.vmem %s8485_s6, %s6203_s22 }
  0x88   :  { %v428_v6 = vld [vmem:[%s408_s25] sm:$0x1] }
  0x89   :  { %429 = vst [vmem:[#allocation2 + $0x6] sm:$0x1] %v428_v6 }
  0x8a   :  { %455 = vsyncadd [#allocation3], 16  ;;  %s6204_s26 = sld [smem:[#allocation5 + $0x7]] }
  0x90   :  { %s457_s11 = scalar_lea.vmem %s8485_s6, %s6204_s26 }
  0x91   :  { %v477_v7 = vld [vmem:[%s457_s11] sm:$0x1] }
  0x92   :  { %478 = vst [vmem:[#allocation2 + $0x7] sm:$0x1] %v477_v7 }
  0x93   :  { %504 = vsyncadd [#allocation3], 16  ;;  %s6205_s15 = sld [smem:[#allocation5 + $0x8]] }
  0x99   :  { %s506_s29 = scalar_lea.vmem %s8485_s6, %s6205_s15 }
  0x9a   :  { %v526_v8 = vld [vmem:[%s506_s29] sm:$0x1] }
  0x9b   :  { %527 = vst [vmem:[#allocation2 + $0x8] sm:$0x1] %v526_v8 }
  0x9c   :  { %553 = vsyncadd [#allocation3], 16  ;;  %s6206_s30 = sld [smem:[#allocation5 + $0x9]] }
  0xa2   :  { %s555_s8 = scalar_lea.vmem %s8485_s6, %s6206_s30 }
  0xa3   :  { %v575_v9 = vld [vmem:[%s555_s8] sm:$0x1] }
  0xa4   :  { %576 = vst [vmem:[#allocation2 + $0x9] sm:$0x1] %v575_v9 }
  0xa5   :  { %602 = vsyncadd [#allocation3], 16  ;;  %s6207_s17 = sld [smem:[#allocation5 + $0xa]] }
  0xab   :  { %s604_s20 = scalar_lea.vmem %s8485_s6, %s6207_s17 }
  0xac   :  { %v624_v10 = vld [vmem:[%s604_s20] sm:$0x1] }
  0xad   :  { %625 = vst [vmem:[#allocation2 + $0xa] sm:$0x1] %v624_v10 }
  0xae   :  { %651 = vsyncadd [#allocation3], 16  ;;  %s6208_s2 = sld [smem:[#allocation5 + $0xb]] }
  0xb4   :  { %s653_s22 = scalar_lea.vmem %s8485_s6, %s6208_s2 }
  0xb5   :  { %v673_v11 = vld [vmem:[%s653_s22] sm:$0x1] }
  0xb6   :  { %674 = vst [vmem:[#allocation2 + $0xb] sm:$0x1] %v673_v11 }
  0xb7   :  { %700 = vsyncadd [#allocation3], 16  ;;  %s6209_s23 = sld [smem:[#allocation5 + $0xc]] }
  0xbd   :  { %s702_s26 = scalar_lea.vmem %s8485_s6, %s6209_s23 }
  0xbe   :  { %v722_v12 = vld [vmem:[%s702_s26] sm:$0x1] }
  0xbf   :  { %723 = vst [vmem:[#allocation2 + $0xc] sm:$0x1] %v722_v12 }
  0xc0   :  { %749 = vsyncadd [#allocation3], 16  ;;  %s6210_s27 = sld [smem:[#allocation5 + $0xd]] }
  0xc6   :  { %s751_s15 = scalar_lea.vmem %s8485_s6, %s6210_s27 }
  0xc7   :  { %v771_v13 = vld [vmem:[%s751_s15] sm:$0x1] }
  0xc8   :  { %772 = vst [vmem:[#allocation2 + $0xd] sm:$0x1] %v771_v13 }
  0xc9   :  { %798 = vsyncadd [#allocation3], 16  ;;  %s6211_s16 = sld [smem:[#allocation5 + $0xe]] }
  0xcf   :  { %s800_s30 = scalar_lea.vmem %s8485_s6, %s6211_s16 }
  0xd0   :  { %v820_v14 = vld [vmem:[%s800_s30] sm:$0x1] }
  0xd1   :  { %821 = vst [vmem:[#allocation2 + $0xe] sm:$0x1] %v820_v14 }
  0xd2   :  { %847 = vsyncadd [#allocation3], 16  ;;  %s6212_s14 = sld [smem:[#allocation5 + $0xf]] }
  0xd8   :  { %s849_s17 = scalar_lea.vmem %s8485_s6, %s6212_s14 }
  0xd9   :  { %v869_v15 = vld [vmem:[%s849_s17] sm:$0x1] }
  0xda   :  { %870 = vst [vmem:[#allocation2 + $0xf] sm:$0x1] %v869_v15 }
  0xdb   :  { %896 = vsyncadd [#allocation3], 16  ;;  %s6213_s18 = sld [smem:[#allocation5 + $0x10]] }
  0xe1   :  { %s898_s2 = scalar_lea.vmem %s8485_s6, %s6213_s18 }
  0xe2   :  { %v918_v16 = vld [vmem:[%s898_s2] sm:$0x1] }
  0xe3   :  { %919 = vst [vmem:[#allocation2 + $0x10] sm:$0x1] %v918_v16 }
  0xe4   :  { %945 = vsyncadd [#allocation3], 16  ;;  %s6214_s21 = sld [smem:[#allocation5 + $0x11]] }
  0xea   :  { %s947_s23 = scalar_lea.vmem %s8485_s6, %s6214_s21 }
  0xeb   :  { %v967_v17 = vld [vmem:[%s947_s23] sm:$0x1] }
  0xec   :  { %968 = vst [vmem:[#allocation2 + $0x11] sm:$0x1] %v967_v17 }
  0xed   :  { %994 = vsyncadd [#allocation3], 16  ;;  %s6215_s24 = sld [smem:[#allocation5 + $0x12]] }
  0xf3   :  { %s996_s27 = scalar_lea.vmem %s8485_s6, %s6215_s24 }
  0xf4   :  { %v1016_v18 = vld [vmem:[%s996_s27] sm:$0x1] }
  0xf5   :  { %1017 = vst [vmem:[#allocation2 + $0x12] sm:$0x1] %v1016_v18 }
  0xf6   :  { %1043 = vsyncadd [#allocation3], 16  ;;  %s6216_s4 = sld [smem:[#allocation5 + $0x13]] }
  0xfc   :  { %s1045_s16 = scalar_lea.vmem %s8485_s6, %s6216_s4 }
  0xfd   :  { %v1065_v19 = vld [vmem:[%s1045_s16] sm:$0x1] }
  0xfe   :  { %1066 = vst [vmem:[#allocation2 + $0x13] sm:$0x1] %v1065_v19 }
  0xff   :  { %1092 = vsyncadd [#allocation3], 16  ;;  %s6217_s28 = sld [smem:[#allocation5 + $0x14]] }
 0x105   :  { %s1094_s14 = scalar_lea.vmem %s8485_s6, %s6217_s28 }
 0x106   :  { %v1114_v20 = vld [vmem:[%s1094_s14] sm:$0x1] }
 0x107   :  { %1115 = vst [vmem:[#allocation2 + $0x14] sm:$0x1] %v1114_v20 }
 0x108   :  { %1141 = vsyncadd [#allocation3], 16  ;;  %s6218_s0 = sld [smem:[#allocation5 + $0x15]] }
 0x10e   :  { %s1143_s18 = scalar_lea.vmem %s8485_s6, %s6218_s0 }
 0x10f   :  { %v1163_v21 = vld [vmem:[%s1143_s18] sm:$0x1] }
 0x110   :  { %1164 = vst [vmem:[#allocation2 + $0x15] sm:$0x1] %v1163_v21 }
 0x111   :  { %1190 = vsyncadd [#allocation3], 16  ;;  %s6219_s19 = sld [smem:[#allocation5 + $0x16]] }
 0x117   :  { %s1192_s21 = scalar_lea.vmem %s8485_s6, %s6219_s19 }
 0x118   :  { %v1212_v22 = vld [vmem:[%s1192_s21] sm:$0x1] }
 0x119   :  { %1213 = vst [vmem:[#allocation2 + $0x16] sm:$0x1] %v1212_v22 }
 0x11a   :  { %1239 = vsyncadd [#allocation3], 16  ;;  %s6220_s7 = sld [smem:[#allocation5 + $0x17]] }
 0x120   :  { %s1241_s24 = scalar_lea.vmem %s8485_s6, %s6220_s7 }
 0x121   :  { %v1261_v23 = vld [vmem:[%s1241_s24] sm:$0x1] }
 0x122   :  { %1262 = vst [vmem:[#allocation2 + $0x17] sm:$0x1] %v1261_v23 }
 0x123   :  { %1288 = vsyncadd [#allocation3], 16  ;;  %s6221_s25 = sld [smem:[#allocation5 + $0x18]] }
 0x129   :  { %s1290_s4 = scalar_lea.vmem %s8485_s6, %s6221_s25 }
 0x12a   :  { %v1310_v24 = vld [vmem:[%s1290_s4] sm:$0x1] }
 0x12b   :  { %1311 = vst [vmem:[#allocation2 + $0x18] sm:$0x1] %v1310_v24 }
 0x12c   :  { %1337 = vsyncadd [#allocation3], 16  ;;  %s6222_s11 = sld [smem:[#allocation5 + $0x19]] }
 0x132   :  { %s1339_s28 = scalar_lea.vmem %s8485_s6, %s6222_s11 }
 0x133   :  { %v1359_v25 = vld [vmem:[%s1339_s28] sm:$0x1] }
 0x134   :  { %1360 = vst [vmem:[#allocation2 + $0x19] sm:$0x1] %v1359_v25 }
 0x135   :  { %1386 = vsyncadd [#allocation3], 16  ;;  %s6223_s29 = sld [smem:[#allocation5 + $0x1a]] }
 0x13b   :  { %s1388_s0 = scalar_lea.vmem %s8485_s6, %s6223_s29 }
 0x13c   :  { %v1408_v26 = vld [vmem:[%s1388_s0] sm:$0x1] }
 0x13d   :  { %1409 = vst [vmem:[#allocation2 + $0x1a] sm:$0x1] %v1408_v26 }
 0x13e   :  { %1435 = vsyncadd [#allocation3], 16  ;;  %s6224_s8 = sld [smem:[#allocation5 + $0x1b]] }
 0x144   :  { %s1437_s19 = scalar_lea.vmem %s8485_s6, %s6224_s8 }
 0x145   :  { %v1457_v27 = vld [vmem:[%s1437_s19] sm:$0x1] }
 0x146   :  { %1458 = vst [vmem:[#allocation2 + $0x1b] sm:$0x1] %v1457_v27 }
 0x147   :  { %1484 = vsyncadd [#allocation3], 16  ;;  %s6225_s20 = sld [smem:[#allocation5 + $0x1c]] }
 0x14d   :  { %s1486_s7 = scalar_lea.vmem %s8485_s6, %s6225_s20 }
 0x14e   :  { %v1506_v28 = vld [vmem:[%s1486_s7] sm:$0x1] }
 0x14f   :  { %1507 = vst [vmem:[#allocation2 + $0x1c] sm:$0x1] %v1506_v28 }
 0x150   :  { %1533 = vsyncadd [#allocation3], 16  ;;  %s6226_s22 = sld [smem:[#allocation5 + $0x1d]] }
 0x156   :  { %s1535_s25 = scalar_lea.vmem %s8485_s6, %s6226_s22 }
 0x157   :  { %v1555_v29 = vld [vmem:[%s1535_s25] sm:$0x1] }
 0x158   :  { %1556 = vst [vmem:[#allocation2 + $0x1d] sm:$0x1] %v1555_v29 }
 0x159   :  { %1582 = vsyncadd [#allocation3], 16  ;;  %s6227_s26 = sld [smem:[#allocation5 + $0x1e]] }
 0x15f   :  { %s1584_s11 = scalar_lea.vmem %s8485_s6, %s6227_s26 }
 0x160   :  { %v1604_v30 = vld [vmem:[%s1584_s11] sm:$0x1] }
 0x161   :  { %1605 = vst [vmem:[#allocation2 + $0x1e] sm:$0x1] %v1604_v30 }
 0x162   :  { %1631 = vsyncadd [#allocation3], 16  ;;  %s6228_s15 = sld [smem:[#allocation5 + $0x1f]] }
 0x168   :  { %s1633_s29 = scalar_lea.vmem %s8485_s6, %s6228_s15 }
 0x169   :  { %v1653_v31 = vld [vmem:[%s1633_s29] sm:$0x1] }
 0x16a   :  { %1654 = vst [vmem:[#allocation2 + $0x1f] sm:$0x1] %v1653_v31 }
 0x16b   :  { %1680 = vsyncadd [#allocation3], 16  ;;  %s6229_s30 = sld [smem:[#allocation5 + $0x20]] }
 0x171   :  { %s1682_s8 = scalar_lea.vmem %s8485_s6, %s6229_s30 }
 0x172   :  { %v1702_v32 = vld [vmem:[%s1682_s8] sm:$0x1] }
 0x173   :  { %1703 = vst [vmem:[#allocation2 + $0x20] sm:$0x1] %v1702_v32 }
 0x174   :  { %1729 = vsyncadd [#allocation3], 16  ;;  %s6230_s17 = sld [smem:[#allocation5 + $0x21]] }
 0x17a   :  { %s1731_s20 = scalar_lea.vmem %s8485_s6, %s6230_s17 }
 0x17b   :  { %v1751_v33 = vld [vmem:[%s1731_s20] sm:$0x1] }
 0x17c   :  { %1752 = vst [vmem:[#allocation2 + $0x21] sm:$0x1] %v1751_v33 }
 0x17d   :  { %1778 = vsyncadd [#allocation3], 16  ;;  %s6231_s2 = sld [smem:[#allocation5 + $0x22]] }
 0x183   :  { %s1780_s22 = scalar_lea.vmem %s8485_s6, %s6231_s2 }
 0x184   :  { %v1800_v34 = vld [vmem:[%s1780_s22] sm:$0x1] }
 0x185   :  { %1801 = vst [vmem:[#allocation2 + $0x22] sm:$0x1] %v1800_v34 }
 0x186   :  { %1827 = vsyncadd [#allocation3], 16  ;;  %s6232_s23 = sld [smem:[#allocation5 + $0x23]] }
 0x18c   :  { %s1829_s26 = scalar_lea.vmem %s8485_s6, %s6232_s23 }
 0x18d   :  { %v1849_v35 = vld [vmem:[%s1829_s26] sm:$0x1] }
 0x18e   :  { %1850 = vst [vmem:[#allocation2 + $0x23] sm:$0x1] %v1849_v35 }
 0x18f   :  { %1876 = vsyncadd [#allocation3], 16  ;;  %s6233_s27 = sld [smem:[#allocation5 + $0x24]] }
 0x195   :  { %s1878_s15 = scalar_lea.vmem %s8485_s6, %s6233_s27 }
 0x196   :  { %v1898_v36 = vld [vmem:[%s1878_s15] sm:$0x1] }
 0x197   :  { %1899 = vst [vmem:[#allocation2 + $0x24] sm:$0x1] %v1898_v36 }
 0x198   :  { %1925 = vsyncadd [#allocation3], 16  ;;  %s6234_s16 = sld [smem:[#allocation5 + $0x25]] }
 0x19e   :  { %s1927_s30 = scalar_lea.vmem %s8485_s6, %s6234_s16 }
 0x19f   :  { %v1947_v37 = vld [vmem:[%s1927_s30] sm:$0x1] }
 0x1a0   :  { %1948 = vst [vmem:[#allocation2 + $0x25] sm:$0x1] %v1947_v37 }
 0x1a1   :  { %1974 = vsyncadd [#allocation3], 16  ;;  %s6235_s14 = sld [smem:[#allocation5 + $0x26]] }
 0x1a7   :  { %s1976_s17 = scalar_lea.vmem %s8485_s6, %s6235_s14 }
 0x1a8   :  { %v1996_v38 = vld [vmem:[%s1976_s17] sm:$0x1] }
 0x1a9   :  { %1997 = vst [vmem:[#allocation2 + $0x26] sm:$0x1] %v1996_v38 }
 0x1aa   :  { %2023 = vsyncadd [#allocation3], 16  ;;  %s6236_s18 = sld [smem:[#allocation5 + $0x27]] }
 0x1b0   :  { %s2025_s2 = scalar_lea.vmem %s8485_s6, %s6236_s18 }
 0x1b1   :  { %v2045_v39 = vld [vmem:[%s2025_s2] sm:$0x1] }
 0x1b2   :  { %2046 = vst [vmem:[#allocation2 + $0x27] sm:$0x1] %v2045_v39 }
 0x1b3   :  { %2072 = vsyncadd [#allocation3], 16  ;;  %s6237_s21 = sld [smem:[#allocation5 + $0x28]] }
 0x1b9   :  { %s2074_s23 = scalar_lea.vmem %s8485_s6, %s6237_s21 }
 0x1ba   :  { %v2094_v40 = vld [vmem:[%s2074_s23] sm:$0x1] }
 0x1bb   :  { %2095 = vst [vmem:[#allocation2 + $0x28] sm:$0x1] %v2094_v40 }
 0x1bc   :  { %2121 = vsyncadd [#allocation3], 16  ;;  %s6238_s24 = sld [smem:[#allocation5 + $0x29]] }
 0x1c2   :  { %s2123_s27 = scalar_lea.vmem %s8485_s6, %s6238_s24 }
 0x1c3   :  { %v2143_v41 = vld [vmem:[%s2123_s27] sm:$0x1] }
 0x1c4   :  { %2144 = vst [vmem:[#allocation2 + $0x29] sm:$0x1] %v2143_v41 }
 0x1c5   :  { %2170 = vsyncadd [#allocation3], 16  ;;  %s6239_s4 = sld [smem:[#allocation5 + $0x2a]] }
 0x1cb   :  { %s2172_s16 = scalar_lea.vmem %s8485_s6, %s6239_s4 }
 0x1cc   :  { %v2192_v42 = vld [vmem:[%s2172_s16] sm:$0x1] }
 0x1cd   :  { %2193 = vst [vmem:[#allocation2 + $0x2a] sm:$0x1] %v2192_v42 }
 0x1ce   :  { %2219 = vsyncadd [#allocation3], 16  ;;  %s6240_s28 = sld [smem:[#allocation5 + $0x2b]] }
 0x1d4   :  { %s2221_s14 = scalar_lea.vmem %s8485_s6, %s6240_s28 }
 0x1d5   :  { %v2241_v43 = vld [vmem:[%s2221_s14] sm:$0x1] }
 0x1d6   :  { %2242 = vst [vmem:[#allocation2 + $0x2b] sm:$0x1] %v2241_v43 }
 0x1d7   :  { %2268 = vsyncadd [#allocation3], 16  ;;  %s6241_s0 = sld [smem:[#allocation5 + $0x2c]] }
 0x1dd   :  { %s2270_s18 = scalar_lea.vmem %s8485_s6, %s6241_s0 }
 0x1de   :  { %v2290_v44 = vld [vmem:[%s2270_s18] sm:$0x1] }
 0x1df   :  { %2291 = vst [vmem:[#allocation2 + $0x2c] sm:$0x1] %v2290_v44 }
 0x1e0   :  { %2317 = vsyncadd [#allocation3], 16  ;;  %s6242_s19 = sld [smem:[#allocation5 + $0x2d]] }
 0x1e6   :  { %s2319_s21 = scalar_lea.vmem %s8485_s6, %s6242_s19 }
 0x1e7   :  { %v2339_v45 = vld [vmem:[%s2319_s21] sm:$0x1] }
 0x1e8   :  { %2340 = vst [vmem:[#allocation2 + $0x2d] sm:$0x1] %v2339_v45 }
 0x1e9   :  { %2366 = vsyncadd [#allocation3], 16  ;;  %s6243_s7 = sld [smem:[#allocation5 + $0x2e]] }
 0x1ef   :  { %s2368_s24 = scalar_lea.vmem %s8485_s6, %s6243_s7 }
 0x1f0   :  { %v2388_v46 = vld [vmem:[%s2368_s24] sm:$0x1] }
 0x1f1   :  { %2389 = vst [vmem:[#allocation2 + $0x2e] sm:$0x1] %v2388_v46 }
 0x1f2   :  { %2415 = vsyncadd [#allocation3], 16  ;;  %s6244_s25 = sld [smem:[#allocation5 + $0x2f]] }
 0x1f8   :  { %s2417_s4 = scalar_lea.vmem %s8485_s6, %s6244_s25 }
 0x1f9   :  { %v2437_v47 = vld [vmem:[%s2417_s4] sm:$0x1] }
 0x1fa   :  { %2438 = vst [vmem:[#allocation2 + $0x2f] sm:$0x1] %v2437_v47 }
 0x1fb   :  { %2464 = vsyncadd [#allocation3], 16  ;;  %s6245_s11 = sld [smem:[#allocation5 + $0x30]] }
 0x201   :  { %s2466_s28 = scalar_lea.vmem %s8485_s6, %s6245_s11 }
 0x202   :  { %v2486_v48 = vld [vmem:[%s2466_s28] sm:$0x1] }
 0x203   :  { %2487 = vst [vmem:[#allocation2 + $0x30] sm:$0x1] %v2486_v48 }
 0x204   :  { %2513 = vsyncadd [#allocation3], 16  ;;  %s6246_s29 = sld [smem:[#allocation5 + $0x31]] }
 0x20a   :  { %s2515_s0 = scalar_lea.vmem %s8485_s6, %s6246_s29 }
 0x20b   :  { %v2535_v49 = vld [vmem:[%s2515_s0] sm:$0x1] }
 0x20c   :  { %2536 = vst [vmem:[#allocation2 + $0x31] sm:$0x1] %v2535_v49 }
 0x20d   :  { %2562 = vsyncadd [#allocation3], 16  ;;  %s6247_s8 = sld [smem:[#allocation5 + $0x32]] }
 0x213   :  { %s2564_s19 = scalar_lea.vmem %s8485_s6, %s6247_s8 }
 0x214   :  { %v2584_v50 = vld [vmem:[%s2564_s19] sm:$0x1] }
 0x215   :  { %2585 = vst [vmem:[#allocation2 + $0x32] sm:$0x1] %v2584_v50 }
 0x216   :  { %2611 = vsyncadd [#allocation3], 16  ;;  %s6248_s20 = sld [smem:[#allocation5 + $0x33]] }
 0x21c   :  { %s2613_s7 = scalar_lea.vmem %s8485_s6, %s6248_s20 }
 0x21d   :  { %v2633_v51 = vld [vmem:[%s2613_s7] sm:$0x1] }
 0x21e   :  { %2634 = vst [vmem:[#allocation2 + $0x33] sm:$0x1] %v2633_v51 }
 0x21f   :  { %2660 = vsyncadd [#allocation3], 16  ;;  %s6249_s22 = sld [smem:[#allocation5 + $0x34]] }
 0x225   :  { %s2662_s25 = scalar_lea.vmem %s8485_s6, %s6249_s22 }
 0x226   :  { %v2682_v52 = vld [vmem:[%s2662_s25] sm:$0x1] }
 0x227   :  { %2683 = vst [vmem:[#allocation2 + $0x34] sm:$0x1] %v2682_v52 }
 0x228   :  { %2709 = vsyncadd [#allocation3], 16  ;;  %s6250_s26 = sld [smem:[#allocation5 + $0x35]] }
 0x22e   :  { %s2711_s11 = scalar_lea.vmem %s8485_s6, %s6250_s26 }
 0x22f   :  { %v2731_v53 = vld [vmem:[%s2711_s11] sm:$0x1] }
 0x230   :  { %2732 = vst [vmem:[#allocation2 + $0x35] sm:$0x1] %v2731_v53 }
 0x231   :  { %2758 = vsyncadd [#allocation3], 16  ;;  %s6251_s15 = sld [smem:[#allocation5 + $0x36]] }
 0x237   :  { %s2760_s29 = scalar_lea.vmem %s8485_s6, %s6251_s15 }
 0x238   :  { %v2780_v54 = vld [vmem:[%s2760_s29] sm:$0x1] }
 0x239   :  { %2781 = vst [vmem:[#allocation2 + $0x36] sm:$0x1] %v2780_v54 }
 0x23a   :  { %2807 = vsyncadd [#allocation3], 16  ;;  %s6252_s30 = sld [smem:[#allocation5 + $0x37]] }
 0x240   :  { %s2809_s8 = scalar_lea.vmem %s8485_s6, %s6252_s30 }
 0x241   :  { %v2829_v55 = vld [vmem:[%s2809_s8] sm:$0x1] }
 0x242   :  { %2830 = vst [vmem:[#allocation2 + $0x37] sm:$0x1] %v2829_v55 }
 0x243   :  { %2856 = vsyncadd [#allocation3], 16  ;;  %s6253_s17 = sld [smem:[#allocation5 + $0x38]] }
 0x249   :  { %s2858_s20 = scalar_lea.vmem %s8485_s6, %s6253_s17 }
 0x24a   :  { %v2878_v56 = vld [vmem:[%s2858_s20] sm:$0x1] }
 0x24b   :  { %2879 = vst [vmem:[#allocation2 + $0x38] sm:$0x1] %v2878_v56 }
 0x24c   :  { %2905 = vsyncadd [#allocation3], 16  ;;  %s6254_s2 = sld [smem:[#allocation5 + $0x39]] }
 0x252   :  { %s2907_s22 = scalar_lea.vmem %s8485_s6, %s6254_s2 }
 0x253   :  { %v2927_v57 = vld [vmem:[%s2907_s22] sm:$0x1] }
 0x254   :  { %2928 = vst [vmem:[#allocation2 + $0x39] sm:$0x1] %v2927_v57 }
 0x255   :  { %2954 = vsyncadd [#allocation3], 16  ;;  %s6255_s23 = sld [smem:[#allocation5 + $0x3a]] }
 0x25b   :  { %s2956_s26 = scalar_lea.vmem %s8485_s6, %s6255_s23 }
 0x25c   :  { %v2976_v58 = vld [vmem:[%s2956_s26] sm:$0x1] }
 0x25d   :  { %2977 = vst [vmem:[#allocation2 + $0x3a] sm:$0x1] %v2976_v58 }
 0x25e   :  { %3003 = vsyncadd [#allocation3], 16  ;;  %s6256_s27 = sld [smem:[#allocation5 + $0x3b]] }
 0x264   :  { %s3005_s15 = scalar_lea.vmem %s8485_s6, %s6256_s27 }
 0x265   :  { %v3025_v59 = vld [vmem:[%s3005_s15] sm:$0x1] }
 0x266   :  { %3026 = vst [vmem:[#allocation2 + $0x3b] sm:$0x1] %v3025_v59 }
 0x267   :  { %3052 = vsyncadd [#allocation3], 16  ;;  %s6257_s16 = sld [smem:[#allocation5 + $0x3c]] }
 0x26d   :  { %s3054_s30 = scalar_lea.vmem %s8485_s6, %s6257_s16 }
 0x26e   :  { %v3074_v60 = vld [vmem:[%s3054_s30] sm:$0x1] }
 0x26f   :  { %3075 = vst [vmem:[#allocation2 + $0x3c] sm:$0x1] %v3074_v60 }
 0x270   :  { %3101 = vsyncadd [#allocation3], 16  ;;  %s6258_s14 = sld [smem:[#allocation5 + $0x3d]] }
 0x276   :  { %s3103_s17 = scalar_lea.vmem %s8485_s6, %s6258_s14 }
 0x277   :  { %v3123_v61 = vld [vmem:[%s3103_s17] sm:$0x1] }
 0x278   :  { %3124 = vst [vmem:[#allocation2 + $0x3d] sm:$0x1] %v3123_v61 }
 0x279   :  { %3150 = vsyncadd [#allocation3], 16  ;;  %s6259_s18 = sld [smem:[#allocation5 + $0x3e]] }
 0x27f   :  { %s3152_s2 = scalar_lea.vmem %s8485_s6, %s6259_s18 }
 0x280   :  { %v3172_v62 = vld [vmem:[%s3152_s2] sm:$0x1] }
 0x281   :  { %3173 = vst [vmem:[#allocation2 + $0x3e] sm:$0x1] %v3172_v62 }
 0x282   :  { %3199 = vsyncadd [#allocation3], 16  ;;  %s6260_s21 = sld [smem:[#allocation5 + $0x3f]] }
 0x288   :  { %s3201_s23 = scalar_lea.vmem %s8485_s6, %s6260_s21 }
 0x289   :  { %v3221_v63 = vld [vmem:[%s3201_s23] sm:$0x1] }
 0x28a   :  { %3222 = vst [vmem:[#allocation2 + $0x3f] sm:$0x1] %v3221_v63 }
 0x28b   :  { %3248 = vsyncadd [#allocation3], 16  ;;  %v3265_v0 = vld [vmem:[#allocation6 + $0x78] sm:$0xff]  ;;  %v8493_v1 = vmov 0.0   ;;  %v3264_v2 = vld [vmem:[#allocation6 + $0x70] sm:$0xff]  ;;  %vm7210_vm0 = vmmov 0  }
 0x28c   :  { %6499 = vmatprep.subr.mxu1 %v8493_v1  ;;  %6531 = vmatprep.mubr.msk.f32.mxu1 %vm7210_vm0, %v8493_v1  ;;  %v3263_v3 = vld [vmem:[#allocation6 + $0x68] sm:$0xff]  ;;  %v3262_v4 = vld [vmem:[#allocation6 + $0x60] sm:$0xff]  ;;  %v3261_v5 = vld [vmem:[#allocation6 + $0x58] sm:$0xff] }
 0x28d   :  { %6500 = vmatpush3.msra.mxu1 %v3265_v0  ;;  %v3260_v6 = vld [vmem:[#allocation6 + $0x50] sm:$0xff]  ;;  %v3259_v7 = vld [vmem:[#allocation6 + $0x48] sm:$0xff]  ;;  %v3258_v8 = vld [vmem:[#allocation6 + $0x40] sm:$0xff] }
 0x28e   :  { %6501 = vmatprep.subr.mxu1 %v8493_v1  ;;  %v3257_v9 = vld [vmem:[#allocation6 + $0x38] sm:$0xff]  ;;  %v3256_v10 = vld [vmem:[#allocation6 + $0x30] sm:$0xff]  ;;  %v3255_v11 = vld [vmem:[#allocation6 + $0x28] sm:$0xff] }
 0x28f   :  { %6502 = vmatpush3.msra.mxu1 %v3264_v2  ;;  %v3254_v12 = vld [vmem:[#allocation6 + $0x20] sm:$0xff]  ;;  %v3253_v13 = vld [vmem:[#allocation6 + $0x18] sm:$0xff]  ;;  %v3252_v14 = vld [vmem:[#allocation6 + $0x10] sm:$0xff] }
 0x290   :  { %6503 = vmatprep.subr.mxu1 %v8493_v1  ;;  %v3251_v15 = vld [vmem:[#allocation6 + $0x8] sm:$0xff]  ;;  %v3250_v16 = vld [vmem:[#allocation6] sm:$0xff]  ;;  %v3359_v18 = vld [vmem:[#allocation8 + $0x78] sm:$0xff] }
 0x291   :  { %6504 = vmatpush3.msra.mxu1 %v3263_v3  ;;  %v3249_v17 = vld [vmem:[%s8480_s1] sm:$0xff]  ;;  %v3358_v19 = vld [vmem:[#allocation8 + $0x70] sm:$0xff]  ;;  %v3357_v20 = vld [vmem:[#allocation8 + $0x68] sm:$0xff] }
 0x292   :  { %6505 = vmatprep.subr.mxu1 %v8493_v1  ;;  %v3356_v21 = vld [vmem:[#allocation8 + $0x60] sm:$0xff]  ;;  %v3355_v22 = vld [vmem:[#allocation8 + $0x58] sm:$0xff]  ;;  %v3354_v23 = vld [vmem:[#allocation8 + $0x50] sm:$0xff] }
 0x293   :  { %6506 = vmatpush3.msra.mxu1 %v3262_v4  ;;  %v3353_v24 = vld [vmem:[#allocation8 + $0x48] sm:$0xff]  ;;  %v3352_v25 = vld [vmem:[#allocation8 + $0x40] sm:$0xff]  ;;  %v3351_v26 = vld [vmem:[#allocation8 + $0x38] sm:$0xff] }
 0x294   :  { %6507 = vmatprep.subr.mxu1 %v8493_v1  ;;  %v3350_v27 = vld [vmem:[#allocation8 + $0x30] sm:$0xff]  ;;  %v3349_v28 = vld [vmem:[#allocation8 + $0x28] sm:$0xff]  ;;  %v3348_v29 = vld [vmem:[#allocation8 + $0x20] sm:$0xff] }
 0x295   :  { %6508 = vmatpush3.msra.mxu1 %v3261_v5  ;;  %v3347_v30 = vld [vmem:[#allocation8 + $0x18] sm:$0xff]  ;;  %v3346_v31 = vld [vmem:[#allocation8 + $0x10] sm:$0xff]  ;;  %v3345_v32 = vld [vmem:[#allocation8 + $0x8] sm:$0xff] }
 0x296   :  { %6509 = vmatprep.subr.mxu1 %v8493_v1  ;;  %v3344_v33 = vld [vmem:[#allocation8] sm:$0xff] }
 0x297   :  { %6510 = vmatpush3.msra.mxu1 %v3260_v6  ;;  %v6261_v34 = vld [vmem:[%s8482_s3] ss:$0 sm:$0xff] }
 0x298   :  { %6511 = vmatprep.subr.mxu1 %v8493_v1  ;;  %v6262_v39 = vld [vmem:[%s8484_s5] ss:$0 sm:$0xff] }
 0x299   :  { %6512 = vmatpush3.msra.mxu1 %v3259_v7 }
 0x29a   :  { %6513 = vmatprep.subr.mxu1 %v8493_v1 }
 0x29b   :  { %6514 = vmatpush3.msra.mxu1 %v3258_v8 }
 0x29c   :  { %6515 = vmatprep.subr.mxu1 %v8493_v1 }
 0x29d   :  { %6516 = vmatpush3.msra.mxu1 %v3257_v9 }
 0x29e   :  { %6517 = vmatprep.subr.mxu1 %v8493_v1 }
 0x29f   :  { %6518 = vmatpush3.msra.mxu1 %v3256_v10 }
 0x2a0   :  { %6519 = vmatprep.subr.mxu1 %v8493_v1 }
 0x2a1   :  { %6520 = vmatpush3.msra.mxu1 %v3255_v11 }
 0x2a2   :  { %6521 = vmatprep.subr.mxu1 %v8493_v1 }
 0x2a3   :  { %6522 = vmatpush3.msra.mxu1 %v3254_v12 }
 0x2a4   :  { %6523 = vmatprep.subr.mxu1 %v8493_v1 }
 0x2a5   :  { %6524 = vmatpush3.msra.mxu1 %v3253_v13 }
 0x2a6   :  { %6525 = vmatprep.subr.mxu1 %v8493_v1 }
 0x2a7   :  { %6526 = vmatpush3.msra.mxu1 %v3252_v14 }
 0x2a8   :  { %6527 = vmatprep.subr.mxu1 %v8493_v1 }
 0x2a9   :  { %6528 = vmatpush3.msra.mxu1 %v3251_v15 }
 0x2aa   :  { %6529 = vmatprep.subr.mxu1 %v8493_v1 }
 0x2ab   :  { %6530 = vmatpush3.msra.mxu1 %v3250_v16 }
 0x2ac   :  { %6532 = vmatmul.mubr.f32.vlgmr.msra.gmra.mxu1 %v3249_v17  ;;  %6534 = vmatprep.subr.mxu1 %v8493_v1 }
 0x2ad   :  { %6535 = vmatpush3.msra.mxu1 %v3359_v18  ;;  %6566 = vmatprep.mubr.msk.f32.mxu1 %vm7210_vm0, %v8493_v1 }
 0x2ae   :  { %6536 = vmatprep.subr.mxu1 %v8493_v1 }
 0x2af   :  { %6537 = vmatpush3.msra.mxu1 %v3358_v19 }
 0x2b0   :  { %6538 = vmatprep.subr.mxu1 %v8493_v1 }
 0x2b1   :  { %6539 = vmatpush3.msra.mxu1 %v3357_v20 }
 0x2b2   :  { %6540 = vmatprep.subr.mxu1 %v8493_v1 }
 0x2b3   :  { %6541 = vmatpush3.msra.mxu1 %v3356_v21 }
 0x2b4   :  { %6542 = vmatprep.subr.mxu1 %v8493_v1 }
 0x2b5   :  { %6543 = vmatpush3.msra.mxu1 %v3355_v22 }
 0x2b6   :  { %6544 = vmatprep.subr.mxu1 %v8493_v1 }
 0x2b7   :  { %6545 = vmatpush3.msra.mxu1 %v3354_v23 }
 0x2b8   :  { %6546 = vmatprep.subr.mxu1 %v8493_v1 }
 0x2b9   :  { %6547 = vmatpush3.msra.mxu1 %v3353_v24 }
 0x2ba   :  { %6548 = vmatprep.subr.mxu1 %v8493_v1 }
 0x2bb   :  { %6549 = vmatpush3.msra.mxu1 %v3352_v25 }
 0x2bc   :  { %6550 = vmatprep.subr.mxu1 %v8493_v1 }
 0x2bd   :  { %6551 = vmatpush3.msra.mxu1 %v3351_v26 }
 0x2be   :  { %6552 = vmatprep.subr.mxu1 %v8493_v1 }
 0x2bf   :  { %6553 = vmatpush3.msra.mxu1 %v3350_v27 }
 0x2c0   :  { %6554 = vmatprep.subr.mxu1 %v8493_v1 }
 0x2c1   :  { %6555 = vmatpush3.msra.mxu1 %v3349_v28 }
 0x2c2   :  { %6556 = vmatprep.subr.mxu1 %v8493_v1 }
 0x2c3   :  { %6557 = vmatpush3.msra.mxu1 %v3348_v29 }
 0x2c4   :  { %6558 = vmatprep.subr.mxu1 %v8493_v1 }
 0x2c5   :  { %6559 = vmatpush3.msra.mxu1 %v3347_v30 }
 0x2c6   :  { %6560 = vmatprep.subr.mxu1 %v8493_v1 }
 0x2c7   :  { %6561 = vmatpush3.msra.mxu1 %v3346_v31 }
 0x2c8   :  { %6562 = vmatprep.subr.mxu1 %v8493_v1 }
 0x2c9   :  { %6563 = vmatpush3.msra.mxu1 %v3345_v32 }
 0x2ca   :  { %6564 = vmatprep.subr.mxu1 %v8493_v1 }
 0x2cb   :  { %6565 = vmatpush3.msra.mxu1 %v3344_v33 }
 0x36c   :  { %v3339_v35 = vpop.f32.mrf.mxu1 }
 0x36d   :  { %v3340_v36 = vadd.f32 %v6261_v34, %v3339_v35 }
 0x36e   :  { %v6533_v37 = vpop.f32.mrf.mxu1 }
 0x36f   :  { %v3343_v38 = vmax.f32 %v3340_v36, 0.0 }
 0x371   :  { %6567 = vmatmul.mubr.f32.vlgmr.msra.gmra.mxu1 %v3343_v38 }
 0x431   :  { %v3433_v40 = vpop.f32.mrf.mxu1 }
 0x432   :  { %v7545_v41 = vadd.f32 %v6262_v39, %v3433_v40 }
 0x433   :  { %v6568_v42 = vpop.f32.mrf.mxu1 }
 0x434   :  { %7197 = dma.done.wait [#allocation3], 1024 }
 0x435   :  { %7198 = vsyncadd [#allocation3], 4294966272  ;;  %3767 = vmatprep.mubr.f32.mxu0 %v8493_v1  ;;  %v3684_v43 = vld [vmem:[#allocation10 + $0x170] sm:$0xff]  ;;  %v3683_v44 = vld [vmem:[#allocation10 + $0x168] sm:$0xff] }
 0x436   :  { %v3681_v45 = vld [vmem:[#allocation10 + $0x158] sm:$0xff]  ;;  %3703 = vmatprep.subr.mxu0 %v3684_v43  ;;  %v3680_v46 = vld [vmem:[#allocation10 + $0x150] sm:$0xff]  ;;  %v3678_v47 = vld [vmem:[#allocation10 + $0x140] sm:$0xff] }
 0x437   :  { %3704 = vmatpush1.msra.mxu0 %v3683_v44  ;;  %v3677_v48 = vld [vmem:[#allocation10 + $0x138] sm:$0xff]  ;;  %v3675_v49 = vld [vmem:[#allocation10 + $0x128] sm:$0xff]  ;;  %v3674_v50 = vld [vmem:[#allocation10 + $0x120] sm:$0xff] }
 0x438   :  { %3705 = vmatprep.subr.mxu0 %v3681_v45  ;;  %v3672_v51 = vld [vmem:[#allocation10 + $0x110] sm:$0xff]  ;;  %v3671_v52 = vld [vmem:[#allocation10 + $0x108] sm:$0xff]  ;;  %v3669_v53 = vld [vmem:[#allocation10 + $0xf8] sm:$0xff] }
 0x439   :  { %3706 = vmatpush1.msra.mxu0 %v3680_v46  ;;  %v3668_v54 = vld [vmem:[#allocation10 + $0xf0] sm:$0xff]  ;;  %v3666_v55 = vld [vmem:[#allocation10 + $0xe0] sm:$0xff]  ;;  %v3665_v57 = vld [vmem:[#allocation10 + $0xd8] sm:$0xff] }
 0x43a   :  { %3707 = vmatprep.subr.mxu0 %v3678_v47  ;;  %v7548_v56 = vld [vmem:[#allocation2] sm:$0xff]  ;;  %v3685_v58 = vld [vmem:[#allocation10 + $0x178] sm:$0xff]  ;;  %v3663_v59 = vld [vmem:[#allocation10 + $0xc8] sm:$0xff] }
 0x43b   :  { %3708 = vmatpush1.msra.mxu0 %v3677_v48  ;;  %6601 = vmatprep.mubr.f32.mxu1 %v7548_v56  ;;  %v3682_v60 = vld [vmem:[#allocation10 + $0x160] sm:$0xff]  ;;  %v3679_v62 = vld [vmem:[#allocation10 + $0x148] sm:$0xff]  ;;  %v3660_v63 = vld [vmem:[#allocation10 + $0xb0] sm:$0xff] }
 0x43c   :  { %3709 = vmatprep.subr.mxu0 %v3675_v49  ;;  %6569 = vmatprep.subr.mxu1 %v3685_v58  ;;  %v3662_v61 = vld [vmem:[#allocation10 + $0xc0] sm:$0xff]  ;;  %v3659_v0 = vld [vmem:[#allocation10 + $0xa8] sm:$0xff]  ;;  %v3676_v2 = vld [vmem:[#allocation10 + $0x130] sm:$0xff] }
 0x43d   :  { %3710 = vmatpush1.msra.mxu0 %v3674_v50  ;;  %6570 = vmatpush3.msra.mxu1 %v3685_v58  ;;  %v3657_v3 = vld [vmem:[#allocation10 + $0x98] sm:$0xff]  ;;  %v3656_v4 = vld [vmem:[#allocation10 + $0x90] sm:$0xff]  ;;  %v3654_v6 = vld [vmem:[#allocation10 + $0x80] sm:$0xff] }
 0x43e   :  { %3711 = vmatprep.subr.mxu0 %v3672_v51  ;;  %6571 = vmatprep.subr.mxu1 %v3682_v60  ;;  %v3673_v5 = vld [vmem:[#allocation10 + $0x118] sm:$0xff]  ;;  %v3670_v8 = vld [vmem:[#allocation10 + $0x100] sm:$0xff]  ;;  %v3651_v9 = vld [vmem:[#allocation10 + $0x68] sm:$0xff] }
 0x43f   :  { %3712 = vmatpush1.msra.mxu0 %v3671_v52  ;;  %6572 = vmatpush3.msra.mxu1 %v3682_v60  ;;  %v3653_v7 = vld [vmem:[#allocation10 + $0x78] sm:$0xff]  ;;  %v3650_v10 = vld [vmem:[#allocation10 + $0x60] sm:$0xff]  ;;  %v3667_v11 = vld [vmem:[#allocation10 + $0xe8] sm:$0xff] }
 0x440   :  { %3713 = vmatprep.subr.mxu0 %v3669_v53  ;;  %6573 = vmatprep.subr.mxu1 %v3679_v62  ;;  %v3648_v12 = vld [vmem:[#allocation10 + $0x50] sm:$0xff]  ;;  %v3647_v13 = vld [vmem:[#allocation10 + $0x48] sm:$0xff]  ;;  %v3645_v15 = vld [vmem:[#allocation10 + $0x38] sm:$0xff] }
 0x441   :  { %3714 = vmatpush1.msra.mxu0 %v3668_v54  ;;  %6574 = vmatpush3.msra.mxu1 %v3679_v62  ;;  %v3664_v14 = vld [vmem:[#allocation10 + $0xd0] sm:$0xff]  ;;  %v3661_v17 = vld [vmem:[#allocation10 + $0xb8] sm:$0xff]  ;;  %v3642_v18 = vld [vmem:[#allocation10 + $0x20] sm:$0xff] }
 0x442   :  { %3715 = vmatprep.subr.mxu0 %v3666_v55  ;;  %6575 = vmatprep.subr.mxu1 %v3676_v2  ;;  %v3644_v16 = vld [vmem:[#allocation10 + $0x30] sm:$0xff]  ;;  %v3641_v19 = vld [vmem:[#allocation10 + $0x18] sm:$0xff]  ;;  %v3658_v20 = vld [vmem:[#allocation10 + $0xa0] sm:$0xff] }
 0x443   :  { %3716 = vmatpush1.msra.mxu0 %v3665_v57  ;;  %6576 = vmatpush3.msra.mxu1 %v3676_v2  ;;  %v3639_v21 = vld [vmem:[#allocation10 + $0x8] sm:$0xff]  ;;  %v3638_v22 = vld [vmem:[#allocation10] sm:$0xff]  ;;  %v7551_v24 = vld [vmem:[#allocation11 + $0x170] sm:$0xff] }
 0x444   :  { %3717 = vmatprep.subr.mxu0 %v3663_v59  ;;  %6577 = vmatprep.subr.mxu1 %v3673_v5  ;;  %v3655_v23 = vld [vmem:[#allocation10 + $0x88] sm:$0xff]  ;;  %8527 = vst [vmem:[#allocation83_spill] sm:$0xff] %v7551_v24  ;;  %v7555_v26 = vld [vmem:[#allocation11 + $0x158] sm:$0xff]  ;;  %v7559_v27 = vld [vmem:[#allocation11 + $0x150] sm:$0xff] }
 0x445   :  { %3718 = vmatpush1.msra.mxu0 %v3662_v61  ;;  %6578 = vmatpush3.msra.mxu1 %v3673_v5  ;;  %v7553_v25 = vld [vmem:[#allocation11 + $0x168] sm:$0xff]  ;;  %v3652_v28 = vld [vmem:[#allocation10 + $0x70] sm:$0xff]  ;;  %v7565_v30 = vld [vmem:[#allocation11 + $0x140] sm:$0xff] }
 0x446   :  { %3719 = vmatprep.subr.mxu0 %v3660_v63  ;;  %6579 = vmatprep.subr.mxu1 %v3670_v8  ;;  %v7563_v29 = vld [vmem:[#allocation2 + $0x8] sm:$0xff]  ;;  %v7568_v31 = vld [vmem:[#allocation11 + $0x138] sm:$0xff]  ;;  %v7575_v33 = vld [vmem:[#allocation11 + $0x120] sm:$0xff] }
 0x447   :  { %3720 = vmatpush1.msra.mxu0 %v3659_v0  ;;  %6580 = vmatpush3.msra.mxu1 %v3670_v8  ;;  %v7571_v32 = vld [vmem:[#allocation11 + $0x128] sm:$0xff]  ;;  %v3649_v34 = vld [vmem:[#allocation10 + $0x58] sm:$0xff]  ;;  %v7579_v35 = vld [vmem:[#allocation2 + $0x10] sm:$0xff] }
 0x448   :  { %3721 = vmatprep.subr.mxu0 %v3657_v3  ;;  %6581 = vmatprep.subr.mxu1 %v3667_v11  ;;  %v7581_v36 = vld [vmem:[#allocation11 + $0x110] sm:$0xff]  ;;  %v7584_v37 = vld [vmem:[#allocation11 + $0x108] sm:$0xff]  ;;  %v7587_v38 = vld [vmem:[#allocation11 + $0xf8] sm:$0xff] }
 0x449   :  { %3722 = vmatpush1.msra.mxu0 %v3656_v4  ;;  %6582 = vmatpush3.msra.mxu1 %v3667_v11  ;;  %v7591_v39 = vld [vmem:[#allocation11 + $0xf0] sm:$0xff]  ;;  %v3646_v40 = vld [vmem:[#allocation10 + $0x40] sm:$0xff]  ;;  %v7595_v42 = vld [vmem:[#allocation2 + $0x18] sm:$0xff] }
 0x44a   :  { %3723 = vmatprep.subr.mxu0 %v3654_v6  ;;  %6583 = vmatprep.subr.mxu1 %v3664_v14  ;;  %v7597_v43 = vld [vmem:[#allocation11 + $0xe0] sm:$0xff]  ;;  %v7600_v44 = vld [vmem:[#allocation11 + $0xd8] sm:$0xff]  ;;  %v7603_v45 = vld [vmem:[#allocation11 + $0xc8] sm:$0xff] }
 0x44b   :  { %3724 = vmatpush1.msra.mxu0 %v3653_v7  ;;  %6584 = vmatpush3.msra.mxu1 %v3664_v14  ;;  %v7607_v46 = vld [vmem:[#allocation11 + $0xc0] sm:$0xff]  ;;  %v3643_v47 = vld [vmem:[#allocation10 + $0x28] sm:$0xff]  ;;  %v7613_v49 = vld [vmem:[#allocation11 + $0xb0] sm:$0xff] }
 0x44c   :  { %3725 = vmatprep.subr.mxu0 %v3651_v9  ;;  %6585 = vmatprep.subr.mxu1 %v3661_v17  ;;  %v7611_v48 = vld [vmem:[#allocation2 + $0x20] sm:$0xff]  ;;  %v7616_v50 = vld [vmem:[#allocation11 + $0xa8] sm:$0xff]  ;;  %v7619_v51 = vld [vmem:[#allocation11 + $0x98] sm:$0xff] }
 0x44d   :  { %3726 = vmatpush1.msra.mxu0 %v3650_v10  ;;  %6586 = vmatpush3.msra.mxu1 %v3661_v17  ;;  %v7623_v52 = vld [vmem:[#allocation11 + $0x90] sm:$0xff]  ;;  %v3635_v54 = vld [vmem:[#allocation2 + $0x28] sm:$0xff]  ;;  %v7627_v55 = vld [vmem:[#allocation11 + $0x80] sm:$0xff] }
 0x44e   :  { %3727 = vmatprep.subr.mxu0 %v3648_v12  ;;  %6587 = vmatprep.subr.mxu1 %v3658_v20  ;;  %v3640_v53 = vld [vmem:[#allocation10 + $0x10] sm:$0xff]  ;;  %v7633_v57 = vld [vmem:[#allocation11 + $0x68] sm:$0xff]  ;;  %v7636_v58 = vld [vmem:[#allocation11 + $0x60] sm:$0xff] }
 0x44f   :  { %3728 = vmatpush1.msra.mxu0 %v3647_v13  ;;  %6588 = vmatpush3.msra.mxu1 %v3658_v20  ;;  %v3636_v59 = vld [vmem:[#allocation2 + $0x30] sm:$0xff]  ;;  %v7643_v61 = vld [vmem:[#allocation11 + $0x48] sm:$0xff]  ;;  %v7646_v62 = vld [vmem:[#allocation11 + $0x38] sm:$0xff] }
 0x450   :  { %3729 = vmatprep.subr.mxu0 %v3645_v15  ;;  %6589 = vmatprep.subr.mxu1 %v3655_v23  ;;  %v7640_v60 = vld [vmem:[#allocation11 + $0x50] sm:$0xff]  ;;  %8528 = vst [vmem:[#allocation84_spill] sm:$0xff] %v7646_v62  ;;  %v7652_v0 = vld [vmem:[#allocation11 + $0x178] sm:$0xff]  ;;  %v7656_v3 = vld [vmem:[#allocation11 + $0x20] sm:$0xff] }
 0x451   :  { %3730 = vmatpush1.msra.mxu0 %v3644_v16  ;;  %6590 = vmatpush3.msra.mxu1 %v3655_v23  ;;  %v7650_v63 = vld [vmem:[#allocation11 + $0x30] sm:$0xff]  ;;  %v3637_v2 = vld [vmem:[#allocation2 + $0x38] sm:$0xff]  ;;  %8530 = vst [vmem:[#allocation86_spill] sm:$0xff] %v7656_v3  ;;  %v7663_v5 = vld [vmem:[#allocation11 + $0x8] sm:$0xff] }
 0x452   :  { %3731 = vmatprep.subr.mxu0 %v3642_v18  ;;  %6591 = vmatprep.subr.mxu1 %v3652_v28  ;;  %8529 = vst [vmem:[#allocation85_spill] sm:$0xff] %v7650_v63  ;;  %v7659_v4 = vld [vmem:[#allocation11 + $0x18] sm:$0xff]  ;;  %8532 = vst [vmem:[#allocation88_spill] sm:$0xff] %v7663_v5  ;;  %v7667_v6 = vld [vmem:[#allocation11] sm:$0xff] }
 0x453   :  { %3732 = vmatpush1.msra.mxu0 %v3641_v19  ;;  %6592 = vmatpush3.msra.mxu1 %v3652_v28  ;;  %8531 = vst [vmem:[#allocation87_spill] sm:$0xff] %v7659_v4  ;;  %8533 = vst [vmem:[#allocation89_spill] sm:$0xff] %v7667_v6  ;;  %v7669_v7 = vld [vmem:[#allocation11 + $0x160] sm:$0xff]  ;;  %v7675_v8 = vld [vmem:[#allocation11 + $0x148] sm:$0xff] }
 0x454   :  { %3733 = vmatprep.subr.mxu0 %v3639_v21  ;;  %6593 = vmatprep.subr.mxu1 %v3649_v34  ;;  %v7681_v9 = vld [vmem:[#allocation11 + $0x130] sm:$0xff]  ;;  %v7686_v10 = vld [vmem:[#allocation11 + $0x118] sm:$0xff]  ;;  %v7692_v11 = vld [vmem:[#allocation11 + $0x100] sm:$0xff] }
 0x455   :  { %3734 = vmatpush1.msra.mxu0 %v3638_v22  ;;  %6594 = vmatpush3.msra.mxu1 %v3649_v34  ;;  %v7698_v12 = vld [vmem:[#allocation11 + $0xe8] sm:$0xff]  ;;  %v7702_v13 = vld [vmem:[#allocation11 + $0xd0] sm:$0xff]  ;;  %v7708_v14 = vld [vmem:[#allocation11 + $0xb8] sm:$0xff]  ;;  %v3688_v22 = vlaneseq }
 0x456   :  { %3768 = vmatmul.mubr.f32.vlgmr.msra.gmra.mxu0 %v7548_v56  ;;  %3986 = vmatprep.subr.mxu0 %v7551_v24  ;;  %v7630_v56 = vld [vmem:[#allocation11 + $0x78] sm:$0xff]  ;;  %v7714_v15 = vld [vmem:[#allocation11 + $0xa0] sm:$0xff]  ;;  %v7720_v16 = vld [vmem:[#allocation11 + $0x88] sm:$0xff] }
 0x457   :  { %3987 = vmatpush1.msra.mxu0 %v7553_v25  ;;  %3773 = vmatprep.mubr.f32.mxu0 %v8493_v1  ;;  %v7726_v17 = vld [vmem:[#allocation11 + $0x70] sm:$0xff]  ;;  %v7732_v18 = vld [vmem:[#allocation11 + $0x58] sm:$0xff]  ;;  %v7738_v19 = vld [vmem:[#allocation11 + $0x40] sm:$0xff]  ;;  %v7809_v23 = vshrl.u32 %v3688_v22, 7 }
 0x458   :  { %3988 = vmatprep.subr.mxu0 %v7555_v26  ;;  %6595 = vmatprep.subr.mxu1 %v3646_v40  ;;  %8534 = vst [vmem:[#allocation90_spill] sm:$0xff] %v7738_v19  ;;  %v7744_v20 = vld [vmem:[#allocation11 + $0x28] sm:$0xff]  ;;  %v7750_v21 = vld [vmem:[#allocation11 + $0x10] sm:$0xff] }
 0x459   :  { %3989 = vmatpush1.msra.mxu0 %v7559_v27  ;;  %6596 = vmatpush3.msra.mxu1 %v3646_v40  ;;  %8535 = vst [vmem:[#allocation91_spill] sm:$0xff] %v7744_v20  ;;  %8536 = vst [vmem:[#allocation92_spill] sm:$0xff] %v7750_v21  ;;  %v3690_v28 = vsub.s32 0, %v7809_v23 }
 0x45a   :  { %3774 = vmatmul.mubr.f32.gmra.mxu0 %v7563_v29  ;;  %3990 = vmatprep.subr.mxu0 %v7565_v30 }
 0x45b   :  { %3991 = vmatpush1.msra.mxu0 %v7568_v31  ;;  %3779 = vmatprep.mubr.f32.mxu0 %v8493_v1 }
 0x45c   :  { %3992 = vmatprep.subr.mxu0 %v7571_v32  ;;  %6597 = vmatprep.subr.mxu1 %v3643_v47 }
 0x45d   :  { %3993 = vmatpush1.msra.mxu0 %v7575_v33  ;;  %6598 = vmatpush3.msra.mxu1 %v3643_v47 }
 0x45e   :  { %3780 = vmatmul.mubr.f32.gmra.mxu0 %v7579_v35  ;;  %3994 = vmatprep.subr.mxu0 %v7581_v36 }
 0x45f   :  { %3995 = vmatpush1.msra.mxu0 %v7584_v37  ;;  %3785 = vmatprep.mubr.f32.mxu0 %v8493_v1 }
 0x460   :  { %3996 = vmatprep.subr.mxu0 %v7587_v38  ;;  %6599 = vmatprep.subr.mxu1 %v3640_v53 }
 0x461   :  { %3997 = vmatpush1.msra.mxu0 %v7591_v39  ;;  %6600 = vmatpush3.msra.mxu1 %v3640_v53 }
 0x462   :  { %3786 = vmatmul.mubr.f32.gmra.mxu0 %v7595_v42  ;;  %3998 = vmatprep.subr.mxu0 %v7597_v43 }
 0x463   :  { %3999 = vmatpush1.msra.mxu0 %v7600_v44  ;;  %3791 = vmatprep.mubr.f32.mxu0 %v8493_v1 }
 0x464   :  { %4000 = vmatprep.subr.mxu0 %v7603_v45  ;;  %6613 = vmatprep.subr.mxu1 %v8493_v1 }
 0x465   :  { %4001 = vmatpush1.msra.mxu0 %v7607_v46  ;;  %6602 = vmatmul.mubr.f32.vlgmr.msra.gmra.mxu1 %v7563_v29  ;;  %v3686_v29 = vld [vmem:[%s8488_s9] sm:$0x7] }
 0x466   :  { %3792 = vmatmul.mubr.f32.gmra.mxu0 %v7611_v48  ;;  %4002 = vmatprep.subr.mxu0 %v7613_v49 }
 0x467   :  { %4003 = vmatpush1.msra.mxu0 %v7616_v50  ;;  %3797 = vmatprep.mubr.f32.mxu0 %v8493_v1 }
 0x468   :  { %4004 = vmatprep.subr.mxu0 %v7619_v51  ;;  %6614 = vmatpush3.msra.mxu1 %v7652_v0 }
 0x469   :  { %4005 = vmatpush1.msra.mxu0 %v7623_v52  ;;  %6615 = vmatprep.subr.mxu1 %v8493_v1 }
 0x46a   :  { %3798 = vmatmul.mubr.f32.gmra.mxu0 %v3635_v54  ;;  %4006 = vmatprep.subr.mxu0 %v7627_v55 }
 0x46b   :  { %4007 = vmatpush1.msra.mxu0 %v7630_v56  ;;  %3803 = vmatprep.mubr.f32.mxu0 %v8493_v1 }
 0x46c   :  { %4008 = vmatprep.subr.mxu0 %v7633_v57  ;;  %6616 = vmatpush3.msra.mxu1 %v7669_v7 }
 0x46d   :  { %4009 = vmatpush1.msra.mxu0 %v7636_v58  ;;  %6617 = vmatprep.subr.mxu1 %v8493_v1 }
 0x46e   :  { %3804 = vmatmul.mubr.f32.gmra.mxu0 %v3636_v59  ;;  %4010 = vmatprep.subr.mxu0 %v7640_v60 }
 0x46f   :  { %4011 = vmatpush1.msra.mxu0 %v7643_v61  ;;  %3809 = vmatprep.mubr.f32.mxu0 %v8493_v1 }
 0x470   :  { %4012 = vmatprep.subr.mxu0 %v7646_v62  ;;  %6618 = vmatpush3.msra.mxu1 %v7675_v8 }
 0x471   :  { %4013 = vmatpush1.msra.mxu0 %v7650_v63  ;;  %6604 = vmatprep.mubr.f32.mxu1 %v7579_v35  ;;  %v3694_v35 = vsub.s32 1, %v7809_v23 }
 0x472   :  { %3810 = vmatmul.mubr.f32.gmra.mxu0 %v3637_v2  ;;  %4014 = vmatprep.subr.mxu0 %v7656_v3 }
 0x473   :  { %4015 = vmatpush1.msra.mxu0 %v7659_v4  ;;  %4050 = vmatprep.mubr.f32.mxu0 %v8493_v1 }
 0x474   :  { %4016 = vmatprep.subr.mxu0 %v7663_v5  ;;  %6619 = vmatprep.subr.mxu1 %v8493_v1 }
 0x475   :  { %4017 = vmatpush1.msra.mxu0 %v7667_v6  ;;  %6605 = vmatmul.mubr.f32.gmra.mxu1 %v7595_v42  ;;  %v3691_v42 = vrot.slane %v3686_v29, %v3690_v28 }
 0x476   :  { %4051 = vmatmul.mubr.f32.vlgmr.msra.gmra.mxu0 %v7545_v41  ;;  %6620 = vmatpush3.msra.mxu1 %v7681_v9 }
 0x477   :  { %6607 = vmatprep.mubr.f32.mxu1 %v7611_v48  ;;  %6621 = vmatprep.subr.mxu1 %v8493_v1  ;;  %v3695_v48 = vrot.slane %v3686_v29, %v3694_v35 }
 0x478   :  { %4148 = vmatprep.subr.mxu0 %v7551_v24  ;;  %6622 = vmatpush3.msra.mxu1 %v7686_v10 }
 0x479   :  { %4149 = vmatpush1.msra.mxu0 %v7553_v25  ;;  %6623 = vmatprep.subr.mxu1 %v8493_v1 }
 0x47a   :  { %6608 = vmatmul.mubr.f32.gmra.mxu1 %v3635_v54  ;;  %4150 = vmatprep.subr.mxu0 %v7555_v26 }
 0x47b   :  { %6624 = vmatpush3.msra.mxu1 %v7692_v11  ;;  %6610 = vmatprep.mubr.f32.mxu1 %v3636_v59 }
 0x47c   :  { %6625 = vmatprep.subr.mxu1 %v8493_v1  ;;  %4151 = vmatpush1.msra.mxu0 %v7559_v27 }
 0x47d   :  { %6626 = vmatpush3.msra.mxu1 %v7698_v12  ;;  %4152 = vmatprep.subr.mxu0 %v7565_v30 }
 0x47e   :  { %6627 = vmatprep.subr.mxu1 %v8493_v1  ;;  %6611 = vmatmul.mubr.f32.gmra.mxu1 %v3637_v2 }
 0x47f   :  { %6628 = vmatpush3.msra.mxu1 %v7702_v13  ;;  %6645 = vmatprep.mubr.msk.f32.mxu1 %vm7210_vm0, %v8493_v1 }
 0x480   :  { %6629 = vmatprep.subr.mxu1 %v8493_v1  ;;  %4153 = vmatpush1.msra.mxu0 %v7568_v31 }
 0x481   :  { %6630 = vmatpush3.msra.mxu1 %v7708_v14  ;;  %4154 = vmatprep.subr.mxu0 %v7571_v32 }
 0x482   :  { %6631 = vmatprep.subr.mxu1 %v8493_v1  ;;  %4155 = vmatpush1.msra.mxu0 %v7575_v33 }
 0x483   :  { %6632 = vmatpush3.msra.mxu1 %v7714_v15  ;;  %4156 = vmatprep.subr.mxu0 %v7581_v36 }
 0x484   :  { %6633 = vmatprep.subr.mxu1 %v8493_v1  ;;  %4157 = vmatpush1.msra.mxu0 %v7584_v37 }
 0x485   :  { %6634 = vmatpush3.msra.mxu1 %v7720_v16  ;;  %4158 = vmatprep.subr.mxu0 %v7587_v38 }
 0x486   :  { %6635 = vmatprep.subr.mxu1 %v8493_v1  ;;  %4159 = vmatpush1.msra.mxu0 %v7591_v39 }
 0x487   :  { %6636 = vmatpush3.msra.mxu1 %v7726_v17  ;;  %4160 = vmatprep.subr.mxu0 %v7597_v43 }
 0x488   :  { %6637 = vmatprep.subr.mxu1 %v8493_v1  ;;  %4161 = vmatpush1.msra.mxu0 %v7600_v44 }
 0x489   :  { %6638 = vmatpush3.msra.mxu1 %v7732_v18  ;;  %4162 = vmatprep.subr.mxu0 %v7603_v45 }
 0x48a   :  { %6639 = vmatprep.subr.mxu1 %v8493_v1  ;;  %4163 = vmatpush1.msra.mxu0 %v7607_v46 }
 0x48b   :  { %6640 = vmatpush3.msra.mxu1 %v7738_v19  ;;  %4164 = vmatprep.subr.mxu0 %v7613_v49 }
 0x48c   :  { %6641 = vmatprep.subr.mxu1 %v8493_v1  ;;  %4165 = vmatpush1.msra.mxu0 %v7616_v50 }
 0x48d   :  { %6642 = vmatpush3.msra.mxu1 %v7744_v20  ;;  %4166 = vmatprep.subr.mxu0 %v7619_v51 }
 0x48e   :  { %6643 = vmatprep.subr.mxu1 %v8493_v1  ;;  %4167 = vmatpush1.msra.mxu0 %v7623_v52 }
 0x48f   :  { %6644 = vmatpush3.msra.mxu1 %v7750_v21  ;;  %4168 = vmatprep.subr.mxu0 %v7627_v55 }
 0x490   :  { %6646 = vmatmul.mubr.f32.vlgmr.msra.gmra.mxu1 %v7545_v41  ;;  %6648 = vmatprep.subr.mxu1 %v8493_v1 }
 0x491   :  { %6649 = vmatpush3.msra.mxu1 %v7652_v0  ;;  %4169 = vmatpush1.msra.mxu0 %v7630_v56 }
 0x492   :  { %6650 = vmatprep.subr.mxu1 %v8493_v1  ;;  %4170 = vmatprep.subr.mxu0 %v7633_v57 }
 0x493   :  { %6651 = vmatpush3.msra.mxu1 %v7669_v7  ;;  %4171 = vmatpush1.msra.mxu0 %v7636_v58 }
 0x494   :  { %6652 = vmatprep.subr.mxu1 %v8493_v1  ;;  %4172 = vmatprep.subr.mxu0 %v7640_v60 }
 0x495   :  { %6653 = vmatpush3.msra.mxu1 %v7675_v8  ;;  %4173 = vmatpush1.msra.mxu0 %v7643_v61 }
 0x496   :  { %6654 = vmatprep.subr.mxu1 %v8493_v1  ;;  %4174 = vmatprep.subr.mxu0 %v7646_v62 }
 0x497   :  { %6655 = vmatpush3.msra.mxu1 %v7681_v9  ;;  %4175 = vmatpush1.msra.mxu0 %v7650_v63 }
 0x498   :  { %6656 = vmatprep.subr.mxu1 %v8493_v1  ;;  %4176 = vmatprep.subr.mxu0 %v7656_v3 }
 0x499   :  { %6657 = vmatpush3.msra.mxu1 %v7686_v10  ;;  %4177 = vmatpush1.msra.mxu0 %v7659_v4 }
 0x49a   :  { %6658 = vmatprep.subr.mxu1 %v8493_v1  ;;  %4178 = vmatprep.subr.mxu0 %v7663_v5 }
 0x49b   :  { %6659 = vmatpush3.msra.mxu1 %v7692_v11  ;;  %4179 = vmatpush1.msra.mxu0 %v7667_v6 }
 0x49c   :  { %6660 = vmatprep.subr.mxu1 %v8493_v1  ;;  %4212 = vmatprep.mubr.f32.mxu0 %v8493_v1 }
 0x49d   :  { %6661 = vmatpush3.msra.mxu1 %v7698_v12  ;;  %6680 = vmatprep.mubr.msk.f32.mxu1 %vm7210_vm0, %v8493_v1 }
 0x49e   :  { %6662 = vmatprep.subr.mxu1 %v8493_v1  ;;  %4310 = vmatprep.subr.mxu0 %v7551_v24 }
 0x49f   :  { %6663 = vmatpush3.msra.mxu1 %v7702_v13 }
 0x4a0   :  { %6664 = vmatprep.subr.mxu1 %v8493_v1 }
 0x4a1   :  { %6665 = vmatpush3.msra.mxu1 %v7708_v14 }
 0x4a2   :  { %6666 = vmatprep.subr.mxu1 %v8493_v1 }
 0x4a3   :  { %6667 = vmatpush3.msra.mxu1 %v7714_v15 }
 0x4a4   :  { %6668 = vmatprep.subr.mxu1 %v8493_v1 }
 0x4a5   :  { %6669 = vmatpush3.msra.mxu1 %v7720_v16 }
 0x4a6   :  { %6670 = vmatprep.subr.mxu1 %v8493_v1 }
 0x4a7   :  { %6671 = vmatpush3.msra.mxu1 %v7726_v17 }
 0x4a8   :  { %6672 = vmatprep.subr.mxu1 %v8493_v1 }
 0x4a9   :  { %6673 = vmatpush3.msra.mxu1 %v7732_v18 }
 0x4aa   :  { %6674 = vmatprep.subr.mxu1 %v8493_v1 }
 0x4ab   :  { %6675 = vmatpush3.msra.mxu1 %v7738_v19 }
 0x4ac   :  { %6676 = vmatprep.subr.mxu1 %v8493_v1 }
 0x4ad   :  { %6677 = vmatpush3.msra.mxu1 %v7744_v20 }
 0x4ae   :  { %6678 = vmatprep.subr.mxu1 %v8493_v1 }
 0x4af   :  { %6679 = vmatpush3.msra.mxu1 %v7750_v21 }
 0x4b0   :  { %6683 = vmatprep.subr.mxu1 %v8493_v1 }
 0x516   :  { %v3769_v34 = vpop.f32.mrf.mxu0 }
 0x518   :  { %v3771_v40 = vpop.f32.mrf.mxu0 }
 0x51a   :  { %v3775_v47 = vpop.f32.mrf.mxu0 }
 0x51b   :  { %v7816_v53 = vadd.f32 %v3775_v47, %v3691_v42 }
 0x51c   :  { %v3777_v54 = vpop.f32.mrf.mxu0 }
 0x51d   :  { %8537 = vst [vmem:[#allocation93_spill] sm:$0xff] %v7816_v53  ;;  %v7818_v59 = vadd.f32 %v3777_v54, %v3695_v48  ;;  %v3698_v54 = vsub.s32 2, %v7809_v23 }
 0x51e   :  { %v3781_v2 = vpop.f32.mrf.mxu0 }
 0x51f   :  { %8538 = vst [vmem:[#allocation94_spill] sm:$0xff] %v7818_v59  ;;  %v7820_v22 = vadd.f32 %v3781_v2, %v3691_v42 }
 0x520   :  { %v3783_v1 = vpop.f32.mrf.mxu0 }
 0x521   :  { %8539 = vst [vmem:[#allocation95_spill] sm:$0xff] %v7820_v22  ;;  %v7822_v24 = vadd.f32 %v3783_v1, %v3695_v48 }
 0x522   :  { %v3787_v21 = vpop.f32.mrf.mxu0 }
 0x523   :  { %8540 = vst [vmem:[#allocation96_spill] sm:$0xff] %v7822_v24  ;;  %v7824_v6 = vadd.f32 %v3787_v21, %v3691_v42  ;;  %v3699_v24 = vrot.slane %v3686_v29, %v3698_v54 }
 0x524   :  { %v3789_v5 = vpop.f32.mrf.mxu0 }
 0x525   :  { %8541 = vst [vmem:[#allocation97_spill] sm:$0xff] %v7824_v6  ;;  %v7826_v20 = vadd.f32 %v3789_v5, %v3695_v48 }
 0x526   :  { %v3793_v4 = vpop.f32.mrf.mxu0 }
 0x527   :  { %8542 = vst [vmem:[#allocation98_spill] sm:$0xff] %v7826_v20  ;;  %v7828_v3 = vadd.f32 %v3793_v4, %v3691_v42  ;;  %v3969_v4 = vld [vmem:[%s8489_s10] sm:$0x7] }
 0x528   :  { %v3795_v47 = vpop.f32.mrf.mxu0  ;;  %v7853_v19 = vrot.slane %v3969_v4, %v3694_v35 }
 0x529   :  { %8543 = vst [vmem:[#allocation99_spill] sm:$0xff] %v7828_v3  ;;  %v7830_v53 = vadd.f32 %v3795_v47, %v3695_v48  ;;  %v6603_v3 = vpop.f32.mrf.mxu1 }
 0x52a   :  { %v3799_v59 = vpop.f32.mrf.mxu0 }
 0x52b   :  { %8544 = vst [vmem:[#allocation100_spill] sm:$0xff] %v7830_v53  ;;  %v7833_v2 = vadd.f32 %v3799_v59, %v3691_v42  ;;  %v7844_v53 = vadd.f32 %v6603_v3, %v3699_v24 }
 0x52c   :  { %v3801_v22 = vpop.f32.mrf.mxu0 }
 0x52d   :  { %8545 = vst [vmem:[#allocation101_spill] sm:$0xff] %v7833_v2  ;;  %v7835_v1 = vadd.f32 %v3801_v22, %v3695_v48  ;;  %8549 = vst [vmem:[#allocation105_spill] sm:$0xff] %v7844_v53  ;;  %v7848_v2 = vrot.slane %v3969_v4, %v3690_v28 }
 0x52e   :  { %v3805_v21 = vpop.f32.mrf.mxu0 }
 0x52f   :  { %8546 = vst [vmem:[#allocation102_spill] sm:$0xff] %v7835_v1  ;;  %v7837_v6 = vadd.f32 %v3805_v21, %v3691_v42  ;;  %8551 = vst [vmem:[#allocation107_spill] sm:$0xff] %v7848_v2  ;;  %v3770_v1 = vadd.f32 %v3769_v34, %v3691_v42 }
 0x530   :  { %v3807_v5 = vpop.f32.mrf.mxu0 }
 0x531   :  { %8547 = vst [vmem:[#allocation103_spill] sm:$0xff] %v7837_v6  ;;  %v7842_v47 = vadd.f32 %v3807_v5, %v3695_v48  ;;  %v3882_v6 = vpop.f32.mrf.mxu1 }
 0x532   :  { %v3811_v23 = vpop.f32.mrf.mxu0 }
 0x533   :  { %8548 = vst [vmem:[#allocation104_spill] sm:$0xff] %v7842_v47  ;;  %v7846_v59 = vadd.f32 %v3811_v23, %v3691_v42 }
 0x534   :  { %v3813_v22 = vpop.f32.mrf.mxu0 }
 0x535   :  { %8550 = vst [vmem:[#allocation106_spill] sm:$0xff] %v7846_v59  ;;  %v7850_v29 = vadd.f32 %v3813_v22, %v3695_v48  ;;  %v6606_v5 = vpop.f32.mrf.mxu1 }
 0x536   :  { %v4052_v21 = vpop.f32.mrf.mxu0  ;;  %v7855_v3 = vadd.f32 %v6606_v5, %v3699_v24 }
 0x537   :  { %8552 = vst [vmem:[#allocation108_spill] sm:$0xff] %v7850_v29  ;;  %v4053_v20 = vadd.f32 %v4052_v21, %v7848_v2  ;;  %v3892_v53 = vpop.f32.mrf.mxu1  ;;  %v3772_v29 = vadd.f32 %v3771_v40, %v3695_v48  ;;  %v7868_v40 = vrot.slane %v3969_v4, %v3698_v54  ;;  %v8563_v54 = vld [vmem:[#allocation90_spill] sm:$0xff]  ;;  %v8565_v4 = vld [vmem:[#allocation87_spill] sm:$0xff] }
 0x538   :  { %v4054_v63 = vpop.f32.mrf.mxu0  ;;  %8553 = vst [vmem:[#allocation109_spill] sm:$0xff] %v7855_v3  ;;  %v7858_v59 = vadd.f32 %v3892_v53, %v3699_v24  ;;  %v8573_v3 = vld [vmem:[#allocation94_spill] sm:$0xff] }
 0x539   :  { %v4127_v47 = vadd.f32 %v4053_v20, %v3770_v1  ;;  %v4055_v28 = vadd.f32 %v4054_v63, %v7853_v19 }
 0x53a   :  { %8554 = vst [vmem:[#allocation110_spill] sm:$0xff] %v7858_v59  ;;  %v6609_v22 = vpop.f32.mrf.mxu1 }
 0x53b   :  { %v6263_v23 = vmul.f32 -1.442695, %v4127_v47  ;;  %v7860_v62 = vadd.f32 %v6609_v22, %v3699_v24  ;;  %v4134_v42 = vadd.f32 %v4055_v28, %v3772_v29 }
 0x53c   :  { %v3902_v34 = vpop.f32.mrf.mxu1 }
 0x53d   :  { %6949 = vpow2.f32 %v6263_v23  ;;  %8555 = vst [vmem:[#allocation111_spill] sm:$0xff] %v7860_v62  ;;  %v7862_v35 = vadd.f32 %v3902_v34, %v3699_v24  ;;  %v6264_v1 = vmul.f32 -1.442695, %v4134_v42  ;;  %v3883_v34 = vadd.f32 %v3882_v6, %v3699_v24  ;;  %v8562_v6 = vld [vmem:[#allocation85_spill] sm:$0xff] }
 0x53e   :  { %v6612_v21 = vpop.f32.mrf.mxu1 }
 0x53f   :  { %8556 = vst [vmem:[#allocation112_spill] sm:$0xff] %v7862_v35  ;;  %v7864_v2 = vadd.f32 %v6612_v21, %v3699_v24  ;;  %6951 = vpow2.f32 %v6264_v1 }
 0x540   :  { %v3912_v20 = vpop.f32.mrf.mxu1 }
 0x541   :  { %8557 = vst [vmem:[#allocation113_spill] sm:$0xff] %v7864_v2  ;;  %v7866_v5 = vadd.f32 %v3912_v20, %v3699_v24  ;;  %v8560_v24 = vmov 0.0  }
 0x543   :  { %8558 = vst [vmem:[#allocation114_spill] sm:$0xff] %v7866_v5 }
 0x54a   :  { %v6950_v63 = vpop.eup %6949 }
 0x54b   :  { %v4131_v53 = vadd.f32 1.0, %v6950_v63 }
 0x54c   :  { %v6952_v48 = vpop.eup %6951 }
 0x54d   :  { %6953 = vrcp.f32 %v4131_v53  ;;  %v4138_v22 = vadd.f32 1.0, %v6952_v48  ;;  %v8568_v48 = vld [vmem:[#allocation89_spill] sm:$0xff] }
 0x54f   :  { %6955 = vrcp.f32 %v4138_v22  ;;  %v8570_v22 = vld [vmem:[#allocation83_spill] sm:$0xff] }
 0x550   :  { %v4123_v47 = vpop.f32.mrf.mxu1 }
 0x551   :  { %v4124_v29 = vadd.f32 %v4123_v47, %v7868_v40  ;;  %v8567_v47 = vld [vmem:[#allocation88_spill] sm:$0xff] }
 0x552   :  { %v6647_v23 = vpop.f32.mrf.mxu1 }
 0x553   :  { %v8569_v23 = vld [vmem:[#allocation92_spill] sm:$0xff] }
 0x55a   :  { %v6954_v28 = vpop.eup %6953 }
 0x55b   :  { %v4141_v21 = vmul.f32 %v6954_v28, %v4124_v29 }
 0x55c   :  { %v6956_v42 = vpop.eup %6955 }
 0x55d   :  { %v4142_v2 = vadd.f32 %v4141_v21, %v3883_v34  ;;  %v4144_v20 = vsub.f32 1.0, %v6956_v42  ;;  %v4146_v63 = vmul.f32 %v6956_v42, %v7545_v41  ;;  %v8561_v41 = vld [vmem:[#allocation84_spill] sm:$0xff]  ;;  %v8571_v34 = vld [vmem:[#allocation107_spill] sm:$0xff] }
 0x55f   :  { %6957 = vtanh.f32 %v4142_v2  ;;  %v8564_v2 = vld [vmem:[#allocation86_spill] sm:$0xff] }
 0x56c   :  { %v6958_v1 = vpop.eup %6957 }
 0x56d   :  { %v4145_v5 = vmul.f32 %v6958_v1, %v4144_v20  ;;  %v8572_v1 = vld [vmem:[#allocation93_spill] sm:$0xff] }
 0x56f   :  { %v7872_v53 = vadd.f32 %v4146_v63, %v4145_v5  ;;  %v8566_v5 = vld [vmem:[#allocation91_spill] sm:$0xff] }
 0x571   :  { %8559 = vst [vmem:[#allocation115_spill] sm:$0xff] %v7872_v53  ;;  %4213 = vmatmul.mubr.f32.vlgmr.msra.gmra.mxu0 %v7872_v53  ;;  %6681 = vmatmul.mubr.f32.vlgmr.msra.gmra.mxu1 %v7872_v53 }
 0x572   :  { %4311 = vmatpush1.msra.mxu0 %v7553_v25  ;;  %6684 = vmatpush3.msra.mxu1 %v7652_v0 }
 0x573   :  { %4312 = vmatprep.subr.mxu0 %v7555_v26  ;;  %6685 = vmatprep.subr.mxu1 %v8560_v24 }
 0x574   :  { %4313 = vmatpush1.msra.mxu0 %v7559_v27  ;;  %6686 = vmatpush3.msra.mxu1 %v7669_v7 }
 0x575   :  { %4314 = vmatprep.subr.mxu0 %v7565_v30  ;;  %6687 = vmatprep.subr.mxu1 %v8560_v24 }
 0x576   :  { %4315 = vmatpush1.msra.mxu0 %v7568_v31  ;;  %6688 = vmatpush3.msra.mxu1 %v7675_v8 }
 0x577   :  { %4316 = vmatprep.subr.mxu0 %v7571_v32  ;;  %6689 = vmatprep.subr.mxu1 %v8560_v24 }
 0x578   :  { %4317 = vmatpush1.msra.mxu0 %v7575_v33  ;;  %6690 = vmatpush3.msra.mxu1 %v7681_v9 }
 0x579   :  { %4318 = vmatprep.subr.mxu0 %v7581_v36  ;;  %6691 = vmatprep.subr.mxu1 %v8560_v24 }
 0x57a   :  { %4319 = vmatpush1.msra.mxu0 %v7584_v37  ;;  %6692 = vmatpush3.msra.mxu1 %v7686_v10 }
 0x57b   :  { %4320 = vmatprep.subr.mxu0 %v7587_v38  ;;  %6693 = vmatprep.subr.mxu1 %v8560_v24 }
 0x57c   :  { %4321 = vmatpush1.msra.mxu0 %v7591_v39  ;;  %6694 = vmatpush3.msra.mxu1 %v7692_v11 }
 0x57d   :  { %4322 = vmatprep.subr.mxu0 %v7597_v43  ;;  %6695 = vmatprep.subr.mxu1 %v8560_v24 }
 0x57e   :  { %4323 = vmatpush1.msra.mxu0 %v7600_v44  ;;  %6696 = vmatpush3.msra.mxu1 %v7698_v12 }
 0x57f   :  { %4324 = vmatprep.subr.mxu0 %v7603_v45  ;;  %6697 = vmatprep.subr.mxu1 %v8560_v24 }
 0x580   :  { %4325 = vmatpush1.msra.mxu0 %v7607_v46  ;;  %6698 = vmatpush3.msra.mxu1 %v7702_v13 }
 0x581   :  { %4326 = vmatprep.subr.mxu0 %v7613_v49  ;;  %6699 = vmatprep.subr.mxu1 %v8560_v24 }
 0x582   :  { %4327 = vmatpush1.msra.mxu0 %v7616_v50  ;;  %6700 = vmatpush3.msra.mxu1 %v7708_v14 }
 0x583   :  { %4328 = vmatprep.subr.mxu0 %v7619_v51  ;;  %6701 = vmatprep.subr.mxu1 %v8560_v24 }
 0x584   :  { %4329 = vmatpush1.msra.mxu0 %v7623_v52  ;;  %6702 = vmatpush3.msra.mxu1 %v7714_v15 }
 0x585   :  { %4330 = vmatprep.subr.mxu0 %v7627_v55  ;;  %6703 = vmatprep.subr.mxu1 %v8560_v24 }
 0x586   :  { %4331 = vmatpush1.msra.mxu0 %v7630_v56  ;;  %6704 = vmatpush3.msra.mxu1 %v7720_v16 }
 0x587   :  { %4332 = vmatprep.subr.mxu0 %v7633_v57  ;;  %6705 = vmatprep.subr.mxu1 %v8560_v24 }
 0x588   :  { %4333 = vmatpush1.msra.mxu0 %v7636_v58  ;;  %6706 = vmatpush3.msra.mxu1 %v7726_v17 }
 0x589   :  { %4334 = vmatprep.subr.mxu0 %v7640_v60  ;;  %6707 = vmatprep.subr.mxu1 %v8560_v24 }
 0x58a   :  { %4335 = vmatpush1.msra.mxu0 %v7643_v61  ;;  %6708 = vmatpush3.msra.mxu1 %v7732_v18 }
 0x58b   :  { %4336 = vmatprep.subr.mxu0 %v8561_v41  ;;  %6709 = vmatprep.subr.mxu1 %v8560_v24 }
 0x58c   :  { %4337 = vmatpush1.msra.mxu0 %v8562_v6  ;;  %6710 = vmatpush3.msra.mxu1 %v8563_v54 }
 0x58d   :  { %4338 = vmatprep.subr.mxu0 %v8564_v2  ;;  %6711 = vmatprep.subr.mxu1 %v8560_v24 }
 0x58e   :  { %4339 = vmatpush1.msra.mxu0 %v8565_v4  ;;  %6712 = vmatpush3.msra.mxu1 %v8566_v5 }
 0x58f   :  { %4340 = vmatprep.subr.mxu0 %v8567_v47  ;;  %6713 = vmatprep.subr.mxu1 %v8560_v24 }
 0x590   :  { %4341 = vmatpush1.msra.mxu0 %v8568_v48  ;;  %4374 = vmatprep.mubr.f32.mxu0 %v8560_v24 }
 0x591   :  { %6714 = vmatpush3.msra.mxu1 %v8569_v23  ;;  %6715 = vmatprep.mubr.msk.f32.mxu1 %vm7210_vm0, %v8560_v24 }
 0x592   :  { %4472 = vmatprep.subr.mxu0 %v8570_v22  ;;  %6718 = vmatprep.subr.mxu1 %v8560_v24 }
 0x631   :  { %v4214_v29 = vpop.f32.mrf.mxu0  ;;  %v4285_v28 = vpop.f32.mrf.mxu1 }
 0x632   :  { %v4215_v21 = vadd.f32 %v4214_v29, %v8571_v34  ;;  %v4286_v4 = vadd.f32 %v4285_v28, %v7868_v40 }
 0x633   :  { %v4216_v42 = vpop.f32.mrf.mxu0  ;;  %v6682_v20 = vpop.f32.mrf.mxu1 }
 0x634   :  { %v4289_v63 = vadd.f32 %v4215_v21, %v8572_v1  ;;  %v4217_v35 = vadd.f32 %v4216_v42, %v7853_v19  ;;  %v8574_v20 = vld [vmem:[#allocation105_spill] sm:$0xff] }
 0x636   :  { %v6265_v62 = vmul.f32 -1.442695, %v4289_v63  ;;  %v4296_v59 = vadd.f32 %v4217_v35, %v8573_v3  ;;  %v8579_v35 = vld [vmem:[#allocation89_spill] sm:$0xff] }
 0x638   :  { %6959 = vpow2.f32 %v6265_v62  ;;  %v6266_v23 = vmul.f32 -1.442695, %v4296_v59 }
 0x63a   :  { %6961 = vpow2.f32 %v6266_v23  ;;  %v8582_v23 = vld [vmem:[#allocation107_spill] sm:$0xff] }
 0x645   :  { %v6960_v48 = vpop.eup %6959 }
 0x646   :  { %v4293_v22 = vadd.f32 1.0, %v6960_v48 }
 0x647   :  { %v6962_v47 = vpop.eup %6961 }
 0x648   :  { %6963 = vrcp.f32 %v4293_v22  ;;  %v4300_v5 = vadd.f32 1.0, %v6962_v47 }
 0x64a   :  { %6965 = vrcp.f32 %v4300_v5  ;;  %v8581_v5 = vld [vmem:[#allocation83_spill] sm:$0xff] }
 0x655   :  { %v6964_v29 = vpop.eup %6963 }
 0x656   :  { %v4303_v34 = vmul.f32 %v6964_v29, %v4286_v4  ;;  %v8580_v4 = vld [vmem:[#allocation92_spill] sm:$0xff]  ;;  %v8583_v29 = vld [vmem:[#allocation95_spill] sm:$0xff] }
 0x657   :  { %v6966_v1 = vpop.eup %6965 }
 0x658   :  { %v4304_v21 = vadd.f32 %v4303_v34, %v8574_v20  ;;  %v4306_v42 = vsub.f32 1.0, %v6966_v1  ;;  %v4308_v59 = vmul.f32 %v6966_v1, %v7872_v53 }
 0x65a   :  { %6967 = vtanh.f32 %v4304_v21 }
 0x667   :  { %v6968_v62 = vpop.eup %6967 }
 0x668   :  { %v4307_v63 = vmul.f32 %v6968_v62, %v4306_v42  ;;  %v8584_v42 = vld [vmem:[#allocation96_spill] sm:$0xff] }
 0x66a   :  { %v7950_v3 = vadd.f32 %v4308_v59, %v4307_v63 }
 0x66c   :  { %8575 = vst [vmem:[#allocation84_spill] sm:$0xff] %v7950_v3  ;;  %4375 = vmatmul.mubr.f32.vlgmr.msra.gmra.mxu0 %v7950_v3  ;;  %6716 = vmatmul.mubr.f32.vlgmr.msra.gmra.mxu1 %v7950_v3 }
 0x66d   :  { %4473 = vmatpush1.msra.mxu0 %v7553_v25  ;;  %6719 = vmatpush3.msra.mxu1 %v7652_v0  ;;  %v8576_v25 = vld [vmem:[#allocation87_spill] sm:$0xff] }
 0x66e   :  { %4474 = vmatprep.subr.mxu0 %v7555_v26  ;;  %6720 = vmatprep.subr.mxu1 %v8560_v24  ;;  %v8577_v26 = vld [vmem:[#allocation91_spill] sm:$0xff] }
 0x66f   :  { %4475 = vmatpush1.msra.mxu0 %v7559_v27  ;;  %6721 = vmatpush3.msra.mxu1 %v7669_v7  ;;  %v8578_v27 = vld [vmem:[#allocation88_spill] sm:$0xff] }
 0x670   :  { %4476 = vmatprep.subr.mxu0 %v7565_v30  ;;  %6722 = vmatprep.subr.mxu1 %v8560_v24 }
 0x671   :  { %4477 = vmatpush1.msra.mxu0 %v7568_v31  ;;  %6723 = vmatpush3.msra.mxu1 %v7675_v8 }
 0x672   :  { %4478 = vmatprep.subr.mxu0 %v7571_v32  ;;  %6724 = vmatprep.subr.mxu1 %v8560_v24 }
 0x673   :  { %4479 = vmatpush1.msra.mxu0 %v7575_v33  ;;  %6725 = vmatpush3.msra.mxu1 %v7681_v9 }
 0x674   :  { %4480 = vmatprep.subr.mxu0 %v7581_v36  ;;  %6726 = vmatprep.subr.mxu1 %v8560_v24 }
 0x675   :  { %4481 = vmatpush1.msra.mxu0 %v7584_v37  ;;  %6727 = vmatpush3.msra.mxu1 %v7686_v10 }
 0x676   :  { %4482 = vmatprep.subr.mxu0 %v7587_v38  ;;  %6728 = vmatprep.subr.mxu1 %v8560_v24 }
 0x677   :  { %4483 = vmatpush1.msra.mxu0 %v7591_v39  ;;  %6729 = vmatpush3.msra.mxu1 %v7692_v11 }
 0x678   :  { %4484 = vmatprep.subr.mxu0 %v7597_v43  ;;  %6730 = vmatprep.subr.mxu1 %v8560_v24 }
 0x679   :  { %4485 = vmatpush1.msra.mxu0 %v7600_v44  ;;  %6731 = vmatpush3.msra.mxu1 %v7698_v12 }
 0x67a   :  { %4486 = vmatprep.subr.mxu0 %v7603_v45  ;;  %6732 = vmatprep.subr.mxu1 %v8560_v24 }
 0x67b   :  { %4487 = vmatpush1.msra.mxu0 %v7607_v46  ;;  %6733 = vmatpush3.msra.mxu1 %v7702_v13 }
 0x67c   :  { %4488 = vmatprep.subr.mxu0 %v7613_v49  ;;  %6734 = vmatprep.subr.mxu1 %v8560_v24 }
 0x67d   :  { %4489 = vmatpush1.msra.mxu0 %v7616_v50  ;;  %6735 = vmatpush3.msra.mxu1 %v7708_v14 }
 0x67e   :  { %4490 = vmatprep.subr.mxu0 %v7619_v51  ;;  %6736 = vmatprep.subr.mxu1 %v8560_v24 }
 0x67f   :  { %4491 = vmatpush1.msra.mxu0 %v7623_v52  ;;  %6737 = vmatpush3.msra.mxu1 %v7714_v15 }
 0x680   :  { %4492 = vmatprep.subr.mxu0 %v7627_v55  ;;  %6738 = vmatprep.subr.mxu1 %v8560_v24 }
 0x681   :  { %4493 = vmatpush1.msra.mxu0 %v7630_v56  ;;  %6739 = vmatpush3.msra.mxu1 %v7720_v16 }
 0x682   :  { %4494 = vmatprep.subr.mxu0 %v7633_v57  ;;  %6740 = vmatprep.subr.mxu1 %v8560_v24 }
 0x683   :  { %4495 = vmatpush1.msra.mxu0 %v7636_v58  ;;  %6741 = vmatpush3.msra.mxu1 %v7726_v17 }
 0x684   :  { %4496 = vmatprep.subr.mxu0 %v7640_v60  ;;  %6742 = vmatprep.subr.mxu1 %v8560_v24 }
 0x685   :  { %4497 = vmatpush1.msra.mxu0 %v7643_v61  ;;  %6743 = vmatpush3.msra.mxu1 %v7732_v18 }
 0x686   :  { %4498 = vmatprep.subr.mxu0 %v8561_v41  ;;  %6744 = vmatprep.subr.mxu1 %v8560_v24 }
 0x687   :  { %4499 = vmatpush1.msra.mxu0 %v8562_v6  ;;  %6745 = vmatpush3.msra.mxu1 %v8563_v54 }
 0x688   :  { %4500 = vmatprep.subr.mxu0 %v8564_v2  ;;  %6746 = vmatprep.subr.mxu1 %v8560_v24 }
 0x689   :  { %4501 = vmatpush1.msra.mxu0 %v8576_v25  ;;  %6747 = vmatpush3.msra.mxu1 %v8577_v26 }
 0x68a   :  { %4502 = vmatprep.subr.mxu0 %v8578_v27  ;;  %6748 = vmatprep.subr.mxu1 %v8560_v24 }
 0x68b   :  { %4503 = vmatpush1.msra.mxu0 %v8579_v35  ;;  %4536 = vmatprep.mubr.f32.mxu0 %v8560_v24 }
 0x68c   :  { %6749 = vmatpush3.msra.mxu1 %v8580_v4  ;;  %6750 = vmatprep.mubr.msk.f32.mxu1 %vm7210_vm0, %v8560_v24 }
 0x68d   :  { %4634 = vmatprep.subr.mxu0 %v8581_v5  ;;  %6753 = vmatprep.subr.mxu1 %v8560_v24 }
 0x72c   :  { %v4376_v47 = vpop.f32.mrf.mxu0  ;;  %v4447_v48 = vpop.f32.mrf.mxu1 }
 0x72d   :  { %v4377_v22 = vadd.f32 %v4376_v47, %v8582_v23  ;;  %v4448_v35 = vadd.f32 %v4447_v48, %v7868_v40  ;;  %v8125_v48 = vld [vmem:[#allocation11 + $0x160] sm:$0xff] }
 0x72e   :  { %v4378_v28 = vpop.f32.mrf.mxu0  ;;  %v6717_v34 = vpop.f32.mrf.mxu1 }
 0x72f   :  { %v4451_v20 = vadd.f32 %v4377_v22, %v8583_v29  ;;  %v4379_v1 = vadd.f32 %v4378_v28, %v7853_v19  ;;  %v8585_v34 = vld [vmem:[#allocation110_spill] sm:$0xff] }
 0x731   :  { %v6267_v21 = vmul.f32 -1.442695, %v4451_v20  ;;  %v4458_v62 = vadd.f32 %v4379_v1, %v8584_v42 }
 0x733   :  { %6969 = vpow2.f32 %v6267_v21  ;;  %v6268_v63 = vmul.f32 -1.442695, %v4458_v62  ;;  %v8132_v62 = vld [vmem:[#allocation11 + $0x138] sm:$0xff] }
 0x735   :  { %6971 = vpow2.f32 %v6268_v63  ;;  %v8135_v63 = vld [vmem:[#allocation11 + $0x148] sm:$0xff] }
 0x740   :  { %v6970_v59 = vpop.eup %6969 }
 0x741   :  { %v4455_v5 = vadd.f32 1.0, %v6970_v59  ;;  %v8138_v59 = vld [vmem:[#allocation11 + $0x128] sm:$0xff] }
 0x742   :  { %v6972_v53 = vpop.eup %6971 }
 0x743   :  { %6973 = vrcp.f32 %v4455_v5  ;;  %v4462_v4 = vadd.f32 1.0, %v6972_v53  ;;  %v8032_v53 = vld [vmem:[#allocation11 + $0x168] sm:$0xff]  ;;  %v8142_v5 = vld [vmem:[#allocation11 + $0x120] sm:$0xff] }
 0x745   :  { %6975 = vrcp.f32 %v4462_v4  ;;  %v8040_v4 = vld [vmem:[#allocation11 + $0x150] sm:$0xff] }
 0x750   :  { %v6974_v47 = vpop.eup %6973 }
 0x751   :  { %v4465_v23 = vmul.f32 %v6974_v47, %v4448_v35  ;;  %v8036_v35 = vld [vmem:[#allocation11 + $0x158] sm:$0xff]  ;;  %v8145_v47 = vld [vmem:[#allocation11 + $0x130] sm:$0xff] }
 0x752   :  { %v6976_v29 = vpop.eup %6975 }
 0x753   :  { %v4466_v22 = vadd.f32 %v4465_v23, %v8585_v34  ;;  %v4468_v28 = vsub.f32 1.0, %v6976_v29  ;;  %v4470_v1 = vmul.f32 %v6976_v29, %v7950_v3  ;;  %v8128_v23 = vld [vmem:[#allocation11 + $0x140] sm:$0xff]  ;;  %v8148_v34 = vld [vmem:[#allocation11 + $0x110] sm:$0xff]  ;;  %v8155_v29 = vld [vmem:[#allocation11 + $0x118] sm:$0xff] }
 0x755   :  { %6977 = vtanh.f32 %v4466_v22  ;;  %v8152_v22 = vld [vmem:[#allocation11 + $0x108] sm:$0xff] }
 0x762   :  { %v6978_v20 = vpop.eup %6977 }
 0x763   :  { %v4469_v21 = vmul.f32 %v6978_v20, %v4468_v28  ;;  %v8158_v28 = vld [vmem:[#allocation11 + $0xf8] sm:$0xff]  ;;  %v8162_v20 = vld [vmem:[#allocation11 + $0xf0] sm:$0xff] }
 0x765   :  { %v8028_v42 = vadd.f32 %v4470_v1, %v4469_v21  ;;  %v8166_v21 = vld [vmem:[#allocation11 + $0xe0] sm:$0xff]  ;;  %v8170_v1 = vld [vmem:[#allocation11 + $0xd8] sm:$0xff] }
 0x767   :  { %8586 = vst [vmem:[#allocation85_spill] sm:$0xff] %v8028_v42  ;;  %4537 = vmatmul.mubr.f32.vlgmr.msra.gmra.mxu0 %v8028_v42  ;;  %6751 = vmatmul.mubr.f32.vlgmr.msra.gmra.mxu1 %v8028_v42 }
 0x768   :  { %4635 = vmatpush1.msra.mxu0 %v8032_v53  ;;  %6754 = vmatpush3.msra.mxu1 %v7652_v0 }
 0x769   :  { %4636 = vmatprep.subr.mxu0 %v8036_v35  ;;  %6755 = vmatprep.subr.mxu1 %v8560_v24 }
 0x76a   :  { %4637 = vmatpush1.msra.mxu0 %v8040_v4  ;;  %6756 = vmatpush3.msra.mxu1 %v7669_v7  ;;  %v8592_v7 = vld [vmem:[#allocation109_spill] sm:$0xff] }
 0x76b   :  { %4638 = vmatprep.subr.mxu0 %v7565_v30  ;;  %6757 = vmatprep.subr.mxu1 %v8560_v24  ;;  %v8587_v30 = vld [vmem:[#allocation89_spill] sm:$0xff] }
 0x76c   :  { %4639 = vmatpush1.msra.mxu0 %v7568_v31  ;;  %6758 = vmatpush3.msra.mxu1 %v7675_v8  ;;  %v8588_v31 = vld [vmem:[#allocation92_spill] sm:$0xff] }
 0x76d   :  { %4640 = vmatprep.subr.mxu0 %v7571_v32  ;;  %6759 = vmatprep.subr.mxu1 %v8560_v24  ;;  %v8103_v32 = vld [vmem:[#allocation11 + $0x170] sm:$0xff] }
 0x76e   :  { %4641 = vmatpush1.msra.mxu0 %v7575_v33  ;;  %6760 = vmatpush3.msra.mxu1 %v7681_v9 }
 0x76f   :  { %4642 = vmatprep.subr.mxu0 %v7581_v36  ;;  %6761 = vmatprep.subr.mxu1 %v8560_v24 }
 0x770   :  { %4643 = vmatpush1.msra.mxu0 %v7584_v37  ;;  %6762 = vmatpush3.msra.mxu1 %v7686_v10  ;;  %v8589_v37 = vld [vmem:[#allocation107_spill] sm:$0xff] }
 0x771   :  { %4644 = vmatprep.subr.mxu0 %v7587_v38  ;;  %6763 = vmatprep.subr.mxu1 %v8560_v24 }
 0x772   :  { %4645 = vmatpush1.msra.mxu0 %v7591_v39  ;;  %6764 = vmatpush3.msra.mxu1 %v7692_v11 }
 0x773   :  { %4646 = vmatprep.subr.mxu0 %v7597_v43  ;;  %6765 = vmatprep.subr.mxu1 %v8560_v24 }
 0x774   :  { %4647 = vmatpush1.msra.mxu0 %v7600_v44  ;;  %6766 = vmatpush3.msra.mxu1 %v7698_v12  ;;  %v8590_v44 = vld [vmem:[#allocation97_spill] sm:$0xff] }
 0x775   :  { %4648 = vmatprep.subr.mxu0 %v7603_v45  ;;  %6767 = vmatprep.subr.mxu1 %v8560_v24 }
 0x776   :  { %4649 = vmatpush1.msra.mxu0 %v7607_v46  ;;  %6768 = vmatpush3.msra.mxu1 %v7702_v13 }
 0x777   :  { %4650 = vmatprep.subr.mxu0 %v7613_v49  ;;  %6769 = vmatprep.subr.mxu1 %v8560_v24 }
 0x778   :  { %4651 = vmatpush1.msra.mxu0 %v7616_v50  ;;  %6770 = vmatpush3.msra.mxu1 %v7708_v14  ;;  %v8591_v50 = vld [vmem:[#allocation98_spill] sm:$0xff] }
 0x779   :  { %4652 = vmatprep.subr.mxu0 %v7619_v51  ;;  %6771 = vmatprep.subr.mxu1 %v8560_v24 }
 0x77a   :  { %4653 = vmatpush1.msra.mxu0 %v7623_v52  ;;  %6772 = vmatpush3.msra.mxu1 %v7714_v15 }
 0x77b   :  { %4654 = vmatprep.subr.mxu0 %v7627_v55  ;;  %6773 = vmatprep.subr.mxu1 %v8560_v24 }
 0x77c   :  { %4655 = vmatpush1.msra.mxu0 %v7630_v56  ;;  %6774 = vmatpush3.msra.mxu1 %v7720_v16 }
 0x77d   :  { %4656 = vmatprep.subr.mxu0 %v7633_v57  ;;  %6775 = vmatprep.subr.mxu1 %v8560_v24 }
 0x77e   :  { %4657 = vmatpush1.msra.mxu0 %v7636_v58  ;;  %6776 = vmatpush3.msra.mxu1 %v7726_v17 }
 0x77f   :  { %4658 = vmatprep.subr.mxu0 %v7640_v60  ;;  %6777 = vmatprep.subr.mxu1 %v8560_v24 }
 0x780   :  { %4659 = vmatpush1.msra.mxu0 %v7643_v61  ;;  %6778 = vmatpush3.msra.mxu1 %v7732_v18 }
 0x781   :  { %4660 = vmatprep.subr.mxu0 %v8561_v41  ;;  %6779 = vmatprep.subr.mxu1 %v8560_v24 }
 0x782   :  { %4661 = vmatpush1.msra.mxu0 %v8562_v6  ;;  %6780 = vmatpush3.msra.mxu1 %v8563_v54 }
 0x783   :  { %4662 = vmatprep.subr.mxu0 %v8564_v2  ;;  %6781 = vmatprep.subr.mxu1 %v8560_v24 }
 0x784   :  { %4663 = vmatpush1.msra.mxu0 %v8576_v25  ;;  %6782 = vmatpush3.msra.mxu1 %v8577_v26 }
 0x785   :  { %4664 = vmatprep.subr.mxu0 %v8578_v27  ;;  %6783 = vmatprep.subr.mxu1 %v8560_v24  ;;  %v8119_v27 = vld [vmem:[#allocation11 + $0x178] sm:$0xff] }
 0x786   :  { %4665 = vmatpush1.msra.mxu0 %v8587_v30  ;;  %4698 = vmatprep.mubr.f32.mxu0 %v8560_v24  ;;  %v8174_v30 = vld [vmem:[#allocation11 + $0xc8] sm:$0xff] }
 0x787   :  { %6784 = vmatpush3.msra.mxu1 %v8588_v31  ;;  %6785 = vmatprep.mubr.msk.f32.mxu1 %vm7210_vm0, %v8560_v24 }
 0x788   :  { %4796 = vmatprep.subr.mxu0 %v8103_v32  ;;  %6788 = vmatprep.subr.mxu1 %v8560_v24 }
 0x827   :  { %v4538_v33 = vpop.f32.mrf.mxu0  ;;  %v4609_v36 = vpop.f32.mrf.mxu1 }
 0x828   :  { %v4539_v38 = vadd.f32 %v4538_v33, %v8589_v37  ;;  %v4610_v60 = vadd.f32 %v4609_v36, %v7868_v40  ;;  %v8178_v33 = vld [vmem:[#allocation11 + $0xc0] sm:$0xff]  ;;  %v8186_v36 = vld [vmem:[#allocation11 + $0xa8] sm:$0xff] }
 0x829   :  { %v4540_v39 = vpop.f32.mrf.mxu0  ;;  %v6752_v43 = vpop.f32.mrf.mxu1 }
 0x82a   :  { %v4613_v45 = vadd.f32 %v4539_v38, %v8590_v44  ;;  %v4541_v49 = vadd.f32 %v4540_v39, %v7853_v19  ;;  %v8194_v38 = vld [vmem:[#allocation11 + $0x90] sm:$0xff]  ;;  %v8202_v39 = vld [vmem:[#allocation11 + $0x78] sm:$0xff]  ;;  %v8210_v43 = vld [vmem:[#allocation11 + $0x60] sm:$0xff] }
 0x82b   :  { %v8218_v44 = vld [vmem:[#allocation11 + $0x48] sm:$0xff] }
 0x82c   :  { %v6269_v46 = vmul.f32 -1.442695, %v4613_v45  ;;  %v4620_v51 = vadd.f32 %v4541_v49, %v8591_v50  ;;  %v8226_v45 = vld [vmem:[#allocation11 + $0x30] sm:$0xff]  ;;  %v8242_v49 = vld [vmem:[#allocation11] sm:$0xff] }
 0x82d   :  { %8596 = vst [vmem:[#allocation94_spill] sm:$0xff] %v8242_v49 }
 0x82e   :  { %6979 = vpow2.f32 %v6269_v46  ;;  %v6270_v52 = vmul.f32 -1.442695, %v4620_v51  ;;  %v8234_v46 = vld [vmem:[#allocation11 + $0x18] sm:$0xff] }
 0x82f   :  { %8594 = vst [vmem:[#allocation86_spill] sm:$0xff] %v8234_v46 }
 0x830   :  { %6981 = vpow2.f32 %v6270_v52 }
 0x83b   :  { %v6980_v55 = vpop.eup %6979 }
 0x83c   :  { %v4617_v56 = vadd.f32 1.0, %v6980_v55  ;;  %v8597_v55 = vld [vmem:[#allocation99_spill] sm:$0xff] }
 0x83d   :  { %v6982_v57 = vpop.eup %6981 }
 0x83e   :  { %6983 = vrcp.f32 %v4617_v56  ;;  %v4624_v58 = vadd.f32 1.0, %v6982_v57 }
 0x840   :  { %6985 = vrcp.f32 %v4624_v58 }
 0x84b   :  { %v6984_v61 = vpop.eup %6983 }
 0x84c   :  { %v4627_v0 = vmul.f32 %v6984_v61, %v4610_v60 }
 0x84d   :  { %v6986_v9 = vpop.eup %6985 }
 0x84e   :  { %v4628_v8 = vadd.f32 %v4627_v0, %v8592_v7  ;;  %v4630_v10 = vsub.f32 1.0, %v6986_v9  ;;  %v4632_v2 = vmul.f32 %v6986_v9, %v8028_v42  ;;  %v8603_v42 = vld [vmem:[#allocation102_spill] sm:$0xff] }
 0x850   :  { %6987 = vtanh.f32 %v4628_v8 }
 0x85d   :  { %v6988_v41 = vpop.eup %6987 }
 0x85e   :  { %v4631_v6 = vmul.f32 %v6988_v41, %v4630_v10 }
 0x860   :  { %v8114_v25 = vadd.f32 %v4632_v2, %v4631_v6  ;;  %v8599_v2 = vld [vmem:[#allocation112_spill] sm:$0xff] }
 0x862   :  { %8593 = vst [vmem:[#allocation90_spill] sm:$0xff] %v8114_v25  ;;  %4699 = vmatmul.mubr.f32.vlgmr.msra.gmra.mxu0 %v8114_v25  ;;  %6786 = vmatmul.mubr.f32.vlgmr.msra.gmra.mxu1 %v8114_v25 }
 0x863   :  { %4797 = vmatpush1.msra.mxu0 %v8032_v53  ;;  %6789 = vmatpush3.msra.mxu1 %v8119_v27 }
 0x864   :  { %4798 = vmatprep.subr.mxu0 %v8036_v35  ;;  %6790 = vmatprep.subr.mxu1 %v8560_v24 }
 0x865   :  { %4799 = vmatpush1.msra.mxu0 %v8040_v4  ;;  %6791 = vmatpush3.msra.mxu1 %v8125_v48 }
 0x866   :  { %4800 = vmatprep.subr.mxu0 %v8128_v23  ;;  %6792 = vmatprep.subr.mxu1 %v8560_v24 }
 0x867   :  { %4801 = vmatpush1.msra.mxu0 %v8132_v62  ;;  %6793 = vmatpush3.msra.mxu1 %v8135_v63 }
 0x868   :  { %4802 = vmatprep.subr.mxu0 %v8138_v59  ;;  %6794 = vmatprep.subr.mxu1 %v8560_v24 }
 0x869   :  { %4803 = vmatpush1.msra.mxu0 %v8142_v5  ;;  %6795 = vmatpush3.msra.mxu1 %v8145_v47 }
 0x86a   :  { %4804 = vmatprep.subr.mxu0 %v8148_v34  ;;  %6796 = vmatprep.subr.mxu1 %v8560_v24 }
 0x86b   :  { %4805 = vmatpush1.msra.mxu0 %v8152_v22  ;;  %6797 = vmatpush3.msra.mxu1 %v8155_v29 }
 0x86c   :  { %4806 = vmatprep.subr.mxu0 %v8158_v28  ;;  %6798 = vmatprep.subr.mxu1 %v8560_v24 }
 0x86d   :  { %4807 = vmatpush1.msra.mxu0 %v8162_v20  ;;  %6799 = vmatpush3.msra.mxu1 %v7692_v11  ;;  %v8182_v11 = vld [vmem:[#allocation11 + $0xb0] sm:$0xff] }
 0x86e   :  { %4808 = vmatprep.subr.mxu0 %v8166_v21  ;;  %6800 = vmatprep.subr.mxu1 %v8560_v24 }
 0x86f   :  { %4809 = vmatpush1.msra.mxu0 %v8170_v1  ;;  %6801 = vmatpush3.msra.mxu1 %v7698_v12  ;;  %v8190_v12 = vld [vmem:[#allocation11 + $0x98] sm:$0xff] }
 0x870   :  { %4810 = vmatprep.subr.mxu0 %v8174_v30  ;;  %6802 = vmatprep.subr.mxu1 %v8560_v24 }
 0x871   :  { %4811 = vmatpush1.msra.mxu0 %v8178_v33  ;;  %6803 = vmatpush3.msra.mxu1 %v7702_v13  ;;  %v8198_v13 = vld [vmem:[#allocation11 + $0x80] sm:$0xff] }
 0x872   :  { %4812 = vmatprep.subr.mxu0 %v8182_v11  ;;  %6804 = vmatprep.subr.mxu1 %v8560_v24 }
 0x873   :  { %4813 = vmatpush1.msra.mxu0 %v8186_v36  ;;  %6805 = vmatpush3.msra.mxu1 %v7708_v14  ;;  %v8206_v14 = vld [vmem:[#allocation11 + $0x68] sm:$0xff] }
 0x874   :  { %4814 = vmatprep.subr.mxu0 %v8190_v12  ;;  %6806 = vmatprep.subr.mxu1 %v8560_v24 }
 0x875   :  { %4815 = vmatpush1.msra.mxu0 %v8194_v38  ;;  %6807 = vmatpush3.msra.mxu1 %v7714_v15  ;;  %v8214_v15 = vld [vmem:[#allocation11 + $0x50] sm:$0xff] }
 0x876   :  { %4816 = vmatprep.subr.mxu0 %v8198_v13  ;;  %6808 = vmatprep.subr.mxu1 %v8560_v24 }
 0x877   :  { %4817 = vmatpush1.msra.mxu0 %v8202_v39  ;;  %6809 = vmatpush3.msra.mxu1 %v7720_v16  ;;  %v8222_v16 = vld [vmem:[#allocation11 + $0x38] sm:$0xff] }
 0x878   :  { %4818 = vmatprep.subr.mxu0 %v8206_v14  ;;  %6810 = vmatprep.subr.mxu1 %v8560_v24 }
 0x879   :  { %4819 = vmatpush1.msra.mxu0 %v8210_v43  ;;  %6811 = vmatpush3.msra.mxu1 %v7726_v17  ;;  %v8230_v17 = vld [vmem:[#allocation11 + $0x20] sm:$0xff] }
 0x87a   :  { %4820 = vmatprep.subr.mxu0 %v8214_v15  ;;  %6812 = vmatprep.subr.mxu1 %v8560_v24 }
 0x87b   :  { %4821 = vmatpush1.msra.mxu0 %v8218_v44  ;;  %6813 = vmatpush3.msra.mxu1 %v7732_v18  ;;  %v8238_v18 = vld [vmem:[#allocation11 + $0x8] sm:$0xff] }
 0x87c   :  { %4822 = vmatprep.subr.mxu0 %v8222_v16  ;;  %6814 = vmatprep.subr.mxu1 %v8560_v24  ;;  %8595 = vst [vmem:[#allocation93_spill] sm:$0xff] %v8238_v18 }
 0x87d   :  { %4823 = vmatpush1.msra.mxu0 %v8226_v45  ;;  %6815 = vmatpush3.msra.mxu1 %v8563_v54 }
 0x87e   :  { %4824 = vmatprep.subr.mxu0 %v8230_v17  ;;  %6816 = vmatprep.subr.mxu1 %v8560_v24 }
 0x87f   :  { %4825 = vmatpush1.msra.mxu0 %v8234_v46  ;;  %6817 = vmatpush3.msra.mxu1 %v8577_v26 }
 0x880   :  { %4826 = vmatprep.subr.mxu0 %v8238_v18  ;;  %6818 = vmatprep.subr.mxu1 %v8560_v24 }
 0x881   :  { %4827 = vmatpush1.msra.mxu0 %v8242_v49  ;;  %4860 = vmatprep.mubr.f32.mxu0 %v8560_v24 }
 0x882   :  { %6819 = vmatpush3.msra.mxu1 %v8588_v31  ;;  %6820 = vmatprep.mubr.msk.f32.mxu1 %vm7210_vm0, %v8560_v24  ;;  %v8598_v31 = vld [vmem:[#allocation100_spill] sm:$0xff] }
 0x883   :  { %4958 = vmatprep.subr.mxu0 %v8103_v32  ;;  %6823 = vmatprep.subr.mxu1 %v8560_v24 }
 0x922   :  { %v4700_v54 = vpop.f32.mrf.mxu0  ;;  %v4771_v26 = vpop.f32.mrf.mxu1 }
 0x923   :  { %v4701_v50 = vadd.f32 %v4700_v54, %v8589_v37  ;;  %v4772_v10 = vadd.f32 %v4771_v26, %v7868_v40  ;;  %v8283_v26 = vld [vmem:[#allocation11 + $0x100] sm:$0xff] }
 0x924   :  { %v4702_v51 = vpop.f32.mrf.mxu0  ;;  %v6787_v52 = vpop.f32.mrf.mxu1 }
 0x925   :  { %v4775_v56 = vadd.f32 %v4701_v50, %v8597_v55  ;;  %v4703_v58 = vadd.f32 %v4702_v51, %v7853_v19 }
 0x927   :  { %v6271_v57 = vmul.f32 -1.442695, %v4775_v56  ;;  %v4782_v60 = vadd.f32 %v4703_v58, %v8598_v31  ;;  %v8289_v58 = vld [vmem:[#allocation11 + $0xe8] sm:$0xff]  ;;  %v8295_v31 = vld [vmem:[#allocation11 + $0xd0] sm:$0xff] }
 0x929   :  { %6989 = vpow2.f32 %v6271_v57  ;;  %v6272_v61 = vmul.f32 -1.442695, %v4782_v60  ;;  %v8301_v60 = vld [vmem:[#allocation11 + $0xb8] sm:$0xff] }
 0x92b   :  { %6991 = vpow2.f32 %v6272_v61  ;;  %v8307_v61 = vld [vmem:[#allocation11 + $0xa0] sm:$0xff] }
 0x936   :  { %v6990_v0 = vpop.eup %6989 }
 0x937   :  { %v4779_v7 = vadd.f32 1.0, %v6990_v0  ;;  %v8313_v0 = vld [vmem:[#allocation11 + $0x88] sm:$0xff] }
 0x938   :  { %v6992_v8 = vpop.eup %6991 }
 0x939   :  { %6993 = vrcp.f32 %v4779_v7  ;;  %v4786_v9 = vadd.f32 1.0, %v6992_v8  ;;  %v8319_v7 = vld [vmem:[#allocation11 + $0x70] sm:$0xff]  ;;  %v8325_v8 = vld [vmem:[#allocation11 + $0x58] sm:$0xff] }
 0x93b   :  { %6995 = vrcp.f32 %v4786_v9  ;;  %v8331_v9 = vld [vmem:[#allocation11 + $0x40] sm:$0xff] }
 0x946   :  { %v6994_v41 = vpop.eup %6993 }
 0x947   :  { %v4789_v6 = vmul.f32 %v6994_v41, %v4772_v10  ;;  %v8337_v10 = vld [vmem:[#allocation11 + $0x28] sm:$0xff]  ;;  %v8344_v41 = vld [vmem:[#allocation11 + $0x10] sm:$0xff] }
 0x948   :  { %v6996_v50 = vpop.eup %6995  ;;  %8600 = vst [vmem:[#allocation105_spill] sm:$0xff] %v8337_v10  ;;  %8601 = vst [vmem:[#allocation87_spill] sm:$0xff] %v8344_v41 }
 0x949   :  { %v4790_v54 = vadd.f32 %v4789_v6, %v8599_v2  ;;  %v4792_v51 = vsub.f32 1.0, %v6996_v50  ;;  %v4794_v56 = vmul.f32 %v6996_v50, %v8114_v25 }
 0x94b   :  { %6997 = vtanh.f32 %v4790_v54 }
 0x958   :  { %v6998_v52 = vpop.eup %6997 }
 0x959   :  { %v4793_v55 = vmul.f32 %v6998_v52, %v4792_v51  ;;  %v8602_v52 = vld [vmem:[#allocation101_spill] sm:$0xff] }
 0x95b   :  { %v8258_v57 = vadd.f32 %v4794_v56, %v4793_v55 }
 0x95d   :  { %4861 = vmatmul.mubr.f32.vlgmr.msra.gmra.mxu0 %v8258_v57  ;;  %6821 = vmatmul.mubr.f32.vlgmr.msra.gmra.mxu1 %v8258_v57 }
 0x95e   :  { %4959 = vmatpush1.msra.mxu0 %v8032_v53  ;;  %6824 = vmatpush3.msra.mxu1 %v8119_v27 }
 0x95f   :  { %4960 = vmatprep.subr.mxu0 %v8036_v35  ;;  %6825 = vmatprep.subr.mxu1 %v8560_v24 }
 0x960   :  { %4961 = vmatpush1.msra.mxu0 %v8040_v4  ;;  %6826 = vmatpush3.msra.mxu1 %v8125_v48 }
 0x961   :  { %4962 = vmatprep.subr.mxu0 %v8128_v23  ;;  %6827 = vmatprep.subr.mxu1 %v8560_v24 }
 0x962   :  { %4963 = vmatpush1.msra.mxu0 %v8132_v62  ;;  %6828 = vmatpush3.msra.mxu1 %v8135_v63 }
 0x963   :  { %4964 = vmatprep.subr.mxu0 %v8138_v59  ;;  %6829 = vmatprep.subr.mxu1 %v8560_v24 }
 0x964   :  { %4965 = vmatpush1.msra.mxu0 %v8142_v5  ;;  %6830 = vmatpush3.msra.mxu1 %v8145_v47 }
 0x965   :  { %4966 = vmatprep.subr.mxu0 %v8148_v34  ;;  %6831 = vmatprep.subr.mxu1 %v8560_v24 }
 0x966   :  { %4967 = vmatpush1.msra.mxu0 %v8152_v22  ;;  %6832 = vmatpush3.msra.mxu1 %v8155_v29 }
 0x967   :  { %4968 = vmatprep.subr.mxu0 %v8158_v28  ;;  %6833 = vmatprep.subr.mxu1 %v8560_v24 }
 0x968   :  { %4969 = vmatpush1.msra.mxu0 %v8162_v20  ;;  %6834 = vmatpush3.msra.mxu1 %v8283_v26 }
 0x969   :  { %4970 = vmatprep.subr.mxu0 %v8166_v21  ;;  %6835 = vmatprep.subr.mxu1 %v8560_v24 }
 0x96a   :  { %4971 = vmatpush1.msra.mxu0 %v8170_v1  ;;  %6836 = vmatpush3.msra.mxu1 %v8289_v58 }
 0x96b   :  { %4972 = vmatprep.subr.mxu0 %v8174_v30  ;;  %6837 = vmatprep.subr.mxu1 %v8560_v24 }
 0x96c   :  { %4973 = vmatpush1.msra.mxu0 %v8178_v33  ;;  %6838 = vmatpush3.msra.mxu1 %v8295_v31 }
 0x96d   :  { %4974 = vmatprep.subr.mxu0 %v8182_v11  ;;  %6839 = vmatprep.subr.mxu1 %v8560_v24 }
 0x96e   :  { %4975 = vmatpush1.msra.mxu0 %v8186_v36  ;;  %6840 = vmatpush3.msra.mxu1 %v8301_v60 }
 0x96f   :  { %4976 = vmatprep.subr.mxu0 %v8190_v12  ;;  %6841 = vmatprep.subr.mxu1 %v8560_v24 }
 0x970   :  { %4977 = vmatpush1.msra.mxu0 %v8194_v38  ;;  %6842 = vmatpush3.msra.mxu1 %v8307_v61 }
 0x971   :  { %4978 = vmatprep.subr.mxu0 %v8198_v13  ;;  %6843 = vmatprep.subr.mxu1 %v8560_v24 }
 0x972   :  { %4979 = vmatpush1.msra.mxu0 %v8202_v39  ;;  %6844 = vmatpush3.msra.mxu1 %v8313_v0 }
 0x973   :  { %4980 = vmatprep.subr.mxu0 %v8206_v14  ;;  %6845 = vmatprep.subr.mxu1 %v8560_v24 }
 0x974   :  { %4981 = vmatpush1.msra.mxu0 %v8210_v43  ;;  %6846 = vmatpush3.msra.mxu1 %v8319_v7 }
 0x975   :  { %4982 = vmatprep.subr.mxu0 %v8214_v15  ;;  %6847 = vmatprep.subr.mxu1 %v8560_v24 }
 0x976   :  { %4983 = vmatpush1.msra.mxu0 %v8218_v44  ;;  %6848 = vmatpush3.msra.mxu1 %v8325_v8 }
 0x977   :  { %4984 = vmatprep.subr.mxu0 %v8222_v16  ;;  %6849 = vmatprep.subr.mxu1 %v8560_v24 }
 0x978   :  { %4985 = vmatpush1.msra.mxu0 %v8226_v45  ;;  %6850 = vmatpush3.msra.mxu1 %v8331_v9 }
 0x979   :  { %4986 = vmatprep.subr.mxu0 %v8230_v17  ;;  %6851 = vmatprep.subr.mxu1 %v8560_v24 }
 0x97a   :  { %4987 = vmatpush1.msra.mxu0 %v8234_v46  ;;  %6852 = vmatpush3.msra.mxu1 %v8337_v10 }
 0x97b   :  { %4988 = vmatprep.subr.mxu0 %v8238_v18  ;;  %6853 = vmatprep.subr.mxu1 %v8560_v24 }
 0x97c   :  { %4989 = vmatpush1.msra.mxu0 %v8242_v49  ;;  %5022 = vmatprep.mubr.f32.mxu0 %v8560_v24 }
 0x97d   :  { %6854 = vmatpush3.msra.mxu1 %v8344_v41  ;;  %6855 = vmatprep.mubr.msk.f32.mxu1 %vm7210_vm0, %v8560_v24 }
 0x97e   :  { %5120 = vmatprep.subr.mxu0 %v8103_v32  ;;  %6858 = vmatprep.subr.mxu1 %v8560_v24 }
 0xa1d   :  { %v4862_v6 = vpop.f32.mrf.mxu0  ;;  %v4933_v2 = vpop.f32.mrf.mxu1 }
 0xa1e   :  { %v4863_v54 = vadd.f32 %v4862_v6, %v8589_v37  ;;  %v4934_v46 = vadd.f32 %v4933_v2, %v7868_v40  ;;  %v8615_v2 = vld [vmem:[#allocation84_spill] sm:$0xff] }
 0xa1f   :  { %v4864_v50 = vpop.f32.mrf.mxu0  ;;  %v6822_v51 = vpop.f32.mrf.mxu1 }
 0xa20   :  { %v4937_v55 = vadd.f32 %v4863_v54, %v8602_v52  ;;  %v4865_v25 = vadd.f32 %v4864_v50, %v7853_v19  ;;  %v8604_v51 = vld [vmem:[#allocation111_spill] sm:$0xff] }
 0xa22   :  { %v6273_v56 = vmul.f32 -1.442695, %v4937_v55  ;;  %v4944_v3 = vadd.f32 %v4865_v25, %v8603_v42  ;;  %v8609_v25 = vld [vmem:[#allocation87_spill] sm:$0xff] }
 0xa24   :  { %6999 = vpow2.f32 %v6273_v56  ;;  %v6274_v41 = vmul.f32 -1.442695, %v4944_v3 }
 0xa26   :  { %7001 = vpow2.f32 %v6274_v41  ;;  %v5282_v41 = vld [vmem:[#allocation13] sm:$0xff] }
 0xa31   :  { %v7000_v49 = vpop.eup %6999 }
 0xa32   :  { %v4941_v32 = vadd.f32 1.0, %v7000_v49  ;;  %v5293_v49 = vld [vmem:[#allocation13 + $0x58] sm:$0xff] }
 0xa33   :  { %v7002_v18 = vpop.eup %7001 }
 0xa34   :  { %7003 = vrcp.f32 %v4941_v32  ;;  %v4948_v10 = vadd.f32 1.0, %v7002_v18  ;;  %v5294_v18 = vld [vmem:[#allocation13 + $0x60] sm:$0xff]  ;;  %v8616_v32 = vld [vmem:[#allocation85_spill] sm:$0xff] }
 0xa36   :  { %7005 = vrcp.f32 %v4948_v10  ;;  %v5283_v10 = vld [vmem:[#allocation13 + $0x8] sm:$0xff] }
 0xa41   :  { %v7004_v6 = vpop.eup %7003 }
 0xa42   :  { %v4951_v37 = vmul.f32 %v7004_v6, %v4934_v46  ;;  %v5295_v46 = vld [vmem:[#allocation13 + $0x68] sm:$0xff]  ;;  %v8617_v6 = vld [vmem:[#allocation90_spill] sm:$0xff] }
 0xa43   :  { %v7006_v52 = vpop.eup %7005 }
 0xa44   :  { %v4952_v54 = vadd.f32 %v4951_v37, %v8604_v51  ;;  %v4954_v50 = vsub.f32 1.0, %v7006_v52  ;;  %v4956_v3 = vmul.f32 %v7006_v52, %v8258_v57  ;;  %v8608_v37 = vld [vmem:[#allocation94_spill] sm:$0xff] }
 0xa46   :  { %7007 = vtanh.f32 %v4952_v54 }
 0xa53   :  { %v7008_v55 = vpop.eup %7007 }
 0xa54   :  { %v4955_v56 = vmul.f32 %v7008_v55, %v4954_v50 }
 0xa56   :  { %v8358_v42 = vadd.f32 %v4956_v3, %v4955_v56  ;;  %v8618_v56 = vld [vmem:[#allocation106_spill] sm:$0xff] }
 0xa58   :  { %5023 = vmatmul.mubr.f32.vlgmr.msra.gmra.mxu0 %v8358_v42  ;;  %6856 = vmatmul.mubr.f32.vlgmr.msra.gmra.mxu1 %v8358_v42 }
 0xa59   :  { %5121 = vmatpush1.msra.mxu0 %v8032_v53  ;;  %6859 = vmatpush3.msra.mxu1 %v8119_v27  ;;  %v8605_v53 = vld [vmem:[#allocation86_spill] sm:$0xff] }
 0xa5a   :  { %5122 = vmatprep.subr.mxu0 %v8036_v35  ;;  %6860 = vmatprep.subr.mxu1 %v8560_v24  ;;  %v8606_v35 = vld [vmem:[#allocation105_spill] sm:$0xff]  ;;  %v5297_v27 = vld [vmem:[#allocation13 + $0x78] sm:$0xff] }
 0xa5b   :  { %5123 = vmatpush1.msra.mxu0 %v8040_v4  ;;  %6861 = vmatpush3.msra.mxu1 %v8125_v48  ;;  %v8607_v4 = vld [vmem:[#allocation93_spill] sm:$0xff] }
 0xa5c   :  { %5124 = vmatprep.subr.mxu0 %v8128_v23  ;;  %6862 = vmatprep.subr.mxu1 %v8560_v24 }
 0xa5d   :  { %5125 = vmatpush1.msra.mxu0 %v8132_v62  ;;  %6863 = vmatpush3.msra.mxu1 %v8135_v63  ;;  %v8610_v62 = vld [vmem:[#allocation107_spill] sm:$0xff] }
 0xa5e   :  { %5126 = vmatprep.subr.mxu0 %v8138_v59  ;;  %6864 = vmatprep.subr.mxu1 %v8560_v24 }
 0xa5f   :  { %5127 = vmatpush1.msra.mxu0 %v8142_v5  ;;  %6865 = vmatpush3.msra.mxu1 %v8145_v47  ;;  %v8611_v47 = vld [vmem:[#allocation103_spill] sm:$0xff] }
 0xa60   :  { %5128 = vmatprep.subr.mxu0 %v8148_v34  ;;  %6866 = vmatprep.subr.mxu1 %v8560_v24 }
 0xa61   :  { %5129 = vmatpush1.msra.mxu0 %v8152_v22  ;;  %6867 = vmatpush3.msra.mxu1 %v8155_v29 }
 0xa62   :  { %5130 = vmatprep.subr.mxu0 %v8158_v28  ;;  %6868 = vmatprep.subr.mxu1 %v8560_v24  ;;  %v8612_v28 = vld [vmem:[#allocation104_spill] sm:$0xff] }
 0xa63   :  { %5131 = vmatpush1.msra.mxu0 %v8162_v20  ;;  %6869 = vmatpush3.msra.mxu1 %v8283_v26  ;;  %v5292_v26 = vld [vmem:[#allocation13 + $0x50] sm:$0xff] }
 0xa64   :  { %5132 = vmatprep.subr.mxu0 %v8166_v21  ;;  %6870 = vmatprep.subr.mxu1 %v8560_v24 }
 0xa65   :  { %5133 = vmatpush1.msra.mxu0 %v8170_v1  ;;  %6871 = vmatpush3.msra.mxu1 %v8289_v58  ;;  %v5291_v58 = vld [vmem:[#allocation13 + $0x48] sm:$0xff] }
 0xa66   :  { %5134 = vmatprep.subr.mxu0 %v8174_v30  ;;  %6872 = vmatprep.subr.mxu1 %v8560_v24 }
 0xa67   :  { %5135 = vmatpush1.msra.mxu0 %v8178_v33  ;;  %6873 = vmatpush3.msra.mxu1 %v8295_v31  ;;  %v5290_v31 = vld [vmem:[#allocation13 + $0x40] sm:$0xff] }
 0xa68   :  { %5136 = vmatprep.subr.mxu0 %v8182_v11  ;;  %6874 = vmatprep.subr.mxu1 %v8560_v24 }
 0xa69   :  { %5137 = vmatpush1.msra.mxu0 %v8186_v36  ;;  %6875 = vmatpush3.msra.mxu1 %v8301_v60  ;;  %v5289_v60 = vld [vmem:[#allocation13 + $0x38] sm:$0xff] }
 0xa6a   :  { %5138 = vmatprep.subr.mxu0 %v8190_v12  ;;  %6876 = vmatprep.subr.mxu1 %v8560_v24 }
 0xa6b   :  { %5139 = vmatpush1.msra.mxu0 %v8194_v38  ;;  %6877 = vmatpush3.msra.mxu1 %v8307_v61  ;;  %v8613_v38 = vld [vmem:[#allocation114_spill] sm:$0xff]  ;;  %v5288_v61 = vld [vmem:[#allocation13 + $0x30] sm:$0xff] }
 0xa6c   :  { %5140 = vmatprep.subr.mxu0 %v8198_v13  ;;  %6878 = vmatprep.subr.mxu1 %v8560_v24 }
 0xa6d   :  { %5141 = vmatpush1.msra.mxu0 %v8202_v39  ;;  %6879 = vmatpush3.msra.mxu1 %v8313_v0  ;;  %v5287_v0 = vld [vmem:[#allocation13 + $0x28] sm:$0xff] }
 0xa6e   :  { %5142 = vmatprep.subr.mxu0 %v8206_v14  ;;  %6880 = vmatprep.subr.mxu1 %v8560_v24 }
 0xa6f   :  { %5143 = vmatpush1.msra.mxu0 %v8210_v43  ;;  %6881 = vmatpush3.msra.mxu1 %v8319_v7  ;;  %v5286_v7 = vld [vmem:[#allocation13 + $0x20] sm:$0xff] }
 0xa70   :  { %5144 = vmatprep.subr.mxu0 %v8214_v15  ;;  %6882 = vmatprep.subr.mxu1 %v8560_v24 }
 0xa71   :  { %5145 = vmatpush1.msra.mxu0 %v8218_v44  ;;  %6883 = vmatpush3.msra.mxu1 %v8325_v8  ;;  %v5285_v8 = vld [vmem:[#allocation13 + $0x18] sm:$0xff] }
 0xa72   :  { %5146 = vmatprep.subr.mxu0 %v8222_v16  ;;  %6884 = vmatprep.subr.mxu1 %v8560_v24 }
 0xa73   :  { %5147 = vmatpush1.msra.mxu0 %v8226_v45  ;;  %6885 = vmatpush3.msra.mxu1 %v8331_v9  ;;  %v5296_v45 = vld [vmem:[#allocation13 + $0x70] sm:$0xff] }
 0xa74   :  { %5148 = vmatprep.subr.mxu0 %v8230_v17  ;;  %6886 = vmatprep.subr.mxu1 %v8560_v24  ;;  %v8614_v17 = vld [vmem:[#allocation115_spill] sm:$0xff]  ;;  %v5284_v9 = vld [vmem:[#allocation13 + $0x10] sm:$0xff] }
 0xa75   :  { %5149 = vmatpush1.msra.mxu0 %v8605_v53  ;;  %6887 = vmatpush3.msra.mxu1 %v8606_v35 }
 0xa76   :  { %5150 = vmatprep.subr.mxu0 %v8607_v4  ;;  %6888 = vmatprep.subr.mxu1 %v8560_v24  ;;  %v8619_v4 = vld [vmem:[#allocation108_spill] sm:$0xff] }
 0xa77   :  { %5151 = vmatpush1.msra.mxu0 %v8608_v37  ;;  %5184 = vmatprep.mubr.f32.mxu0 %v8560_v24 }
 0xa78   :  { %6889 = vmatpush3.msra.mxu1 %v8609_v25  ;;  %6890 = vmatprep.mubr.msk.f32.mxu1 %vm7210_vm0, %v8560_v24 }
 0xa79   :  { %6893 = vmatprep.subr.mxu0 %v5297_v27 }
 0xb18   :  { %v5024_v48 = vpop.f32.mrf.mxu0  ;;  %v5095_v23 = vpop.f32.mrf.mxu1 }
 0xb19   :  { %v5025_v63 = vadd.f32 %v5024_v48, %v8610_v62  ;;  %v5096_v11 = vadd.f32 %v5095_v23, %v7868_v40  ;;  %v6279_v48 = vld [vmem:[%s8491_s12] ss:$0 sm:$0xff] }
 0xb1a   :  { %v5026_v59 = vpop.f32.mrf.mxu0  ;;  %v6857_v5 = vpop.f32.mrf.mxu1 }
 0xb1b   :  { %v5099_v34 = vadd.f32 %v5025_v63, %v8611_v47  ;;  %v5027_v29 = vadd.f32 %v5026_v59, %v7853_v19 }
 0xb1d   :  { %v6275_v22 = vmul.f32 -1.442695, %v5099_v34  ;;  %v5106_v20 = vadd.f32 %v5027_v29, %v8612_v28 }
 0xb1f   :  { %7009 = vpow2.f32 %v6275_v22  ;;  %v6276_v21 = vmul.f32 -1.442695, %v5106_v20  ;;  %v8620_v20 = vld [vmem:[#allocation113_spill] sm:$0xff] }
 0xb21   :  { %7011 = vpow2.f32 %v6276_v21 }
 0xb2c   :  { %v7010_v1 = vpop.eup %7009 }
 0xb2d   :  { %v5103_v24 = vadd.f32 1.0, %v7010_v1 }
 0xb2e   :  { %v7012_v30 = vpop.eup %7011 }
 0xb2f   :  { %7013 = vrcp.f32 %v5103_v24  ;;  %v5110_v33 = vadd.f32 1.0, %v7012_v30 }
 0xb31   :  { %7015 = vrcp.f32 %v5110_v33 }
 0xb3c   :  { %v7014_v36 = vpop.eup %7013 }
 0xb3d   :  { %v5113_v12 = vmul.f32 %v7014_v36, %v5096_v11 }
 0xb3e   :  { %v7016_v39 = vpop.eup %7015 }
 0xb3f   :  { %v5114_v13 = vadd.f32 %v5113_v12, %v8613_v38  ;;  %v5116_v14 = vsub.f32 1.0, %v7016_v39  ;;  %v5118_v44 = vmul.f32 %v7016_v39, %v8358_v42 }
 0xb41   :  { %7017 = vtanh.f32 %v5114_v13 }
 0xb4e   :  { %v7018_v43 = vpop.eup %7017 }
 0xb4f   :  { %v5117_v15 = vmul.f32 %v7018_v43, %v5116_v14 }
 0xb51   :  { %v8434_v16 = vadd.f32 %v5118_v44, %v5117_v15 }
 0xb53   :  { %5185 = vmatmul.mubr.f32.vlgmr.msra.gmra.mxu0 %v8434_v16  ;;  %6891 = vmatmul.mubr.f32.vlgmr.msra.gmra.mxu1 %v8434_v16 }
 0xb54   :  { %6894 = vmatpush3.msra.mxu0 %v5297_v27  ;;  %6925 = vmatprep.mubr.f32.mxu0 %v8614_v17 }
 0xb55   :  { %6895 = vmatprep.subr.mxu0 %v5296_v45 }
 0xb56   :  { %6896 = vmatpush3.msra.mxu0 %v5296_v45 }
 0xb57   :  { %6897 = vmatprep.subr.mxu0 %v5295_v46 }
 0xb58   :  { %6898 = vmatpush3.msra.mxu0 %v5295_v46 }
 0xb59   :  { %6899 = vmatprep.subr.mxu0 %v5294_v18 }
 0xb5a   :  { %6900 = vmatpush3.msra.mxu0 %v5294_v18 }
 0xb5b   :  { %6901 = vmatprep.subr.mxu0 %v5293_v49 }
 0xb5c   :  { %6902 = vmatpush3.msra.mxu0 %v5293_v49 }
 0xb5d   :  { %6903 = vmatprep.subr.mxu0 %v5292_v26 }
 0xb5e   :  { %6904 = vmatpush3.msra.mxu0 %v5292_v26 }
 0xb5f   :  { %6905 = vmatprep.subr.mxu0 %v5291_v58 }
 0xb60   :  { %6906 = vmatpush3.msra.mxu0 %v5291_v58 }
 0xb61   :  { %6907 = vmatprep.subr.mxu0 %v5290_v31 }
 0xb62   :  { %6908 = vmatpush3.msra.mxu0 %v5290_v31 }
 0xb63   :  { %6909 = vmatprep.subr.mxu0 %v5289_v60 }
 0xb64   :  { %6910 = vmatpush3.msra.mxu0 %v5289_v60 }
 0xb65   :  { %6911 = vmatprep.subr.mxu0 %v5288_v61 }
 0xb66   :  { %6912 = vmatpush3.msra.mxu0 %v5288_v61 }
 0xb67   :  { %6913 = vmatprep.subr.mxu0 %v5287_v0 }
 0xb68   :  { %6914 = vmatpush3.msra.mxu0 %v5287_v0 }
 0xb69   :  { %6915 = vmatprep.subr.mxu0 %v5286_v7 }
 0xb6a   :  { %6916 = vmatpush3.msra.mxu0 %v5286_v7 }
 0xb6b   :  { %6917 = vmatprep.subr.mxu0 %v5285_v8 }
 0xb6c   :  { %6918 = vmatpush3.msra.mxu0 %v5285_v8 }
 0xb6d   :  { %6919 = vmatprep.subr.mxu0 %v5284_v9 }
 0xb6e   :  { %6920 = vmatpush3.msra.mxu0 %v5284_v9 }
 0xb6f   :  { %6921 = vmatprep.subr.mxu0 %v5283_v10 }
 0xb70   :  { %6922 = vmatpush3.msra.mxu0 %v5283_v10 }
 0xb71   :  { %6923 = vmatprep.subr.mxu0 %v5282_v41 }
 0xb72   :  { %6924 = vmatpush3.msra.mxu0 %v5282_v41 }
 0xb73   :  { %6926 = vmatmul.mubr.f32.vlgmr.msra.gmra.mxu0 %v8615_v2 }
 0xb74   :  { %6928 = vmatprep.mubr.f32.mxu0 %v8616_v32 }
 0xb77   :  { %6929 = vmatmul.mubr.f32.gmra.mxu0 %v8617_v6 }
 0xb78   :  { %6931 = vmatprep.mubr.f32.mxu0 %v8258_v57 }
 0xb7b   :  { %6932 = vmatmul.mubr.f32.gmra.mxu0 %v8358_v42 }
 0xb7c   :  { %6934 = vmatprep.mubr.f32.mxu0 %v8434_v16 }
 0xc13   :  { %v5186_v51 = vpop.f32.mrf.mxu0  ;;  %v5257_v54 = vpop.f32.mrf.mxu1 }
 0xc14   :  { %v5187_v52 = vadd.f32 %v5186_v51, %v8610_v62  ;;  %v5258_v5 = vadd.f32 %v5257_v54, %v7868_v40 }
 0xc15   :  { %v5188_v50 = vpop.f32.mrf.mxu0  ;;  %v6892_v55 = vpop.f32.mrf.mxu1 }
 0xc16   :  { %v5261_v3 = vadd.f32 %v5187_v52, %v8618_v56  ;;  %v5189_v35 = vadd.f32 %v5188_v50, %v7853_v19 }
 0xc18   :  { %v6277_v53 = vmul.f32 -1.442695, %v5261_v3  ;;  %v5268_v37 = vadd.f32 %v5189_v35, %v8619_v4 }
 0xc1a   :  { %7019 = vpow2.f32 %v6277_v53  ;;  %v6278_v25 = vmul.f32 -1.442695, %v5268_v37 }
 0xc1c   :  { %7021 = vpow2.f32 %v6278_v25 }
 0xc27   :  { %v7020_v57 = vpop.eup %7019 }
 0xc28   :  { %v5265_v42 = vadd.f32 1.0, %v7020_v57 }
 0xc29   :  { %v7022_v27 = vpop.eup %7021 }
 0xc2a   :  { %7023 = vrcp.f32 %v5265_v42  ;;  %v5272_v62 = vadd.f32 1.0, %v7022_v27 }
 0xc2c   :  { %7025 = vrcp.f32 %v5272_v62 }
 0xc33   :  { %v6927_v23 = vpop.f32.mrf.mxu0 }
 0xc34   :  { %v5377_v63 = vadd.f32 %v6927_v23, %v6279_v48 }
 0xc35   :  { %v5371_v59 = vpop.f32.mrf.mxu0 }
 0xc36   :  { %5411 = vst [vmem:[%s8492_s13 + $0x8] sm:$0xff] %v5377_v63  ;;  %v5372_v19 = vadd.f32 %v6279_v48, %v5371_v59 }
 0xc37   :  { %v7024_v47 = vpop.eup %7023  ;;  %v6930_v34 = vpop.f32.mrf.mxu0 }
 0xc38   :  { %v5275_v22 = vmul.f32 %v7024_v47, %v5258_v5  ;;  %5410 = vst [vmem:[%s8492_s13] sm:$0xff] %v5372_v19  ;;  %v5387_v29 = vadd.f32 %v6930_v34, %v6279_v48 }
 0xc39   :  { %v5381_v28 = vpop.f32.mrf.mxu0  ;;  %v7026_v11 = vpop.eup %7025 }
 0xc3a   :  { %v5276_v21 = vadd.f32 %v5275_v22, %v8620_v20  ;;  %5413 = vst [vmem:[%s8492_s13 + $0x18] sm:$0xff] %v5387_v29  ;;  %v5382_v40 = vadd.f32 %v6279_v48, %v5381_v28  ;;  %v5278_v36 = vsub.f32 1.0, %v7026_v11  ;;  %v5280_v13 = vmul.f32 %v7026_v11, %v8434_v16 }
 0xc3b   :  { %v6933_v1 = vpop.f32.mrf.mxu0 }
 0xc3c   :  { %7027 = vtanh.f32 %v5276_v21  ;;  %5412 = vst [vmem:[%s8492_s13 + $0x10] sm:$0xff] %v5382_v40  ;;  %v5397_v24 = vadd.f32 %v6933_v1, %v6279_v48 }
 0xc3d   :  { %v5391_v30 = vpop.f32.mrf.mxu0 }
 0xc3e   :  { %5415 = vst [vmem:[%s8492_s13 + $0x28] sm:$0xff] %v5397_v24  ;;  %v5392_v33 = vadd.f32 %v6279_v48, %v5391_v30 }
 0xc40   :  { %5414 = vst [vmem:[%s8492_s13 + $0x20] sm:$0xff] %v5392_v33 }
 0xc49   :  { %v7028_v12 = vpop.eup %7027 }
 0xc4a   :  { %v5279_v38 = vmul.f32 %v7028_v12, %v5278_v36 }
 0xc4c   :  { %v5281_v39 = vadd.f32 %v5280_v13, %v5279_v38 }
 0xc4e   :  { %6935 = vmatmul.mubr.f32.gmra.mxu0 %v5281_v39 }
 0xd0e   :  { %v6936_v14 = vpop.f32.mrf.mxu0 }
 0xd0f   :  { %v5407_v43 = vadd.f32 %v6936_v14, %v6279_v48 }
 0xd10   :  { %v5401_v15 = vpop.f32.mrf.mxu0 }
 0xd11   :  { %5417 = vst [vmem:[%s8492_s13 + $0x38] sm:$0xff] %v5407_v43  ;;  %v5402_v44 = vadd.f32 %v6279_v48, %v5401_v15 }
 0xd13   :  { %5416 = vst [vmem:[%s8492_s13 + $0x30] sm:$0xff] %v5402_v44 }
 0xd14   :  { %5422 = vsyncpa [#allocation7], 1 }
 0xd15   :  { %5423 = vsyncpa [#allocation9], 1 }
 0xd16   :  { %5424 = vsyncpa [#allocation12], 1 }
 0xd17   :  { %5425 = vsyncmov [#allocation3] }
 0xd1a   :  { %s5426_s22 = vpop.sfrf %5425 }
 0xd1b   :  { %p6280_p2 = scmp.ne.s32.totalorder %s5426_s22, 0 }
 0xd1d   :  { %5430 = shalt.err (%p6280_p2)  }

</bundles_post_ra>
